<compile_context>
chip_gen: v6e
topology: v6e:2x2x1
jax: 0.10.0
libtpu: 0.0.40
codegen_flags: <defaults>
</compile_context>

<pallas_src>
import numpy as np
import jax
import jax.numpy as jnp
from jax.experimental import pallas as pl
from jax.experimental.pallas import tpu as pltpu

HIDDEN_DIM = 256
TAIL_SPECTRO_DIM = 256
TAIL_PHASE_DIM = 256
FEATURE_DIM = 64
NUM_FREQS = 10                       # positional_encoding(num_freqs=10)
# features_srcs(64) + features_mics(64) + pos_enc(6*20) + freqs_enc(20) + times_enc(20)
INPUT_DIM = FEATURE_DIM * 2 + 6 * 2 * NUM_FREQS + 2 * NUM_FREQS + 2 * NUM_FREQS  # 288


# ---------------------------------------------------------------- Pallas kernel
def naf_mlp_kernel(x_ref,
                   w1, b1, w2, b2, w3, b3, w4, b4,          # block1
                   tw, tb,                                   # fused tail entry (s1|p1)
                   s2, sb2, s3, sb3,                         # tail1 mids
                   p2, pb2, p3, pb3,                         # tail2 mids
                   hw, hb,                                   # head rows (2,256) + bias (1,2)
                   out_ref):
    def lin(v, w_ref, b_ref):
        # bf16 operands on the MXU, f32 accumulation, f32 bias-add.
        return (jnp.dot(v.astype(jnp.bfloat16), w_ref[...],
                        preferred_element_type=jnp.float32)
                + b_ref[...])

    def lrelu(v):                                            # 2 VALU ops per vreg
        return jnp.maximum(v, 0.1 * v)

    h = x_ref[...]                                           # already bf16; no cast in L1
    h = lrelu(lin(h, w1, b1))
    h = lrelu(lin(h, w2, b2))
    h = lrelu(lin(h, w3, b3))
    h = lrelu(lin(h, w4, b4))                                # (tm, 256) f32

    # Fused tail entry: one (tm,256)x(256,512) matmul, split with static slices.
    t = lrelu(lin(h, tw, tb))                                # (tm, 512)
    t1 = t[:, :HIDDEN_DIM]
    t2 = t[:, HIDDEN_DIM:]

    t1 = lrelu(lin(t1, s2, sb2))
    t1 = lrelu(lin(t1, s3, sb3))                             # (tm, 256)
    t2 = lrelu(lin(t2, p2, pb2))
    t2 = lrelu(lin(t2, p3, pb3))                             # (tm, 256)

    # Heads off the MXU: VPU broadcast-multiply + XLU lane reduce per head.
    o0 = jnp.sum(t1 * hw[0:1, :], axis=-1, keepdims=True)    # (tm, 1) f32
    o1 = jnp.sum(t2 * hw[1:2, :], axis=-1, keepdims=True)    # (tm, 1) f32
    # TODO(synk): output block is (tm, 2) -> masked vst; lane-dense output layout
    # skipped per review (tiny fixed saving, complicates the wrapper).
    out_ref[...] = (jnp.concatenate([o0, o1], axis=-1) + hb[...]).astype(out_ref.dtype)


def pack_mlp_weights(mlp):
    """Fuse tail-entry layers, build VPU head rows, cast matmul weights to bf16."""
    (w1, b1, w2, b2, w3, b3, w4, b4,
     s1, sb1, s2, sb2, s3, sb3, s4, sb4,
     p1, pb1, p2, pb2, p3, pb3, p4, pb4) = mlp

    tw = jnp.concatenate([s1, p1], axis=1)                   # (256, 512)
    tb = jnp.concatenate([sb1, pb1], axis=1)                 # (1, 512)

    # Head weights stay f32 rows: consumed by the VPU, not the MXU.
    hw = jnp.concatenate([s4.T, p4.T], axis=0)               # (2, 256) f32
    hb = jnp.concatenate([sb4, pb4], axis=1)                 # (1, 2)   f32

    matmul_ws = [w1, w2, w3, w4, tw, s2, s3, p2, p3]
    biases = [b1, b2, b3, b4, tb, sb2, sb3, pb2, pb3]
    packed = []
    for w, b in zip(matmul_ws, biases):
        packed.append(w.astype(jnp.bfloat16))                # MXU operands in bf16
        packed.append(b.astype(jnp.float32))                 # bias-add stays f32
    packed.append(hw.astype(jnp.float32))
    packed.append(hb.astype(jnp.float32))
    # TODO(synk): optional fp8 weight quantization for the v7x MXU not implemented.
    return tuple(packed)


def naf_mlp(x, packed_weights, *, tm=512):
    """x: (N, INPUT_DIM) f32 -> (N, 2) f32 via the Pallas MLP kernel."""
    N, D = x.shape

    # Adaptive row tile: never pad a tiny batch up to a full tm-row tile.
    tm_eff = min(tm, max(64, -(-N // 64) * 64))
    tm_eff = -(-tm_eff // 64) * 64          # sublane-aligned for bf16 (mult of 16)
    tiles = pl.cdiv(N, tm_eff)              # plain ceil; no even-grid round-up
    n_pad = tiles * tm_eff

    # bf16 cast fused with the (optional) row pad: halves input DMA + x VMEM.
    x = x.astype(jnp.bfloat16)
    if n_pad != N:
        x = jnp.pad(x, ((0, n_pad - N), (0, 0)))

    # Weights (~1.3 MB) stay fully resident in VMEM via constant index_maps.
    # TODO(synk): single-buffer the resident weights (pipeline_mode=pl.Buffered(1))
    # once verified on all target generations; minor VMEM/bookkeeping saving only.
    w_specs = [pl.BlockSpec(w.shape, lambda i: (0, 0)) for w in packed_weights]

    out = pl.pallas_call(
        naf_mlp_kernel,
        out_shape=jax.ShapeDtypeStruct((n_pad, 2), jnp.float32),
        grid_spec=pltpu.PrefetchScalarGridSpec(
            num_scalar_prefetch=0,
            grid=(tiles,),
            in_specs=[pl.BlockSpec((tm_eff, D), lambda i: (i, 0))] + w_specs,
            out_specs=pl.BlockSpec((tm_eff, 2), lambda i: (i, 0)),
        ),
        compiler_params=pltpu.CompilerParams(
            dimension_semantics=("parallel",),
            vmem_limit_bytes=32 * 1024 * 1024),
    )(x, *packed_weights)
    return out[:N]


# ---------------------------------------------------------------- JAX glue
def penc(x, axis, num_freqs=NUM_FREQS):
    """Matches positional_encoding: [sin(x*f) for f] + [cos(x*f) for f], f = 2^j * pi."""
    freqs = (2.0 ** jnp.arange(num_freqs, dtype=jnp.float32)) * jnp.pi
    outs = [jnp.sin(x * f) for f in freqs] + [jnp.cos(x * f) for f in freqs]
    return jnp.concatenate(outs, axis=axis)


def naf_forward(params, srcs, mics, freqs, times, noise_key):
    B, S = freqs.shape
    srcs_xy = srcs[:, :2]
    mics_xy = mics[:, :2]

    pos = jnp.concatenate([srcs, mics], axis=1)                       # (B, 6)
    # Matches reference forward(): unconditional training-time position jitter.
    pos = pos + jax.random.uniform(noise_key, pos.shape, dtype=pos.dtype) * 0.05
    pos_e = penc(pos, axis=1)                                         # (B, 120)
    pos_e = jnp.broadcast_to(pos_e[:, None, :], (B, S, pos_e.shape[-1]))

    freqs_e = penc(freqs[..., None], axis=2)                          # (B, S, 20)
    times_e = penc(times[..., None], axis=2)                          # (B, S, 20)

    # TODO(synk): cKDTree k=1 query replaced with exact brute-force argmin (same result).
    def nearest_idx(q):
        d = jnp.sum((q[:, None, :] - params["grid_xy"][None, :, :]) ** 2, axis=-1)
        return jnp.argmin(d, axis=-1)

    feat_s = params["grid_0"][nearest_idx(srcs_xy)]                   # (B, 64)
    feat_m = params["grid_0"][nearest_idx(mics_xy)]                   # (B, 64)
    feat_s = jnp.broadcast_to(feat_s[:, None, :], (B, S, FEATURE_DIM))
    feat_m = jnp.broadcast_to(feat_m[:, None, :], (B, S, FEATURE_DIM))

    x = jnp.concatenate([feat_s, feat_m, pos_e, freqs_e, times_e], axis=2)  # (B, S, 288)
    out = naf_mlp(x.reshape(B * S, INPUT_DIM), params["mlp_packed"])
    return out.reshape(B, S, 2)


# ---------------------------------------------------------------- parameter init
def init_linear(key, fan_in, fan_out):
    kw, kb = jax.random.split(key)
    w = jax.random.normal(kw, (fan_in, fan_out), jnp.float32) / np.sqrt(float(fan_in))
    b = jax.random.normal(kb, (1, fan_out), jnp.float32) * 0.01
    return w, b


def init_params(key, min_xy=(-1.0, -1.0), max_xy=(1.0, 1.0), grid_density=0.1):
    keys = jax.random.split(key, 16)
    mlp = []
    # block1: 288->256, 256->256 x3
    dims = [(INPUT_DIM, HIDDEN_DIM), (HIDDEN_DIM, HIDDEN_DIM),
            (HIDDEN_DIM, HIDDEN_DIM), (HIDDEN_DIM, HIDDEN_DIM)]
    # tail1: 256->256 x3, 256->1
    dims += [(HIDDEN_DIM, TAIL_SPECTRO_DIM), (TAIL_SPECTRO_DIM, TAIL_SPECTRO_DIM),
             (TAIL_SPECTRO_DIM, TAIL_SPECTRO_DIM), (TAIL_SPECTRO_DIM, 1)]
    # tail2: 256->256 x3, 256->1
    dims += [(HIDDEN_DIM, TAIL_PHASE_DIM), (TAIL_PHASE_DIM, TAIL_PHASE_DIM),
             (TAIL_PHASE_DIM, TAIL_PHASE_DIM), (TAIL_PHASE_DIM, 1)]
    for i, (fi, fo) in enumerate(dims):
        w, b = init_linear(keys[i], fi, fo)
        mlp += [w, b]
    mlp = tuple(mlp)

    gx = np.arange(min_xy[0], max_xy[0], grid_density)
    gy = np.arange(min_xy[1], max_xy[1], grid_density)
    GX, GY = np.meshgrid(gx, gy)
    grid_xy = np.stack([GX.flatten(), GY.flatten()], axis=1).astype(np.float32)  # (G, 2)
    grid_0 = (jax.random.normal(keys[14], (grid_xy.shape[0], FEATURE_DIM), jnp.float32)
              / np.sqrt(float(FEATURE_DIM)))

    return {"mlp": mlp,
            "mlp_packed": pack_mlp_weights(mlp),   # fused + bf16-cast, done once at init
            "grid_xy": jnp.asarray(grid_xy),
            "grid_0": grid_0}


# ---------------------------------------------------------------- main
if __name__ == "__main__":
    key = jax.random.PRNGKey(0)
    k_param, k_src, k_mic, k_f, k_t, k_noise = jax.random.split(key, 6)

    params = init_params(k_param)

    B, SAMPLES = 2, 8
    srcs = jax.random.uniform(k_src, (B, 3), jnp.float32, minval=-1.0, maxval=1.0)
    mics = jax.random.uniform(k_mic, (B, 3), jnp.float32, minval=-1.0, maxval=1.0)
    freqs = jax.random.uniform(k_f, (B, SAMPLES), jnp.float32, minval=-1.0, maxval=1.0)
    times = jax.random.uniform(k_t, (B, SAMPLES), jnp.float32, minval=-1.0, maxval=1.0)

    out = naf_forward(params, srcs, mics, freqs, times, k_noise)
    out = jax.block_until_ready(out)
    assert out.shape == (B, SAMPLES, 2) and out.dtype == jnp.float32
    assert bool(jnp.all(jnp.isfinite(out)))
    print("KERNEL_OK")
</pallas_src>

<mosaic_0001>
module attributes {stable_mosaic.version = 11 : i64} {
  func.func @naf_mlp_kernel(%arg0: i32, %arg1: memref<64x288xbf16, #tpu.memory_space<vmem>>, %arg2: memref<288x256xbf16, #tpu.memory_space<vmem>>, %arg3: memref<1x256xf32, #tpu.memory_space<vmem>>, %arg4: memref<256x256xbf16, #tpu.memory_space<vmem>>, %arg5: memref<1x256xf32, #tpu.memory_space<vmem>>, %arg6: memref<256x256xbf16, #tpu.memory_space<vmem>>, %arg7: memref<1x256xf32, #tpu.memory_space<vmem>>, %arg8: memref<256x256xbf16, #tpu.memory_space<vmem>>, %arg9: memref<1x256xf32, #tpu.memory_space<vmem>>, %arg10: memref<256x512xbf16, #tpu.memory_space<vmem>>, %arg11: memref<1x512xf32, #tpu.memory_space<vmem>>, %arg12: memref<256x256xbf16, #tpu.memory_space<vmem>>, %arg13: memref<1x256xf32, #tpu.memory_space<vmem>>, %arg14: memref<256x256xbf16, #tpu.memory_space<vmem>>, %arg15: memref<1x256xf32, #tpu.memory_space<vmem>>, %arg16: memref<256x256xbf16, #tpu.memory_space<vmem>>, %arg17: memref<1x256xf32, #tpu.memory_space<vmem>>, %arg18: memref<256x256xbf16, #tpu.memory_space<vmem>>, %arg19: memref<1x256xf32, #tpu.memory_space<vmem>>, %arg20: memref<2x256xf32, #tpu.memory_space<vmem>>, %arg21: memref<1x2xf32, #tpu.memory_space<vmem>>, %arg22: memref<64x2xf32, #tpu.memory_space<vmem>>) attributes {dimension_semantics = [#tpu.dimension_semantics<parallel>], iteration_bounds = array<i64: 1>, scalar_prefetch = 0 : i64, scratch_operands = 0 : i64, tpu.core_type = #tpu.core_type<tc>, window_params = [{transform_indices = @transform_0, window_bounds = array<i64: 64, 288>}, {pipeline_mode = #tpu.pipeline_mode<synchronous>, transform_indices = @transform_1, window_bounds = array<i64: 288, 256>}, {pipeline_mode = #tpu.pipeline_mode<synchronous>, transform_indices = @transform_2, window_bounds = array<i64: 1, 256>}, {pipeline_mode = #tpu.pipeline_mode<synchronous>, transform_indices = @transform_3, window_bounds = array<i64: 256, 256>}, {pipeline_mode = #tpu.pipeline_mode<synchronous>, transform_indices = @transform_4, window_bounds = array<i64: 1, 256>}, {pipeline_mode = #tpu.pipeline_mode<synchronous>, transform_indices = @transform_5, window_bounds = array<i64: 256, 256>}, {pipeline_mode = #tpu.pipeline_mode<synchronous>, transform_indices = @transform_6, window_bounds = array<i64: 1, 256>}, {pipeline_mode = #tpu.pipeline_mode<synchronous>, transform_indices = @transform_7, window_bounds = array<i64: 256, 256>}, {pipeline_mode = #tpu.pipeline_mode<synchronous>, transform_indices = @transform_8, window_bounds = array<i64: 1, 256>}, {pipeline_mode = #tpu.pipeline_mode<synchronous>, transform_indices = @transform_9, window_bounds = array<i64: 256, 512>}, {pipeline_mode = #tpu.pipeline_mode<synchronous>, transform_indices = @transform_10, window_bounds = array<i64: 1, 512>}, {pipeline_mode = #tpu.pipeline_mode<synchronous>, transform_indices = @transform_11, window_bounds = array<i64: 256, 256>}, {pipeline_mode = #tpu.pipeline_mode<synchronous>, transform_indices = @transform_12, window_bounds = array<i64: 1, 256>}, {pipeline_mode = #tpu.pipeline_mode<synchronous>, transform_indices = @transform_13, window_bounds = array<i64: 256, 256>}, {pipeline_mode = #tpu.pipeline_mode<synchronous>, transform_indices = @transform_14, window_bounds = array<i64: 1, 256>}, {pipeline_mode = #tpu.pipeline_mode<synchronous>, transform_indices = @transform_15, window_bounds = array<i64: 256, 256>}, {pipeline_mode = #tpu.pipeline_mode<synchronous>, transform_indices = @transform_16, window_bounds = array<i64: 1, 256>}, {pipeline_mode = #tpu.pipeline_mode<synchronous>, transform_indices = @transform_17, window_bounds = array<i64: 256, 256>}, {pipeline_mode = #tpu.pipeline_mode<synchronous>, transform_indices = @transform_18, window_bounds = array<i64: 1, 256>}, {pipeline_mode = #tpu.pipeline_mode<synchronous>, transform_indices = @transform_19, window_bounds = array<i64: 2, 256>}, {pipeline_mode = #tpu.pipeline_mode<synchronous>, transform_indices = @transform_20, window_bounds = array<i64: 1, 2>}, {transform_indices = @transform_21, window_bounds = array<i64: 64, 2>}]} {
    %c0 = arith.constant 0 : index
    %c0_0 = arith.constant 0 : index
    %0 = vector.load %arg1[%c0, %c0_0] : memref<64x288xbf16, #tpu.memory_space<vmem>>, vector<64x288xbf16>
    %c0_1 = arith.constant 0 : index
    %c0_2 = arith.constant 0 : index
    %1 = vector.load %arg2[%c0_1, %c0_2] : memref<288x256xbf16, #tpu.memory_space<vmem>>, vector<288x256xbf16>
    %cst = arith.constant dense<0.000000e+00> : vector<64x256xf32>
    %2 = tpu.matmul %0, %1, %cst {dimension_numbers = #tpu.dot_dimension_numbers<[1], [0], [0], [1], [0, 0, 1, 1], [], []>} : vector<64x288xbf16>, vector<288x256xbf16>, vector<64x256xf32> -> vector<64x256xf32>
    %c0_3 = arith.constant 0 : index
    %c0_4 = arith.constant 0 : index
    %3 = vector.load %arg3[%c0_3, %c0_4] : memref<1x256xf32, #tpu.memory_space<vmem>>, vector<1x256xf32>
    %4 = vector.broadcast %3 : vector<1x256xf32> to vector<64x256xf32>
    %5 = arith.addf %2, %4 : vector<64x256xf32>
    %cst_5 = arith.constant 1.000000e-01 : f32
    %6 = vector.broadcast %cst_5 : f32 to vector<64x256xf32>
    %7 = arith.mulf %6, %5 : vector<64x256xf32>
    %8 = arith.maximumf %5, %7 : vector<64x256xf32>
    %9 = arith.truncf %8 : vector<64x256xf32> to vector<64x256xbf16>
    %c0_6 = arith.constant 0 : index
    %c0_7 = arith.constant 0 : index
    %10 = vector.load %arg4[%c0_6, %c0_7] : memref<256x256xbf16, #tpu.memory_space<vmem>>, vector<256x256xbf16>
    %cst_8 = arith.constant dense<0.000000e+00> : vector<64x256xf32>
    %11 = tpu.matmul %9, %10, %cst_8 {dimension_numbers = #tpu.dot_dimension_numbers<[1], [0], [0], [1], [0, 0, 1, 1], [], []>} : vector<64x256xbf16>, vector<256x256xbf16>, vector<64x256xf32> -> vector<64x256xf32>
    %c0_9 = arith.constant 0 : index
    %c0_10 = arith.constant 0 : index
    %12 = vector.load %arg5[%c0_9, %c0_10] : memref<1x256xf32, #tpu.memory_space<vmem>>, vector<1x256xf32>
    %13 = vector.broadcast %12 : vector<1x256xf32> to vector<64x256xf32>
    %14 = arith.addf %11, %13 : vector<64x256xf32>
    %cst_11 = arith.constant 1.000000e-01 : f32
    %15 = vector.broadcast %cst_11 : f32 to vector<64x256xf32>
    %16 = arith.mulf %15, %14 : vector<64x256xf32>
    %17 = arith.maximumf %14, %16 : vector<64x256xf32>
    %18 = arith.truncf %17 : vector<64x256xf32> to vector<64x256xbf16>
    %c0_12 = arith.constant 0 : index
    %c0_13 = arith.constant 0 : index
    %19 = vector.load %arg6[%c0_12, %c0_13] : memref<256x256xbf16, #tpu.memory_space<vmem>>, vector<256x256xbf16>
    %cst_14 = arith.constant dense<0.000000e+00> : vector<64x256xf32>
    %20 = tpu.matmul %18, %19, %cst_14 {dimension_numbers = #tpu.dot_dimension_numbers<[1], [0], [0], [1], [0, 0, 1, 1], [], []>} : vector<64x256xbf16>, vector<256x256xbf16>, vector<64x256xf32> -> vector<64x256xf32>
    %c0_15 = arith.constant 0 : index
    %c0_16 = arith.constant 0 : index
    %21 = vector.load %arg7[%c0_15, %c0_16] : memref<1x256xf32, #tpu.memory_space<vmem>>, vector<1x256xf32>
    %22 = vector.broadcast %21 : vector<1x256xf32> to vector<64x256xf32>
    %23 = arith.addf %20, %22 : vector<64x256xf32>
    %cst_17 = arith.constant 1.000000e-01 : f32
    %24 = vector.broadcast %cst_17 : f32 to vector<64x256xf32>
    %25 = arith.mulf %24, %23 : vector<64x256xf32>
    %26 = arith.maximumf %23, %25 : vector<64x256xf32>
    %27 = arith.truncf %26 : vector<64x256xf32> to vector<64x256xbf16>
    %c0_18 = arith.constant 0 : index
    %c0_19 = arith.constant 0 : index
    %28 = vector.load %arg8[%c0_18, %c0_19] : memref<256x256xbf16, #tpu.memory_space<vmem>>, vector<256x256xbf16>
    %cst_20 = arith.constant dense<0.000000e+00> : vector<64x256xf32>
    %29 = tpu.matmul %27, %28, %cst_20 {dimension_numbers = #tpu.dot_dimension_numbers<[1], [0], [0], [1], [0, 0, 1, 1], [], []>} : vector<64x256xbf16>, vector<256x256xbf16>, vector<64x256xf32> -> vector<64x256xf32>
    %c0_21 = arith.constant 0 : index
    %c0_22 = arith.constant 0 : index
    %30 = vector.load %arg9[%c0_21, %c0_22] : memref<1x256xf32, #tpu.memory_space<vmem>>, vector<1x256xf32>
    %31 = vector.broadcast %30 : vector<1x256xf32> to vector<64x256xf32>
    %32 = arith.addf %29, %31 : vector<64x256xf32>
    %cst_23 = arith.constant 1.000000e-01 : f32
    %33 = vector.broadcast %cst_23 : f32 to vector<64x256xf32>
    %34 = arith.mulf %33, %32 : vector<64x256xf32>
    %35 = arith.maximumf %32, %34 : vector<64x256xf32>
    %36 = arith.truncf %35 : vector<64x256xf32> to vector<64x256xbf16>
    %c0_24 = arith.constant 0 : index
    %c0_25 = arith.constant 0 : index
    %37 = vector.load %arg10[%c0_24, %c0_25] : memref<256x512xbf16, #tpu.memory_space<vmem>>, vector<256x512xbf16>
    %cst_26 = arith.constant dense<0.000000e+00> : vector<64x512xf32>
    %38 = tpu.matmul %36, %37, %cst_26 {dimension_numbers = #tpu.dot_dimension_numbers<[1], [0], [0], [1], [0, 0, 1, 1], [], []>} : vector<64x256xbf16>, vector<256x512xbf16>, vector<64x512xf32> -> vector<64x512xf32>
    %c0_27 = arith.constant 0 : index
    %c0_28 = arith.constant 0 : index
    %39 = vector.load %arg11[%c0_27, %c0_28] : memref<1x512xf32, #tpu.memory_space<vmem>>, vector<1x512xf32>
    %40 = vector.broadcast %39 : vector<1x512xf32> to vector<64x512xf32>
    %41 = arith.addf %38, %40 : vector<64x512xf32>
    %cst_29 = arith.constant 1.000000e-01 : f32
    %42 = vector.broadcast %cst_29 : f32 to vector<64x512xf32>
    %43 = arith.mulf %42, %41 : vector<64x512xf32>
    %44 = arith.maximumf %41, %43 : vector<64x512xf32>
    %45 = vector.extract_strided_slice %44 {offsets = [0, 0], sizes = [64, 256], strides = [1, 1]} : vector<64x512xf32> to vector<64x256xf32>
    %46 = vector.extract_strided_slice %44 {offsets = [0, 256], sizes = [64, 256], strides = [1, 1]} : vector<64x512xf32> to vector<64x256xf32>
    %47 = arith.truncf %45 : vector<64x256xf32> to vector<64x256xbf16>
    %c0_30 = arith.constant 0 : index
    %c0_31 = arith.constant 0 : index
    %48 = vector.load %arg12[%c0_30, %c0_31] : memref<256x256xbf16, #tpu.memory_space<vmem>>, vector<256x256xbf16>
    %cst_32 = arith.constant dense<0.000000e+00> : vector<64x256xf32>
    %49 = tpu.matmul %47, %48, %cst_32 {dimension_numbers = #tpu.dot_dimension_numbers<[1], [0], [0], [1], [0, 0, 1, 1], [], []>} : vector<64x256xbf16>, vector<256x256xbf16>, vector<64x256xf32> -> vector<64x256xf32>
    %c0_33 = arith.constant 0 : index
    %c0_34 = arith.constant 0 : index
    %50 = vector.load %arg13[%c0_33, %c0_34] : memref<1x256xf32, #tpu.memory_space<vmem>>, vector<1x256xf32>
    %51 = vector.broadcast %50 : vector<1x256xf32> to vector<64x256xf32>
    %52 = arith.addf %49, %51 : vector<64x256xf32>
    %cst_35 = arith.constant 1.000000e-01 : f32
    %53 = vector.broadcast %cst_35 : f32 to vector<64x256xf32>
    %54 = arith.mulf %53, %52 : vector<64x256xf32>
    %55 = arith.maximumf %52, %54 : vector<64x256xf32>
    %56 = arith.truncf %55 : vector<64x256xf32> to vector<64x256xbf16>
    %c0_36 = arith.constant 0 : index
    %c0_37 = arith.constant 0 : index
    %57 = vector.load %arg14[%c0_36, %c0_37] : memref<256x256xbf16, #tpu.memory_space<vmem>>, vector<256x256xbf16>
    %cst_38 = arith.constant dense<0.000000e+00> : vector<64x256xf32>
    %58 = tpu.matmul %56, %57, %cst_38 {dimension_numbers = #tpu.dot_dimension_numbers<[1], [0], [0], [1], [0, 0, 1, 1], [], []>} : vector<64x256xbf16>, vector<256x256xbf16>, vector<64x256xf32> -> vector<64x256xf32>
    %c0_39 = arith.constant 0 : index
    %c0_40 = arith.constant 0 : index
    %59 = vector.load %arg15[%c0_39, %c0_40] : memref<1x256xf32, #tpu.memory_space<vmem>>, vector<1x256xf32>
    %60 = vector.broadcast %59 : vector<1x256xf32> to vector<64x256xf32>
    %61 = arith.addf %58, %60 : vector<64x256xf32>
    %cst_41 = arith.constant 1.000000e-01 : f32
    %62 = vector.broadcast %cst_41 : f32 to vector<64x256xf32>
    %63 = arith.mulf %62, %61 : vector<64x256xf32>
    %64 = arith.maximumf %61, %63 : vector<64x256xf32>
    %65 = arith.truncf %46 : vector<64x256xf32> to vector<64x256xbf16>
    %c0_42 = arith.constant 0 : index
    %c0_43 = arith.constant 0 : index
    %66 = vector.load %arg16[%c0_42, %c0_43] : memref<256x256xbf16, #tpu.memory_space<vmem>>, vector<256x256xbf16>
    %cst_44 = arith.constant dense<0.000000e+00> : vector<64x256xf32>
    %67 = tpu.matmul %65, %66, %cst_44 {dimension_numbers = #tpu.dot_dimension_numbers<[1], [0], [0], [1], [0, 0, 1, 1], [], []>} : vector<64x256xbf16>, vector<256x256xbf16>, vector<64x256xf32> -> vector<64x256xf32>
    %c0_45 = arith.constant 0 : index
    %c0_46 = arith.constant 0 : index
    %68 = vector.load %arg17[%c0_45, %c0_46] : memref<1x256xf32, #tpu.memory_space<vmem>>, vector<1x256xf32>
    %69 = vector.broadcast %68 : vector<1x256xf32> to vector<64x256xf32>
    %70 = arith.addf %67, %69 : vector<64x256xf32>
    %cst_47 = arith.constant 1.000000e-01 : f32
    %71 = vector.broadcast %cst_47 : f32 to vector<64x256xf32>
    %72 = arith.mulf %71, %70 : vector<64x256xf32>
    %73 = arith.maximumf %70, %72 : vector<64x256xf32>
    %74 = arith.truncf %73 : vector<64x256xf32> to vector<64x256xbf16>
    %c0_48 = arith.constant 0 : index
    %c0_49 = arith.constant 0 : index
    %75 = vector.load %arg18[%c0_48, %c0_49] : memref<256x256xbf16, #tpu.memory_space<vmem>>, vector<256x256xbf16>
    %cst_50 = arith.constant dense<0.000000e+00> : vector<64x256xf32>
    %76 = tpu.matmul %74, %75, %cst_50 {dimension_numbers = #tpu.dot_dimension_numbers<[1], [0], [0], [1], [0, 0, 1, 1], [], []>} : vector<64x256xbf16>, vector<256x256xbf16>, vector<64x256xf32> -> vector<64x256xf32>
    %c0_51 = arith.constant 0 : index
    %c0_52 = arith.constant 0 : index
    %77 = vector.load %arg19[%c0_51, %c0_52] : memref<1x256xf32, #tpu.memory_space<vmem>>, vector<1x256xf32>
    %78 = vector.broadcast %77 : vector<1x256xf32> to vector<64x256xf32>
    %79 = arith.addf %76, %78 : vector<64x256xf32>
    %cst_53 = arith.constant 1.000000e-01 : f32
    %80 = vector.broadcast %cst_53 : f32 to vector<64x256xf32>
    %81 = arith.mulf %80, %79 : vector<64x256xf32>
    %82 = arith.maximumf %79, %81 : vector<64x256xf32>
    %c0_54 = arith.constant 0 : index
    %c0_55 = arith.constant 0 : index
    %83 = vector.load %arg20[%c0_54, %c0_55] : memref<2x256xf32, #tpu.memory_space<vmem>>, vector<1x256xf32>
    %84 = vector.broadcast %83 : vector<1x256xf32> to vector<64x256xf32>
    %85 = arith.mulf %64, %84 : vector<64x256xf32>
    %cst_56 = arith.constant dense<0.000000e+00> : vector<64xf32>
    %86 = vector.multi_reduction <add>, %85, %cst_56 [1] : vector<64x256xf32> to vector<64xf32>
    %87 = vector.shape_cast %86 : vector<64xf32> to vector<64x1xf32>
    %c1 = arith.constant 1 : index
    %c0_57 = arith.constant 0 : index
    %88 = vector.load %arg20[%c1, %c0_57] : memref<2x256xf32, #tpu.memory_space<vmem>>, vector<1x256xf32>
    %89 = vector.broadcast %88 : vector<1x256xf32> to vector<64x256xf32>
    %90 = arith.mulf %82, %89 : vector<64x256xf32>
    %cst_58 = arith.constant dense<0.000000e+00> : vector<64xf32>
    %91 = vector.multi_reduction <add>, %90, %cst_58 [1] : vector<64x256xf32> to vector<64xf32>
    %92 = vector.shape_cast %91 : vector<64xf32> to vector<64x1xf32>
    %93 = tpu.concatenate %87, %92 in 1 : vector<64x1xf32>, vector<64x1xf32> -> vector<64x2xf32>
    %c0_59 = arith.constant 0 : index
    %c0_60 = arith.constant 0 : index
    %94 = vector.load %arg21[%c0_59, %c0_60] : memref<1x2xf32, #tpu.memory_space<vmem>>, vector<1x2xf32>
    %95 = vector.broadcast %94 : vector<1x2xf32> to vector<64x2xf32>
    %96 = arith.addf %93, %95 : vector<64x2xf32>
    %c0_61 = arith.constant 0 : index
    %c0_62 = arith.constant 0 : index
    %97 = vector.load %arg22[%c0_61, %c0_62] : memref<64x2xf32, #tpu.memory_space<vmem>>, vector<64x2xf32>
    tpu.vector_store %arg22[%c0_61, %c0_62], %96 {strides = array<i32>} : memref<64x2xf32, #tpu.memory_space<vmem>>, vector<64x2xf32>,
    return
  }
  func.func @transform_0(%arg0: i32) -> (i32, i32) {
    %c0_i32 = arith.constant 0 : i32
    %c0_i32_0 = arith.constant 0 : i32
    return %arg0, %c0_i32 : i32, i32
  }
  func.func @transform_1(%arg0: i32) -> (i32, i32) {
    %c0_i32 = arith.constant 0 : i32
    %c0_i32_0 = arith.constant 0 : i32
    %c0_i32_1 = arith.constant 0 : i32
    return %c0_i32, %c0_i32_0 : i32, i32
  }
  func.func @transform_2(%arg0: i32) -> (i32, i32) {
    %c0_i32 = arith.constant 0 : i32
    %c0_i32_0 = arith.constant 0 : i32
    %c0_i32_1 = arith.constant 0 : i32
    return %c0_i32, %c0_i32_0 : i32, i32
  }
  func.func @transform_3(%arg0: i32) -> (i32, i32) {
    %c0_i32 = arith.constant 0 : i32
    %c0_i32_0 = arith.constant 0 : i32
    %c0_i32_1 = arith.constant 0 : i32
    return %c0_i32, %c0_i32_0 : i32, i32
  }
  func.func @transform_4(%arg0: i32) -> (i32, i32) {
    %c0_i32 = arith.constant 0 : i32
    %c0_i32_0 = arith.constant 0 : i32
    %c0_i32_1 = arith.constant 0 : i32
    return %c0_i32, %c0_i32_0 : i32, i32
  }
  func.func @transform_5(%arg0: i32) -> (i32, i32) {
    %c0_i32 = arith.constant 0 : i32
    %c0_i32_0 = arith.constant 0 : i32
    %c0_i32_1 = arith.constant 0 : i32
    return %c0_i32, %c0_i32_0 : i32, i32
  }
  func.func @transform_6(%arg0: i32) -> (i32, i32) {
    %c0_i32 = arith.constant 0 : i32
    %c0_i32_0 = arith.constant 0 : i32
    %c0_i32_1 = arith.constant 0 : i32
    return %c0_i32, %c0_i32_0 : i32, i32
  }
  func.func @transform_7(%arg0: i32) -> (i32, i32) {
    %c0_i32 = arith.constant 0 : i32
    %c0_i32_0 = arith.constant 0 : i32
    %c0_i32_1 = arith.constant 0 : i32
    return %c0_i32, %c0_i32_0 : i32, i32
  }
  func.func @transform_8(%arg0: i32) -> (i32, i32) {
    %c0_i32 = arith.constant 0 : i32
    %c0_i32_0 = arith.constant 0 : i32
    %c0_i32_1 = arith.constant 0 : i32
    return %c0_i32, %c0_i32_0 : i32, i32
  }
  func.func @transform_9(%arg0: i32) -> (i32, i32) {
    %c0_i32 = arith.constant 0 : i32
    %c0_i32_0 = arith.constant 0 : i32
    %c0_i32_1 = arith.constant 0 : i32
    return %c0_i32, %c0_i32_0 : i32, i32
  }
  func.func @transform_10(%arg0: i32) -> (i32, i32) {
    %c0_i32 = arith.constant 0 : i32
    %c0_i32_0 = arith.constant 0 : i32
    %c0_i32_1 = arith.constant 0 : i32
    return %c0_i32, %c0_i32_0 : i32, i32
  }
  func.func @transform_11(%arg0: i32) -> (i32, i32) {
    %c0_i32 = arith.constant 0 : i32
    %c0_i32_0 = arith.constant 0 : i32
    %c0_i32_1 = arith.constant 0 : i32
    return %c0_i32, %c0_i32_0 : i32, i32
  }
  func.func @transform_12(%arg0: i32) -> (i32, i32) {
    %c0_i32 = arith.constant 0 : i32
    %c0_i32_0 = arith.constant 0 : i32
    %c0_i32_1 = arith.constant 0 : i32
    return %c0_i32, %c0_i32_0 : i32, i32
  }
  func.func @transform_13(%arg0: i32) -> (i32, i32) {
    %c0_i32 = arith.constant 0 : i32
    %c0_i32_0 = arith.constant 0 : i32
    %c0_i32_1 = arith.constant 0 : i32
    return %c0_i32, %c0_i32_0 : i32, i32
  }
  func.func @transform_14(%arg0: i32) -> (i32, i32) {
    %c0_i32 = arith.constant 0 : i32
    %c0_i32_0 = arith.constant 0 : i32
    %c0_i32_1 = arith.constant 0 : i32
    return %c0_i32, %c0_i32_0 : i32, i32
  }
  func.func @transform_15(%arg0: i32) -> (i32, i32) {
    %c0_i32 = arith.constant 0 : i32
    %c0_i32_0 = arith.constant 0 : i32
    %c0_i32_1 = arith.constant 0 : i32
    return %c0_i32, %c0_i32_0 : i32, i32
  }
  func.func @transform_16(%arg0: i32) -> (i32, i32) {
    %c0_i32 = arith.constant 0 : i32
    %c0_i32_0 = arith.constant 0 : i32
    %c0_i32_1 = arith.constant 0 : i32
    return %c0_i32, %c0_i32_0 : i32, i32
  }
  func.func @transform_17(%arg0: i32) -> (i32, i32) {
    %c0_i32 = arith.constant 0 : i32
    %c0_i32_0 = arith.constant 0 : i32
    %c0_i32_1 = arith.constant 0 : i32
    return %c0_i32, %c0_i32_0 : i32, i32
  }
  func.func @transform_18(%arg0: i32) -> (i32, i32) {
    %c0_i32 = arith.constant 0 : i32
    %c0_i32_0 = arith.constant 0 : i32
    %c0_i32_1 = arith.constant 0 : i32
    return %c0_i32, %c0_i32_0 : i32, i32
  }
  func.func @transform_19(%arg0: i32) -> (i32, i32) {
    %c0_i32 = arith.constant 0 : i32
    %c0_i32_0 = arith.constant 0 : i32
    %c0_i32_1 = arith.constant 0 : i32
    return %c0_i32, %c0_i32_0 : i32, i32
  }
  func.func @transform_20(%arg0: i32) -> (i32, i32) {
    %c0_i32 = arith.constant 0 : i32
    %c0_i32_0 = arith.constant 0 : i32
    %c0_i32_1 = arith.constant 0 : i32
    return %c0_i32, %c0_i32_0 : i32, i32
  }
  func.func @transform_21(%arg0: i32) -> (i32, i32) {
    %c0_i32 = arith.constant 0 : i32
    %c0_i32_0 = arith.constant 0 : i32
    return %arg0, %c0_i32 : i32, i32
  }
}

</mosaic_0001>

<bundles_post_ra>
// kernel: tpu_custom_call.1
= control target key start
LH: loop header
LB: loop body
LE: loop exit
PB: predicated region body
PF: predicated region fallthrough
CT: control target
= control target key end

     0   :  { %s5389_s0 = inlined_call_operand.hbm [shape: bf16[64,288], index: 0, kind: input, shape index: {}]   ;;  %s5390_s1 = inlined_call_operand.hbm [shape: bf16[288,256], index: 1, kind: input, shape index: {}]   ;;  %s5391_s2 = inlined_call_operand.hbm [shape: f32[1,256], index: 2, kind: input, shape index: {}]   ;;  %s5392_s3 = inlined_call_operand.hbm [shape: bf16[256,256], index: 3, kind: input, shape index: {}]   ;;  %s5393_s4 = inlined_call_operand.hbm [shape: f32[1,256], index: 4, kind: input, shape index: {}]   ;;  %s5394_s5 = inlined_call_operand.hbm [shape: bf16[256,256], index: 5, kind: input, shape index: {}]   ;;  %s5395_s6 = inlined_call_operand.vmem [shape: f32[1,256], index: 6, kind: input, shape index: {}]   ;;  %s5396_s7 = inlined_call_operand.hbm [shape: bf16[256,256], index: 7, kind: input, shape index: {}]   ;;  %s5397_s8 = inlined_call_operand.vmem [shape: f32[1,256], index: 8, kind: input, shape index: {}]   ;;  %s5398_s9 = inlined_call_operand.hbm [shape: bf16[256,512], index: 9, kind: input, shape index: {}]   ;;  %s5399_s10 = inlined_call_operand.vmem [shape: f32[1,512], index: 10, kind: input, shape index: {}]   ;;  %s5400_s11 = inlined_call_operand.hbm [shape: bf16[256,256], index: 11, kind: input, shape index: {}]   ;;  %s5401_s12 = inlined_call_operand.vmem [shape: f32[1,256], index: 12, kind: input, shape index: {}]   ;;  %s5402_s13 = inlined_call_operand.hbm [shape: bf16[256,256], index: 13, kind: input, shape index: {}]   ;;  %s5403_s14 = inlined_call_operand.vmem [shape: f32[1,256], index: 14, kind: input, shape index: {}]   ;;  %s5404_s15 = inlined_call_operand.hbm [shape: bf16[256,256], index: 15, kind: input, shape index: {}]   ;;  %s5405_s16 = inlined_call_operand.vmem [shape: f32[1,256], index: 16, kind: input, shape index: {}]   ;;  %s5406_s17 = inlined_call_operand.hbm [shape: bf16[256,256], index: 17, kind: input, shape index: {}]   ;;  %s5407_s18 = inlined_call_operand.vmem [shape: f32[1,256], index: 18, kind: input, shape index: {}]   ;;  %s5408_s19 = inlined_call_operand.vmem [shape: f32[2,256], index: 19, kind: input, shape index: {}]   ;;  %s5409_s20 = inlined_call_operand.vmem [shape: f32[1,2], index: 20, kind: input, shape index: {}]   ;;  %s5410_s21 = inlined_call_operand.vmem [shape: f32[64,2], index: 21, kind: output, shape index: {}]  }
   0x1   :  { %5411 = sst [smem:[#allocation28_spill]] %s5389_s0 }
   0x2   :  { %5412 = sst [smem:[#allocation29_spill]] %s5390_s1 }
   0x3   :  { %5413 = sst [smem:[#allocation30_spill]] %s5391_s2 }
   0x4   :  { %5414 = sst [smem:[#allocation31_spill]] %s5392_s3 }
   0x5   :  { %5415 = sst [smem:[#allocation32_spill]] %s5393_s4 }
   0x6   :  { %5416 = sst [smem:[#allocation33_spill]] %s5394_s5 }
   0x7   :  { %26 = vsyncpa [#allocation3], 0 }
   0x8   :  { %27 = vsyncpa [#allocation5], 0 }
   0x9   :  { %28 = vsyncpa [#allocation8], 0 }
   0xa   :  { %29 = vsyncpa [#allocation11], 0 }
   0xb   :  { %30 = vsyncpa [#allocation14], 0 }
   0xc   :  { %31 = vsyncpa [#allocation17], 0 }
   0xd   :  { %32 = vsyncpa [#allocation20], 0  ;;  %s4832_s2 = smov [#allocation4]  }
   0xe   :  { %s50_s25 = sshll.u32 %s4832_s2, 4  ;;  %s51_s25 = int_to_ptr.vmem [resolvable:$true] %s50_s25 }
   0xf   :  { %s4586_s26 = scalar_lea.vmem %s51_s25, 4608  ;;  %p4591_p1 = scmp.lt.s32.totalorder %s51_s25, %s51_s25 }
  0x10   :  { %p4587_p0 = scmp.ne.s32.totalorder %s51_s25, %s4586_s26  ;;  %p4592_p2 = scmp.lt.s32.totalorder %s4586_s26, %s4586_s26 }
  0x12   :  { %p4593_p3 = por %p4592_p2, %p4591_p1 }
  0x14   :  { %p4594_p4 = pnand %p4593_p3, %p4587_p0 }
  0x16   :  { %4597 = shalt.err (!%p4594_p4)
}
  0x17   :  { %s4833_s27 = smov 128   ;;  %s4834_s3 = smov 8  }
  0x18   :  { %s5417_s0 = sld [smem:[#allocation29_spill]]  ;;  %s4835_s4 = smov [#allocation7]  }
  0x19   :  { %s72_s30 = sshll.u32 %s4835_s4, 4  ;;  %s4836_s5 = smov [#allocation10]   ;;  %s73_s30 = int_to_ptr.vmem [resolvable:$true] %s72_s30 }
  0x1a   :  { %s94_s22 = sshll.u32 %s4836_s5, 4  ;;  %s4606_s23 = scalar_lea.vmem %s73_s30, 4096  ;;  %s95_s22 = int_to_ptr.vmem [resolvable:$true] %s94_s22 }
  0x1b   :  { %p4607_p5 = scmp.ne.s32.totalorder %s73_s30, %s4606_s23  ;;  %p4611_p6 = scmp.lt.s32.totalorder %s73_s30, %s73_s30 }
  0x1c   :  { %p4612_p7 = scmp.lt.s32.totalorder %s4606_s23, %s4606_s23 }
  0x1e   :  { %56 = dma.hbm_to_vmem [thread:$0]  %s5417_s0, 4608, %s51_s25, [#allocation5], %s4833_s27, %s4833_s27, %s4834_s3  }
  0x1f   :  { %p4613_p8 = por %p4612_p7, %p4611_p6 }
  0x21   :  { %p4614_p9 = pnand %p4613_p8, %p4607_p5 }
  0x23   :  { %4617 = shalt.err (!%p4614_p9)
}
  0x24   :  { %s5418_s2 = sld [smem:[#allocation31_spill]]  ;;  %s4626_s25 = scalar_lea.vmem %s95_s22, 4096 }
  0x25   :  { %p4627_p10 = scmp.ne.s32.totalorder %s95_s22, %s4626_s25  ;;  %p4631_p11 = scmp.lt.s32.totalorder %s95_s22, %s95_s22 }
  0x26   :  { %p4632_p12 = scmp.lt.s32.totalorder %s4626_s25, %s4626_s25 }
  0x28   :  { %p4633_p13 = por %p4632_p12, %p4631_p11 }
  0x2a   :  { %78 = dma.hbm_to_vmem [thread:$0]  %s5418_s2, 4096, %s73_s30, [#allocation8], %s4833_s27, %s4833_s27, %s4834_s3  }
  0x2b   :  { %p4634_p0 = pnand %p4633_p13, %p4627_p10 }
  0x2d   :  { %4637 = shalt.err (!%p4634_p0)
}
  0x2e   :  { %s5419_s29 = sld [smem:[#allocation33_spill]]  ;;  %s4837_s0 = smov [#allocation13]  }
  0x2f   :  { %s122_s4 = sshll.u32 %s4837_s0, 4  ;;  %s123_s4 = int_to_ptr.vmem [resolvable:$true] %s122_s4 }
  0x30   :  { %s4646_s5 = scalar_lea.vmem %s123_s4, 8192  ;;  %p4651_p2 = scmp.lt.s32.totalorder %s123_s4, %s123_s4 }
  0x31   :  { %p4647_p1 = scmp.ne.s32.totalorder %s123_s4, %s4646_s5  ;;  %p4652_p3 = scmp.lt.s32.totalorder %s4646_s5, %s4646_s5 }
  0x33   :  { %p4653_p4 = por %p4652_p3, %p4651_p2 }
  0x34   :  { %100 = dma.hbm_to_vmem [thread:$0]  %s5419_s29, 4096, %s95_s22, [#allocation11], %s4833_s27, %s4833_s27, %s4834_s3  }
  0x35   :  { %p4654_p5 = pnand %p4653_p4, %p4647_p1 }
  0x37   :  { %4657 = shalt.err (!%p4654_p5)
}
  0x38   :  { %s4838_s30 = smov 256   ;;  %s4839_s23 = smov 16  }
  0x39   :  { %128 = dma.hbm_to_vmem [thread:$0]  %s5398_s9, 8192, %s123_s4, [#allocation14], %s4838_s30, %s4838_s30, %s4839_s23  }
  0x3a   :  { %s4840_s2 = smov [#allocation16]   ;;  %s4841_s26 = smov [#allocation2]  }
  0x3b   :  { %s150_s25 = sshll.u32 %s4840_s2, 4  ;;  %s38_s22 = sshll.u32 %s4841_s26, 4  ;;  %s151_s25 = int_to_ptr.vmem [resolvable:$true] %s150_s25  ;;  %s39_s22 = int_to_ptr.vmem [resolvable:$true] %s38_s22 }
  0x3c   :  { %s4666_s28 = scalar_lea.vmem %s151_s25, 4096  ;;  %p4671_p7 = scmp.lt.s32.totalorder %s151_s25, %s151_s25 }
  0x3d   :  { %p4667_p6 = scmp.ne.s32.totalorder %s151_s25, %s4666_s28  ;;  %p4672_p8 = scmp.lt.s32.totalorder %s4666_s28, %s4666_s28 }
  0x3f   :  { %p4673_p9 = por %p4672_p8, %p4671_p7 }
  0x41   :  { %p4674_p10 = pnand %p4673_p9, %p4667_p6 }
  0x43   :  { %4677 = shalt.err (!%p4674_p10)
}
  0x44   :  { %156 = dma.hbm_to_vmem [thread:$0]  %s5402_s13, 4096, %s151_s25, [#allocation17], %s4833_s27, %s4833_s27, %s4834_s3  }
  0x45   :  { %s4686_s9 = scalar_lea.vmem %s39_s22, 1536  ;;  %p4691_p12 = scmp.lt.s32.totalorder %s39_s22, %s39_s22 }
  0x46   :  { %p4687_p11 = scmp.ne.s32.totalorder %s39_s22, %s4686_s9  ;;  %p4692_p13 = scmp.lt.s32.totalorder %s4686_s9, %s4686_s9 }
  0x48   :  { %p4693_p0 = por %p4692_p13, %p4691_p12 }
  0x4a   :  { %p4694_p1 = pnand %p4693_p0, %p4687_p11 }
  0x4c   :  { %4697 = shalt.err (!%p4694_p1)
}
  0x4d   :  { %s4842_s4 = smov 192   ;;  %s4843_s5 = smov 12  }
  0x4e   :  { %s5420_s1 = sld [smem:[#allocation28_spill]]  ;;  %s4844_s24 = smov [#allocation6]  }
  0x4f   :  { %s63_s2 = sshll.u32 %s4844_s24, 4  ;;  %s4845_s26 = smov [#allocation9]   ;;  %s64_s2 = int_to_ptr.vmem [resolvable:$true] %s63_s2 }
  0x50   :  { %s85_s28 = sshll.u32 %s4845_s26, 4  ;;  %s4706_s13 = scalar_lea.vmem %s64_s2, 32  ;;  %s86_s28 = int_to_ptr.vmem [resolvable:$true] %s85_s28 }
  0x51   :  { %p4707_p2 = scmp.ne.s32.totalorder %s64_s2, %s4706_s13  ;;  %p4711_p3 = scmp.lt.s32.totalorder %s64_s2, %s64_s2 }
  0x52   :  { %p4712_p4 = scmp.lt.s32.totalorder %s4706_s13, %s4706_s13 }
  0x54   :  { %44 = dma.hbm_to_vmem [thread:$0]  %s5420_s1, 1536, %s39_s22, [#allocation3], %s4842_s4, %s4842_s4, %s4843_s5  }
  0x55   :  { %p4713_p5 = por %p4712_p4, %p4711_p3 }
  0x57   :  { %p4714_p6 = pnand %p4713_p5, %p4707_p2 }
  0x59   :  { %4717 = shalt.err (!%p4714_p6)
}
  0x5a   :  { %s5421_s0 = sld [smem:[#allocation30_spill]]  ;;  %s4726_s9 = scalar_lea.vmem %s86_s28, 32 }
  0x5b   :  { %p4727_p7 = scmp.ne.s32.totalorder %s86_s28, %s4726_s9  ;;  %p4731_p8 = scmp.lt.s32.totalorder %s86_s28, %s86_s28 }
  0x5c   :  { %p4732_p9 = scmp.lt.s32.totalorder %s4726_s9, %s4726_s9 }
  0x5e   :  { %p4733_p10 = por %p4732_p9, %p4731_p8 }
  0x60   :  { %66 = dma.hbm_to_vmem [thread:$0]  %s5421_s0, 32, %s64_s2, [#allocation5]  }
  0x61   :  { %p4734_p11 = pnand %p4733_p10, %p4727_p7 }
  0x63   :  { %4737 = shalt.err (!%p4734_p11)
}
  0x64   :  { %s5422_s5 = sld [smem:[#allocation32_spill]]  ;;  %s4846_s30 = smov [#allocation12]  }
  0x65   :  { %s108_s23 = sshll.u32 %s4846_s30, 4  ;;  %s4847_s1 = smov [#allocation15]   ;;  %s109_s23 = int_to_ptr.vmem [resolvable:$true] %s108_s23 }
  0x66   :  { %s136_s24 = sshll.u32 %s4847_s1, 4  ;;  %s4746_s26 = scalar_lea.vmem %s109_s23, 4096  ;;  %s137_s24 = int_to_ptr.vmem [resolvable:$true] %s136_s24 }
  0x67   :  { %p4747_p12 = scmp.ne.s32.totalorder %s109_s23, %s4746_s26  ;;  %p4751_p13 = scmp.lt.s32.totalorder %s109_s23, %s109_s23 }
  0x68   :  { %p4752_p0 = scmp.lt.s32.totalorder %s4746_s26, %s4746_s26 }
  0x6a   :  { %88 = dma.hbm_to_vmem [thread:$0]  %s5422_s5, 32, %s86_s28, [#allocation8]  }
  0x6b   :  { %p4753_p1 = por %p4752_p0, %p4751_p13 }
  0x6d   :  { %p4754_p2 = pnand %p4753_p1, %p4747_p12 }
  0x6f   :  { %4757 = shalt.err (!%p4754_p2)
}
  0x70   :  { %114 = dma.hbm_to_vmem [thread:$0]  %s5396_s7, 4096, %s109_s23, [#allocation11], %s4833_s27, %s4833_s27, %s4834_s3  }
  0x71   :  { %s4766_s28 = scalar_lea.vmem %s137_s24, 4096  ;;  %p4771_p4 = scmp.lt.s32.totalorder %s137_s24, %s137_s24 }
  0x72   :  { %p4767_p3 = scmp.ne.s32.totalorder %s137_s24, %s4766_s28  ;;  %p4772_p5 = scmp.lt.s32.totalorder %s4766_s28, %s4766_s28 }
  0x74   :  { %p4773_p6 = por %p4772_p5, %p4771_p4 }
  0x76   :  { %p4774_p7 = pnand %p4773_p6, %p4767_p3 }
  0x78   :  { %4777 = shalt.err (!%p4774_p7)
}
  0x79   :  { %142 = dma.hbm_to_vmem [thread:$0]  %s5400_s11, 4096, %s137_s24, [#allocation14], %s4833_s27, %s4833_s27, %s4834_s3  }
  0x7a   :  { %s4848_s0 = smov [#allocation18]   ;;  %s4849_s22 = smov [#allocation19]  }
  0x7b   :  { %s164_s9 = sshll.u32 %s4848_s0, 4  ;;  %s178_s4 = sshll.u32 %s4849_s22, 4  ;;  %s165_s9 = int_to_ptr.vmem [resolvable:$true] %s164_s9  ;;  %s179_s4 = int_to_ptr.vmem [resolvable:$true] %s178_s4 }
  0x7c   :  { %s4786_s7 = scalar_lea.vmem %s165_s9, 4096  ;;  %p4791_p9 = scmp.lt.s32.totalorder %s165_s9, %s165_s9 }
  0x7d   :  { %p4787_p8 = scmp.ne.s32.totalorder %s165_s9, %s4786_s7  ;;  %p4792_p10 = scmp.lt.s32.totalorder %s4786_s7, %s4786_s7 }
  0x7f   :  { %p4793_p11 = por %p4792_p10, %p4791_p9 }
  0x81   :  { %p4794_p12 = pnand %p4793_p11, %p4787_p8 }
  0x83   :  { %4797 = shalt.err (!%p4794_p12)
}
  0x84   :  { %170 = dma.hbm_to_vmem [thread:$0]  %s5404_s15, 4096, %s165_s9, [#allocation17], %s4833_s27, %s4833_s27, %s4834_s3  }
  0x85   :  { %s4806_s11 = scalar_lea.vmem %s179_s4, 4096  ;;  %p4811_p0 = scmp.lt.s32.totalorder %s179_s4, %s179_s4 }
  0x86   :  { %p4807_p13 = scmp.ne.s32.totalorder %s179_s4, %s4806_s11  ;;  %p4812_p1 = scmp.lt.s32.totalorder %s4806_s11, %s4806_s11 }
  0x88   :  { %p4813_p2 = por %p4812_p1, %p4811_p0 }
  0x8a   :  { %p4814_p3 = pnand %p4813_p2, %p4807_p13 }
  0x8c   :  { %4817 = shalt.err (!%p4814_p3)
}
  0x8d   :  { %184 = dma.hbm_to_vmem [thread:$0]  %s5406_s17, 4096, %s179_s4, [#allocation20], %s4833_s27, %s4833_s27, %s4834_s3  }
  0x8e   :  { %4818 = dma.done.wait [#allocation3], 1536  }
  0x8f   :  { %4819 = vsyncadd [#allocation3], 4294965760 }
  0x90   :  { %4820 = dma.done.wait [#allocation5], 4640  }
  0x91   :  { %4821 = vsyncadd [#allocation5], 4294962656 }
  0x92   :  { %4822 = dma.done.wait [#allocation8], 4128  }
  0x93   :  { %4823 = vsyncadd [#allocation8], 4294963168 }
  0x94   :  { %4824 = dma.done.wait [#allocation11], 8192  }
  0x95   :  { %4825 = vsyncadd [#allocation11], 4294959104 }
  0x96   :  { %4826 = dma.done.wait [#allocation14], 12288  }
  0x97   :  { %4827 = vsyncadd [#allocation14], 4294955008 }
  0x98   :  { %4828 = dma.done.wait [#allocation17], 8192  }
  0x99   :  { %4829 = vsyncadd [#allocation17], 4294959104 }
  0x9a   :  { %4830 = dma.done.wait [#allocation20], 4096  }
  0x9b   :  { %4831 = vsyncadd [#allocation20], 4294963200  ;;  %v4850_v0 = vmov 0   ;;  %v4076_v1 = vld [vmem:[#allocation4 + $0x74] ss:$8 sps:$4 sm:$0xff]   ;;  %vm532_vm0 = vcmask 261120  }
  0x9c   :  { %650 = vmatprep.mubr.bf16.mxu1 %v4850_v0  ;;  %v4078_v2 = vld [vmem:[#allocation4 + $0x70] ss:$8 sps:$4 sm:$0xff]   ;;  %545 = vmatprep.subr.bf16.mxu0 %v4076_v1  ;;  %v4079_v3 = vld [vmem:[#allocation4 + $0x64] ss:$8 sps:$4 sm:$0xff]   ;;  %v4081_v4 = vld [vmem:[#allocation4 + $0x60] ss:$8 sps:$4 sm:$0xff]  }
  0x9d   :  { %546 = vmatpush1.bf16.msra.mxu0 %v4078_v2  ;;  %v4082_v5 = vld [vmem:[#allocation4 + $0x54] ss:$8 sps:$4 sm:$0xff]   ;;  %v4084_v6 = vld [vmem:[#allocation4 + $0x50] ss:$8 sps:$4 sm:$0xff]   ;;  %v4085_v7 = vld [vmem:[#allocation4 + $0x44] ss:$8 sps:$4 sm:$0xff]  }
  0x9e   :  { %547 = vmatprep.subr.bf16.mxu0 %v4079_v3  ;;  %v4087_v8 = vld [vmem:[#allocation4 + $0x40] ss:$8 sps:$4 sm:$0xff]   ;;  %v4088_v9 = vld [vmem:[#allocation4 + $0x34] ss:$8 sps:$4 sm:$0xff]   ;;  %v4090_v10 = vld [vmem:[#allocation4 + $0x30] ss:$8 sps:$4 sm:$0xff]  }
  0x9f   :  { %v4091_v11 = vld [vmem:[#allocation4 + $0x24] ss:$8 sps:$4 sm:$0xff]   ;;  %v4093_v12 = vld [vmem:[#allocation4 + $0x20] ss:$8 sps:$4 sm:$0xff]   ;;  %v4117_v13 = vld [vmem:[#allocation4 + $0x114] ss:$8 sps:$4 sm:$0xff]  }
  0xa0   :  { %v4120_v14 = vld [vmem:[#allocation4 + $0x110] ss:$8 sps:$4 sm:$0xff]   ;;  %v4094_v15 = vld [vmem:[#allocation4 + $0x14] ss:$8 sps:$4 sm:$0xff]   ;;  %630 = vmatprep.subr.bf16.mxu1 %v4117_v13  ;;  %v4123_v16 = vld [vmem:[#allocation4 + $0x104] ss:$8 sps:$4 sm:$0xff]  }
  0xa1   :  { %548 = vmatpush1.bf16.msra.mxu0 %v4081_v4  ;;  %631 = vmatpush1.bf16.msra.mxu1 %v4120_v14  ;;  %v4126_v17 = vld [vmem:[#allocation4 + $0x100] ss:$8 sps:$4 sm:$0xff]   ;;  %v4096_v18 = vld [vmem:[#allocation4 + $0x10] ss:$8 sps:$4 sm:$0xff]   ;;  %v4097_v19 = vld [vmem:[#allocation4 + $0x4] ss:$8 sps:$4 sm:$0xff]  }
  0xa2   :  { %549 = vmatprep.subr.bf16.mxu0 %v4082_v5  ;;  %632 = vmatprep.subr.bf16.mxu1 %v4123_v16  ;;  %v4129_v20 = vld [vmem:[#allocation2 + $0x8] ss:$12 sps:$4 sm:$0xff]   ;;  %v4133_v21 = vld [vmem:[#allocation2 + $0x4] ss:$12 sps:$4 sm:$0xff]   ;;  %v4137_v26 = vld [vmem:[#allocation2 + $0x20] ss:$12 sps:$4 sm:$0xff]  }
  0xa3   :  { %v4099_v22 = vld [vmem:[#allocation4] ss:$8 sps:$4 sm:$0xff]   ;;  %v4100_v23 = vld [vmem:[#allocation4 + $0xf4] ss:$8 sps:$4 sm:$0xff]   ;;  %577 = vmatprep.mubr.bf16.mxu0 %v4133_v21  ;;  %v4102_v24 = vld [vmem:[#allocation4 + $0xf0] ss:$8 sps:$4 sm:$0xff]  }
  0xa4   :  { %v4103_v25 = vld [vmem:[#allocation4 + $0xe4] ss:$8 sps:$4 sm:$0xff]   ;;  %v4146_v27 = vld [vmem:[#allocation7 + $0x70] ss:$8 sps:$4 sm:$0xff]   ;;  %v4148_v28 = vld [vmem:[#allocation7 + $0x74] ss:$8 sps:$4 sm:$0xff]  }
  0xa5   :  { %550 = vmatpush1.bf16.msra.mxu0 %v4084_v6  ;;  %633 = vmatpush1.bf16.msra.mxu1 %v4126_v17  ;;  %v4105_v29 = vld [vmem:[#allocation4 + $0xe0] ss:$8 sps:$4 sm:$0xff]   ;;  %v4106_v31 = vld [vmem:[#allocation4 + $0xd4] ss:$8 sps:$4 sm:$0xff]   ;;  %v4108_v33 = vld [vmem:[#allocation4 + $0xd0] ss:$8 sps:$4 sm:$0xff]  }
  0xa6   :  { %551 = vmatprep.subr.bf16.mxu0 %v4085_v7  ;;  %v4151_v30 = vld [vmem:[#allocation7 + $0x64] ss:$8 sps:$4 sm:$0xff]   ;;  %935 = vmatprep.subr.bf16.mxu1 %v4148_v28  ;;  %v4149_v32 = vld [vmem:[#allocation7 + $0x60] ss:$8 sps:$4 sm:$0xff]   ;;  %v4154_v34 = vld [vmem:[#allocation7 + $0x54] ss:$8 sps:$4 sm:$0xff]  }
  0xa7   :  { %v4109_v35 = vld [vmem:[#allocation4 + $0xc4] ss:$8 sps:$4 sm:$0xff]   ;;  %v4152_v37 = vld [vmem:[#allocation7 + $0x50] ss:$8 sps:$4 sm:$0xff]   ;;  %v4111_v38 = vld [vmem:[#allocation4 + $0xc0] ss:$8 sps:$4 sm:$0xff]  }
  0xa8   :  { %3763 = vmatmul.mubr.msk.bf16.vlgmr.msra.gmra.mxu1 %vm532_vm0, %v4129_v20  ;;  %v4141_v36 = vld [vmem:[#allocation2 + $0x38] ss:$12 sps:$4 sm:$0xff]   ;;  %v4112_v40 = vld [vmem:[#allocation4 + $0xb4] ss:$8 sps:$4 sm:$0xff]   ;;  %v4119_v47 = vld [vmem:[#allocation4 + $0xa0] ss:$8 sps:$4 sm:$0xff]  }
  0xa9   :  { %552 = vmatpush1.bf16.msra.mxu0 %v4087_v8  ;;  %660 = vmatprep.mubr.bf16.mxu1 %v4850_v0  ;;  %v4157_v39 = vld [vmem:[#allocation7 + $0x44] ss:$8 sps:$4 sm:$0xff]   ;;  %v4155_v43 = vld [vmem:[#allocation7 + $0x40] ss:$8 sps:$4 sm:$0xff]   ;;  %v4160_v45 = vld [vmem:[#allocation7 + $0x34] ss:$8 sps:$4 sm:$0xff]  }
  0xaa   :  { %553 = vmatprep.subr.bf16.mxu0 %v4088_v9  ;;  %936 = vmatpush1.bf16.msra.mxu1 %v4146_v27  ;;  %v4114_v41 = vld [vmem:[#allocation4 + $0xb0] ss:$8 sps:$4 sm:$0xff]   ;;  %v4115_v42 = vld [vmem:[#allocation4 + $0xa4] ss:$8 sps:$4 sm:$0xff]   ;;  %v4121_v49 = vld [vmem:[#allocation4 + $0x94] ss:$8 sps:$4 sm:$0xff]  }
  0xab   :  { %937 = vmatprep.subr.bf16.mxu1 %v4151_v30  ;;  %v4145_v44 = vld [vmem:[#allocation2 + $0x50] ss:$12 sps:$4 sm:$0xff]   ;;  %v4161_v50 = vld [vmem:[#allocation7 + $0x20] ss:$8 sps:$4 sm:$0xff]   ;;  %vm3671_vm1 = vcmask 7168   ;;  %vm3695_vm2 = vcmask 15360  }
  0xac   :  { %v4158_v46 = vld [vmem:[#allocation7 + $0x30] ss:$8 sps:$4 sm:$0xff]   ;;  %v4163_v48 = vld [vmem:[#allocation7 + $0x24] ss:$8 sps:$4 sm:$0xff]   ;;  %v4166_v52 = vld [vmem:[#allocation7 + $0x14] ss:$8 sps:$4 sm:$0xff]  }
  0xad   :  { %554 = vmatpush1.bf16.msra.mxu0 %v4090_v10  ;;  %v4125_v51 = vld [vmem:[#allocation4 + $0x90] ss:$8 sps:$4 sm:$0xff]   ;;  %v4127_v53 = vld [vmem:[#allocation4 + $0x84] ss:$8 sps:$4 sm:$0xff]   ;;  %v4130_v55 = vld [vmem:[#allocation4 + $0x80] ss:$8 sps:$4 sm:$0xff]  }
  0xae   :  { %555 = vmatprep.subr.bf16.mxu0 %v4091_v11  ;;  %938 = vmatpush1.bf16.msra.mxu1 %v4149_v32  ;;  %v4164_v54 = vld [vmem:[#allocation7 + $0x10] ss:$8 sps:$4 sm:$0xff]   ;;  %v4169_v56 = vld [vmem:[#allocation7 + $0x4] ss:$8 sps:$4 sm:$0xff]   ;;  %v4167_v58 = vld [vmem:[#allocation7] ss:$8 sps:$4 sm:$0xff]  }
  0xaf   :  { %939 = vmatprep.subr.bf16.mxu1 %v4154_v34  ;;  %v4131_v57 = vld [vmem:[#allocation2] ss:$12 sps:$4 sm:$0xff]   ;;  %v4134_v59 = vld [vmem:[#allocation2 + $0x1c] ss:$12 sps:$4 sm:$0xff]   ;;  %v4136_v63 = vld [vmem:[#allocation2 + $0x18] ss:$12 sps:$4 sm:$0xff]  }
  0xb0   :  { %3764 = vmatmul.mubr.msk.bf16.gmra.mxu1 %vm532_vm0, %v4137_v26  ;;  %v4172_v60 = vld [vmem:[#allocation7 + $0xf4] ss:$8 sps:$4 sm:$0xff]   ;;  %v4170_v61 = vld [vmem:[#allocation7 + $0xf0] ss:$8 sps:$4 sm:$0xff]   ;;  %v4175_v62 = vld [vmem:[#allocation7 + $0xe4] ss:$8 sps:$4 sm:$0xff]  }
  0xb1   :  { %556 = vmatpush1.bf16.msra.mxu0 %v4093_v12  ;;  %670 = vmatprep.mubr.bf16.mxu1 %v4850_v0  ;;  %v4138_v1 = vld [vmem:[#allocation2 + $0x34] ss:$12 sps:$4 sm:$0xff]   ;;  %v4140_v4 = vld [vmem:[#allocation2 + $0x30] ss:$12 sps:$4 sm:$0xff]   ;;  %v4142_v5 = vld [vmem:[#allocation2 + $0x4c] ss:$12 sps:$4 sm:$0xff]  }
  0xb2   :  { %557 = vmatprep.subr.bf16.mxu0 %v4094_v15  ;;  %940 = vmatpush1.bf16.msra.mxu1 %v4152_v37  ;;  %v4178_v2 = vld [vmem:[#allocation7 + $0xd4] ss:$8 sps:$4 sm:$0xff]   ;;  %v4176_v3 = vld [vmem:[#allocation7 + $0xd0] ss:$8 sps:$4 sm:$0xff]   ;;  %v4179_v7 = vld [vmem:[#allocation7 + $0xc0] ss:$8 sps:$4 sm:$0xff]  }
  0xb3   :  { %941 = vmatprep.subr.bf16.mxu1 %v4157_v39  ;;  %v4144_v6 = vld [vmem:[#allocation2 + $0x48] ss:$12 sps:$4 sm:$0xff]   ;;  %v4197_v20 = vld [vmem:[#allocation10 + $0x60] ss:$8 sps:$4 sm:$0xff]   ;;  %v4202_v21 = vld [vmem:[#allocation10 + $0x54] ss:$8 sps:$4 sm:$0xff]  }
  0xb4   :  { %v4181_v8 = vld [vmem:[#allocation7 + $0xc4] ss:$8 sps:$4 sm:$0xff]   ;;  %v4184_v9 = vld [vmem:[#allocation7 + $0xb4] ss:$8 sps:$4 sm:$0xff]   ;;  %v4182_v10 = vld [vmem:[#allocation7 + $0xb0] ss:$8 sps:$4 sm:$0xff]  }
  0xb5   :  { %558 = vmatpush1.bf16.msra.mxu0 %v4096_v18  ;;  %v4187_v11 = vld [vmem:[#allocation7 + $0xa4] ss:$8 sps:$4 sm:$0xff]   ;;  %v4185_v12 = vld [vmem:[#allocation7 + $0xa0] ss:$8 sps:$4 sm:$0xff]   ;;  %v4190_v13 = vld [vmem:[#allocation7 + $0x94] ss:$8 sps:$4 sm:$0xff]  }
  0xb6   :  { %559 = vmatprep.subr.bf16.mxu0 %v4097_v19  ;;  %942 = vmatpush1.bf16.msra.mxu1 %v4155_v43  ;;  %v4188_v14 = vld [vmem:[#allocation7 + $0x90] ss:$8 sps:$4 sm:$0xff]   ;;  %v4193_v15 = vld [vmem:[#allocation7 + $0x84] ss:$8 sps:$4 sm:$0xff]   ;;  %v4191_v16 = vld [vmem:[#allocation7 + $0x80] ss:$8 sps:$4 sm:$0xff]  }
  0xb7   :  { %943 = vmatprep.subr.bf16.mxu1 %v4160_v45  ;;  %v4194_v17 = vld [vmem:[#allocation10 + $0x70] ss:$8 sps:$4 sm:$0xff]   ;;  %v4196_v18 = vld [vmem:[#allocation10 + $0x74] ss:$8 sps:$4 sm:$0xff]   ;;  %v4199_v19 = vld [vmem:[#allocation10 + $0x64] ss:$8 sps:$4 sm:$0xff]   ;;  %v282_v45 = vlaneseq }
  0xb8   :  { %3765 = vmatmul.mubr.msk.bf16.gmra.mxu1 %vm532_vm0, %v4141_v36  ;;  %v4206_v26 = vld [vmem:[#allocation10 + $0x30] ss:$8 sps:$4 sm:$0xff]   ;;  %v4211_v27 = vld [vmem:[#allocation10 + $0x24] ss:$8 sps:$4 sm:$0xff]   ;;  %v4209_v28 = vld [vmem:[#allocation10 + $0x20] ss:$8 sps:$4 sm:$0xff]  }
  0xb9   :  { %560 = vmatpush1.bf16.msra.mxu0 %v4099_v22  ;;  %680 = vmatprep.mubr.bf16.mxu1 %v4850_v0  ;;  %v4173_v0 = vld [vmem:[#allocation7 + $0xe0] ss:$8 sps:$4 sm:$0xff]   ;;  %v4200_v22 = vld [vmem:[#allocation10 + $0x50] ss:$8 sps:$4 sm:$0xff]  }
  0xba   :  { %561 = vmatprep.subr.bf16.mxu0 %v4100_v23  ;;  %944 = vmatpush1.bf16.msra.mxu1 %v4158_v46  ;;  %v4205_v23 = vld [vmem:[#allocation10 + $0x44] ss:$8 sps:$4 sm:$0xff]   ;;  %v4212_v30 = vld [vmem:[#allocation10 + $0x10] ss:$8 sps:$4 sm:$0xff]   ;;  %v4215_v32 = vld [vmem:[#allocation10] ss:$8 sps:$4 sm:$0xff]  }
  0xbb   :  { %945 = vmatprep.subr.bf16.mxu1 %v4163_v48  ;;  %v4218_v34 = vld [vmem:[#allocation10 + $0xf0] ss:$8 sps:$4 sm:$0xff]   ;;  %v4221_v36 = vld [vmem:[#allocation10 + $0xe0] ss:$8 sps:$4 sm:$0xff]   ;;  %v4226_v37 = vld [vmem:[#allocation10 + $0xd4] ss:$8 sps:$4 sm:$0xff]  }
  0xbc   :  { %v4229_v39 = vld [vmem:[#allocation10 + $0xc4] ss:$8 sps:$4 sm:$0xff]  }
  0xbd   :  { %562 = vmatpush2.bf16.msra.mxu0 %v4102_v24  ;;  %v4203_v24 = vld [vmem:[#allocation10 + $0x40] ss:$8 sps:$4 sm:$0xff]  }
  0xbe   :  { %563 = vmatprep.subr.bf16.mxu0 %v4103_v25  ;;  %946 = vmatpush1.bf16.msra.mxu1 %v4161_v50  ;;  %v4208_v25 = vld [vmem:[#allocation10 + $0x34] ss:$8 sps:$4 sm:$0xff]  }
  0xbf   :  { %947 = vmatprep.subr.bf16.mxu1 %v4166_v52 }
  0xc0   :  { %3766 = vmatmul.mubr.msk.bf16.gmra.mxu1 %vm532_vm0, %v4145_v44 }
  0xc1   :  { %564 = vmatpush2.bf16.msra.mxu0 %v4105_v29  ;;  %v4214_v29 = vld [vmem:[#allocation10 + $0x14] ss:$8 sps:$4 sm:$0xff]  }
  0xc2   :  { %565 = vmatprep.subr.bf16.mxu0 %v4106_v31  ;;  %948 = vmatpush1.bf16.msra.mxu1 %v4164_v54  ;;  %v4217_v31 = vld [vmem:[#allocation10 + $0x4] ss:$8 sps:$4 sm:$0xff]  }
  0xc3   :  { %949 = vmatprep.subr.bf16.mxu1 %v4169_v56 }
  0xc5   :  { %566 = vmatpush2.bf16.msra.mxu0 %v4108_v33  ;;  %v4220_v33 = vld [vmem:[#allocation10 + $0xf4] ss:$8 sps:$4 sm:$0xff]  }
  0xc6   :  { %567 = vmatprep.subr.bf16.mxu0 %v4109_v35  ;;  %950 = vmatpush1.bf16.msra.mxu1 %v4167_v58  ;;  %v4223_v35 = vld [vmem:[#allocation10 + $0xe4] ss:$8 sps:$4 sm:$0xff]  }
  0xc7   :  { %951 = vmatprep.subr.bf16.mxu1 %v4172_v60 }
  0xc9   :  { %568 = vmatpush2.bf16.msra.mxu0 %v4111_v38  ;;  %v4224_v38 = vld [vmem:[#allocation10 + $0xd0] ss:$8 sps:$4 sm:$0xff]  }
  0xca   :  { %569 = vmatprep.subr.bf16.mxu0 %v4112_v40  ;;  %952 = vmatpush2.bf16.msra.mxu1 %v4170_v61  ;;  %v4227_v40 = vld [vmem:[#allocation10 + $0xc0] ss:$8 sps:$4 sm:$0xff]  }
  0xcb   :  { %953 = vmatprep.subr.bf16.mxu1 %v4175_v62 }
  0xcd   :  { %570 = vmatpush2.bf16.msra.mxu0 %v4114_v41 }
  0xce   :  { %571 = vmatprep.subr.bf16.mxu0 %v4115_v42  ;;  %954 = vmatpush2.bf16.msra.mxu1 %v4173_v0 }
  0xcf   :  { %955 = vmatprep.subr.bf16.mxu1 %v4178_v2 }
  0xd1   :  { %572 = vmatpush2.bf16.msra.mxu0 %v4119_v47  ;;  %v5029_v47 = vshrl.u32 %v282_v45, 7 }
  0xd2   :  { %573 = vmatprep.subr.bf16.mxu0 %v4121_v49  ;;  %956 = vmatpush2.bf16.msra.mxu1 %v4176_v3 }
  0xd3   :  { %957 = vmatprep.subr.bf16.mxu1 %v4181_v8  ;;  %v5032_v49 = vsub.s32 0, %v5029_v47  ;;  %v5035_v52 = vsub.s32 1, %v5029_v47 }
  0xd5   :  { %574 = vmatpush2.bf16.msra.mxu0 %v4125_v51  ;;  %v280_v51 = vld [vmem:[#allocation6] sm:$0x3] }
  0xd6   :  { %575 = vmatprep.subr.bf16.mxu0 %v4127_v53  ;;  %958 = vmatpush2.bf16.msra.mxu1 %v4179_v7  ;;  %v5038_v53 = vrot.slane %v280_v51, %v5032_v49 }
  0xd7   :  { %959 = vmatprep.subr.bf16.mxu1 %v4184_v9 }
  0xd9   :  { %576 = vmatpush2.bf16.msra.mxu0 %v4130_v55  ;;  %v5041_v55 = vrot.slane %v280_v51, %v5035_v52 }
  0xda   :  { %960 = vmatpush2.bf16.msra.mxu1 %v4182_v10  ;;  %1252 = vmatprep.subr.bf16.mxu0 %v4196_v18 }
  0xdb   :  { %961 = vmatprep.subr.bf16.mxu1 %v4187_v11 }
  0xdc   :  { %578 = vmatmul.mubr.bf16.vlgmr.msra.gmra.mxu0 %v4131_v57 }
  0xdd   :  { %587 = vmatprep.mubr.bf16.mxu0 %v4134_v59  ;;  %1253 = vmatpush1.bf16.msra.mxu0 %v4194_v17 }
  0xde   :  { %962 = vmatpush2.bf16.msra.mxu1 %v4185_v12  ;;  %1254 = vmatprep.subr.bf16.mxu0 %v4199_v19 }
  0xdf   :  { %963 = vmatprep.subr.bf16.mxu1 %v4190_v13 }
  0xe1   :  { %1255 = vmatpush1.bf16.msra.mxu0 %v4197_v20 }
  0xe2   :  { %964 = vmatpush2.bf16.msra.mxu1 %v4188_v14  ;;  %1256 = vmatprep.subr.bf16.mxu0 %v4202_v21 }
  0xe3   :  { %965 = vmatprep.subr.bf16.mxu1 %v4193_v15 }
  0xe4   :  { %588 = vmatmul.mubr.bf16.gmra.mxu0 %v4136_v63 }
  0xe5   :  { %597 = vmatprep.mubr.bf16.mxu0 %v4138_v1  ;;  %1257 = vmatpush1.bf16.msra.mxu0 %v4200_v22 }
  0xe6   :  { %966 = vmatpush2.bf16.msra.mxu1 %v4191_v16  ;;  %1258 = vmatprep.subr.bf16.mxu0 %v4205_v23 }
  0xe9   :  { %1259 = vmatpush1.bf16.msra.mxu0 %v4203_v24 }
  0xea   :  { %1260 = vmatprep.subr.bf16.mxu0 %v4208_v25 }
  0xec   :  { %598 = vmatmul.mubr.bf16.gmra.mxu0 %v4140_v4 }
  0xed   :  { %607 = vmatprep.mubr.bf16.mxu0 %v4142_v5  ;;  %1261 = vmatpush1.bf16.msra.mxu0 %v4206_v26 }
  0xee   :  { %1262 = vmatprep.subr.bf16.mxu0 %v4211_v27 }
  0xf1   :  { %1263 = vmatpush1.bf16.msra.mxu0 %v4209_v28 }
  0xf2   :  { %1264 = vmatprep.subr.bf16.mxu0 %v4214_v29 }
  0xf4   :  { %608 = vmatmul.mubr.bf16.gmra.mxu0 %v4144_v6 }
  0xf5   :  { %1265 = vmatpush1.bf16.msra.mxu0 %v4212_v30 }
  0xf6   :  { %1266 = vmatprep.subr.bf16.mxu0 %v4217_v31 }
  0xf9   :  { %1267 = vmatpush1.bf16.msra.mxu0 %v4215_v32 }
  0xfa   :  { %1268 = vmatprep.subr.bf16.mxu0 %v4220_v33 }
  0xfd   :  { %1269 = vmatpush2.bf16.msra.mxu0 %v4218_v34 }
  0xfe   :  { %1270 = vmatprep.subr.bf16.mxu0 %v4223_v35 }
 0x101   :  { %1271 = vmatpush2.bf16.msra.mxu0 %v4221_v36 }
 0x102   :  { %1272 = vmatprep.subr.bf16.mxu0 %v4226_v37 }
 0x105   :  { %1273 = vmatpush2.bf16.msra.mxu0 %v4224_v38 }
 0x106   :  { %1274 = vmatprep.subr.bf16.mxu0 %v4229_v39 }
 0x109   :  { %1275 = vmatpush2.bf16.msra.mxu0 %v4227_v40 }
 0x168   :  { %v652_v41 = vpop.f32.mrf.mxu1 }
 0x16a   :  { %v654_v42 = vpop.f32.mrf.mxu1 }
 0x16c   :  { %v656_v43 = vpop.f32.mrf.mxu1 }
 0x16e   :  { %v658_v44 = vpop.f32.mrf.mxu1 }
 0x170   :  { %v662_v46 = vpop.f32.mrf.mxu1 }
 0x172   :  { %v664_v48 = vpop.f32.mrf.mxu1 }
 0x174   :  { %v666_v50 = vpop.f32.mrf.mxu1 }
 0x176   :  { %v668_v54 = vpop.f32.mrf.mxu1 }
 0x178   :  { %v672_v59 = vpop.f32.mrf.mxu1 }
 0x17a   :  { %v674_v2 = vpop.f32.mrf.mxu1 }
 0x17c   :  { %v676_v12 = vpop.f32.mrf.mxu1 }
 0x17e   :  { %v678_v25 = vpop.f32.mrf.mxu1 }
 0x180   :  { %v682_v37 = vpop.f32.mrf.mxu1 }
 0x182   :  { %v684_v51 = vpop.f32.mrf.mxu1 }
 0x19c   :  { %v579_v56 = vpop.f32.mrf.mxu0 }
 0x19d   :  { %v580_v57 = vadd.f32 %v579_v56, %v5038_v53 }
 0x19e   :  { %v581_v58 = vpop.f32.mrf.mxu0 }
 0x19f   :  { %v582_v60 = vadd.f32 %v581_v58, %v5041_v55  ;;  %v653_v0 = vadd.f32 %v652_v41, %v580_v57 }
 0x1a0   :  { %v583_v61 = vpop.f32.mrf.mxu0 }
 0x1a1   :  { %v655_v62 = vadd.f32 %v654_v42, %v582_v60  ;;  %v584_v63 = vadd.f32 %v583_v61, %v5038_v53  ;;  %v691_v10 = vmul.f32 0.1, %v653_v0 }
 0x1a2   :  { %v585_v1 = vpop.f32.mrf.mxu0 }
 0x1a3   :  { %v657_v3 = vadd.f32 %v656_v43, %v584_v63  ;;  %v586_v4 = vadd.f32 %v585_v1, %v5041_v55  ;;  %v692_v6 = vmul.f32 0.1, %v655_v62  ;;  %v707_v21 = vmax.f32 %v653_v0, %v691_v10 }
 0x1a4   :  { %v589_v5 = vpop.f32.mrf.mxu0 }
 0x1a5   :  { %v693_v7 = vmul.f32 0.1, %v657_v3  ;;  %v659_v8 = vadd.f32 %v658_v44, %v586_v4  ;;  %v590_v9 = vadd.f32 %v589_v5, %v5038_v53  ;;  %v708_v18 = vmax.f32 %v655_v62, %v692_v6 }
 0x1a6   :  { %v591_v11 = vpop.f32.mrf.mxu0 }
 0x1a7   :  { %v694_v13 = vmul.f32 0.1, %v659_v8  ;;  %v592_v14 = vadd.f32 %v591_v11, %v5041_v55  ;;  %v663_v15 = vadd.f32 %v662_v46, %v590_v9  ;;  %v709_v16 = vmax.f32 %v657_v3, %v693_v7  ;;  %v686_v3 = vpop.f32.mrf.mxu1 }
 0x1a8   :  { %v593_v17 = vpop.f32.mrf.mxu0 }
 0x1a9   :  { %v710_v19 = vmax.f32 %v659_v8, %v694_v13  ;;  %v594_v20 = vadd.f32 %v593_v17, %v5038_v53  ;;  %v695_v22 = vmul.f32 0.1, %v663_v15  ;;  %v665_v23 = vadd.f32 %v664_v48, %v592_v14  ;;  %v688_v14 = vpop.f32.mrf.mxu1 }
 0x1aa   :  { %v595_v24 = vpop.f32.mrf.mxu0  ;;  %v723_v29 = vpack.c.bf16 %v709_v16, %v707_v21 }
 0x1ab   :  { %v596_v26 = vadd.f32 %v595_v24, %v5041_v55  ;;  %v667_v27 = vadd.f32 %v666_v50, %v594_v20  ;;  %v724_v28 = vpack.c.bf16 %v710_v19, %v708_v18  ;;  %v696_v30 = vmul.f32 0.1, %v665_v23 }
 0x1ac   :  { %v599_v31 = vpop.f32.mrf.mxu0  ;;  %v711_v35 = vmax.f32 %v663_v15, %v695_v22 }
 0x1ad   :  { %v697_v32 = vmul.f32 0.1, %v667_v27  ;;  %v600_v33 = vadd.f32 %v599_v31, %v5038_v53  ;;  %v669_v34 = vadd.f32 %v668_v54, %v596_v26  ;;  %967 = vmatprep.mubr.bf16.mxu1 %v724_v28  ;;  %v712_v42 = vmax.f32 %v665_v23, %v696_v30  ;;  %v4232_v28 = vld [vmem:[#allocation10 + $0xb4] ss:$8 sps:$4 sm:$0xff]   ;;  %v4233_v30 = vld [vmem:[#allocation10 + $0xa0] ss:$8 sps:$4 sm:$0xff]  }
 0x1ae   :  { %v601_v36 = vpop.f32.mrf.mxu0  ;;  %968 = vmatmul.mubr.bf16.vlgmr.msra.gmra.mxu1 %v723_v29  ;;  %v4230_v29 = vld [vmem:[#allocation10 + $0xb0] ss:$8 sps:$4 sm:$0xff]   ;;  %1276 = vmatprep.subr.bf16.mxu0 %v4232_v28  ;;  %v4238_v31 = vld [vmem:[#allocation10 + $0x94] ss:$8 sps:$4 sm:$0xff]  }
 0x1af   :  { %v713_v38 = vmax.f32 %v667_v27, %v697_v32  ;;  %v698_v39 = vmul.f32 0.1, %v669_v34  ;;  %v602_v40 = vadd.f32 %v601_v36, %v5041_v55  ;;  %v673_v41 = vadd.f32 %v672_v59, %v600_v33  ;;  %1277 = vmatpush2.bf16.msra.mxu0 %v4230_v29  ;;  %v4236_v32 = vld [vmem:[#allocation10 + $0x90] ss:$8 sps:$4 sm:$0xff]   ;;  %v4241_v33 = vld [vmem:[#allocation10 + $0x84] ss:$8 sps:$4 sm:$0xff]  }
 0x1b0   :  { %v603_v43 = vpop.f32.mrf.mxu0  ;;  %v4244_v36 = vld [vmem:[#allocation12 + $0x74] ss:$8 sps:$4 sm:$0xff]  }
 0x1b1   :  { %v714_v44 = vmax.f32 %v669_v34, %v698_v39  ;;  %v604_v45 = vadd.f32 %v603_v43, %v5038_v53  ;;  %v675_v46 = vadd.f32 %v674_v2, %v602_v40  ;;  %v699_v48 = vmul.f32 0.1, %v673_v41  ;;  %v4239_v34 = vld [vmem:[#allocation10 + $0x80] ss:$8 sps:$4 sm:$0xff]   ;;  %1569 = vmatprep.subr.bf16.mxu1 %v4244_v36  ;;  %v4250_v39 = vld [vmem:[#allocation12 + $0x54] ss:$8 sps:$4 sm:$0xff]  }
 0x1b2   :  { %v605_v50 = vpop.f32.mrf.mxu0  ;;  %v725_v57 = vpack.c.bf16 %v713_v38, %v711_v35  ;;  %v4242_v35 = vld [vmem:[#allocation12 + $0x70] ss:$8 sps:$4 sm:$0xff]   ;;  %v4245_v38 = vld [vmem:[#allocation12 + $0x60] ss:$8 sps:$4 sm:$0xff]   ;;  %v4256_v43 = vld [vmem:[#allocation12 + $0x34] ss:$8 sps:$4 sm:$0xff]  }
 0x1b3   :  { %v606_v54 = vadd.f32 %v605_v50, %v5041_v55  ;;  %v677_v56 = vadd.f32 %v676_v12, %v604_v45  ;;  %v700_v58 = vmul.f32 0.1, %v675_v46  ;;  %v726_v61 = vpack.c.bf16 %v714_v44, %v712_v42  ;;  %1570 = vmatpush1.bf16.msra.mxu1 %v4242_v35  ;;  %v4248_v40 = vld [vmem:[#allocation12 + $0x50] ss:$8 sps:$4 sm:$0xff]   ;;  %v4251_v42 = vld [vmem:[#allocation12 + $0x40] ss:$8 sps:$4 sm:$0xff]  }
 0x1b4   :  { %v609_v60 = vpop.f32.mrf.mxu0  ;;  %v715_v0 = vmax.f32 %v673_v41, %v699_v48  ;;  %v4253_v41 = vld [vmem:[#allocation12 + $0x44] ss:$8 sps:$4 sm:$0xff]   ;;  %v4254_v44 = vld [vmem:[#allocation12 + $0x30] ss:$8 sps:$4 sm:$0xff]   ;;  %v4262_v48 = vld [vmem:[#allocation12 + $0x14] ss:$8 sps:$4 sm:$0xff]  }
 0x1b5   :  { %v701_v62 = vmul.f32 0.1, %v677_v56  ;;  %v610_v63 = vadd.f32 %v609_v60, %v5038_v53  ;;  %v679_v59 = vadd.f32 %v678_v25, %v606_v54  ;;  %977 = vmatprep.mubr.bf16.mxu1 %v726_v61  ;;  %v716_v7 = vmax.f32 %v675_v46, %v700_v58  ;;  %v4259_v45 = vld [vmem:[#allocation12 + $0x24] ss:$8 sps:$4 sm:$0xff]   ;;  %v4257_v46 = vld [vmem:[#allocation12 + $0x20] ss:$8 sps:$4 sm:$0xff]  }
 0x1b6   :  { %v611_v1 = vpop.f32.mrf.mxu0  ;;  %978 = vmatmul.mubr.bf16.gmra.mxu1 %v725_v57  ;;  %v4260_v50 = vld [vmem:[#allocation12 + $0x10] ss:$8 sps:$4 sm:$0xff]   ;;  %v4263_v54 = vld [vmem:[#allocation12] ss:$8 sps:$4 sm:$0xff]   ;;  %v4271_v58 = vld [vmem:[#allocation12 + $0xe4] ss:$8 sps:$4 sm:$0xff]  }
 0x1b7   :  { %v717_v4 = vmax.f32 %v677_v56, %v701_v62  ;;  %v702_v2 = vmul.f32 0.1, %v679_v59  ;;  %v612_v5 = vadd.f32 %v611_v1, %v5041_v55  ;;  %v683_v6 = vadd.f32 %v682_v37, %v610_v63  ;;  %v4247_v37 = vld [vmem:[#allocation12 + $0x64] ss:$8 sps:$4 sm:$0xff]   ;;  %v4268_v56 = vld [vmem:[#allocation12 + $0xf4] ss:$8 sps:$4 sm:$0xff]  }
 0x1b8   :  { %v613_v8 = vpop.f32.mrf.mxu0  ;;  %1571 = vmatprep.subr.bf16.mxu1 %v4247_v37  ;;  %v4266_v57 = vld [vmem:[#allocation12 + $0xf0] ss:$8 sps:$4 sm:$0xff]   ;;  %v4269_v60 = vld [vmem:[#allocation12 + $0xe0] ss:$8 sps:$4 sm:$0xff]   ;;  %v4274_v61 = vld [vmem:[#allocation12 + $0xd4] ss:$8 sps:$4 sm:$0xff]  }
 0x1b9   :  { %v718_v9 = vmax.f32 %v679_v59, %v702_v2  ;;  %v614_v10 = vadd.f32 %v613_v8, %v5038_v53  ;;  %v685_v11 = vadd.f32 %v684_v51, %v612_v5  ;;  %v703_v12 = vmul.f32 0.1, %v683_v6  ;;  %1572 = vmatpush1.bf16.msra.mxu1 %v4245_v38  ;;  %v4265_v51 = vld [vmem:[#allocation12 + $0x4] ss:$8 sps:$4 sm:$0xff]   ;;  %v4272_v62 = vld [vmem:[#allocation12 + $0xd0] ss:$8 sps:$4 sm:$0xff]  }
 0x1ba   :  { %v615_v13 = vpop.f32.mrf.mxu0  ;;  %v727_v18 = vpack.c.bf16 %v717_v4, %v715_v0  ;;  %1573 = vmatprep.subr.bf16.mxu1 %v4250_v39  ;;  %v4277_v63 = vld [vmem:[#allocation12 + $0xc4] ss:$8 sps:$4 sm:$0xff]   ;;  %v4275_v59 = vld [vmem:[#allocation12 + $0xc0] ss:$8 sps:$4 sm:$0xff]   ;;  %v763_v0 = vld [vmem:[#allocation9] sm:$0x3] }
 0x1bb   :  { %v704_v15 = vmul.f32 0.1, %v685_v11  ;;  %v616_v16 = vadd.f32 %v615_v13, %v5041_v55  ;;  %v687_v17 = vadd.f32 %v686_v3, %v614_v10  ;;  %v728_v19 = vpack.c.bf16 %v718_v9, %v716_v7  ;;  %v4235_v55 = vld [vmem:[#allocation10 + $0xa4] ss:$8 sps:$4 sm:$0xff]  }
 0x1bc   :  { %v719_v22 = vmax.f32 %v683_v6, %v703_v12  ;;  %1278 = vmatprep.subr.bf16.mxu0 %v4235_v55  ;;  %v5060_v1 = vrot.slane %v763_v0, %v5035_v52  ;;  %v5063_v3 = vrot.slane %v763_v0, %v5032_v49 }
 0x1bd   :  { %v705_v20 = vmul.f32 0.1, %v687_v17  ;;  %v689_v21 = vadd.f32 %v688_v14, %v616_v16  ;;  %987 = vmatprep.mubr.bf16.mxu1 %v728_v19  ;;  %v720_v23 = vmax.f32 %v685_v11, %v704_v15  ;;  %1279 = vmatpush2.bf16.msra.mxu0 %v4233_v30 }
 0x1be   :  { %988 = vmatmul.mubr.bf16.gmra.mxu1 %v727_v18  ;;  %1280 = vmatprep.subr.bf16.mxu0 %v4238_v31 }
 0x1bf   :  { %v721_v24 = vmax.f32 %v687_v17, %v705_v20  ;;  %v706_v25 = vmul.f32 0.1, %v689_v21  ;;  %1574 = vmatpush1.bf16.msra.mxu1 %v4248_v40 }
 0x1c0   :  { %1575 = vmatprep.subr.bf16.mxu1 %v4253_v41 }
 0x1c1   :  { %v722_v26 = vmax.f32 %v689_v21, %v706_v25  ;;  %v729_v27 = vpack.c.bf16 %v721_v24, %v719_v22  ;;  %1281 = vmatpush2.bf16.msra.mxu0 %v4236_v32 }
 0x1c2   :  { %1282 = vmatprep.subr.bf16.mxu0 %v4241_v33 }
 0x1c3   :  { %v730_v53 = vpack.c.bf16 %v722_v26, %v720_v23  ;;  %1576 = vmatpush1.bf16.msra.mxu1 %v4251_v42 }
 0x1c4   :  { %1577 = vmatprep.subr.bf16.mxu1 %v4256_v43 }
 0x1c5   :  { %997 = vmatprep.mubr.bf16.mxu1 %v730_v53  ;;  %1283 = vmatpush2.bf16.msra.mxu0 %v4239_v34 }
 0x1c6   :  { %998 = vmatmul.mubr.bf16.gmra.mxu1 %v729_v27 }
 0x1c7   :  { %1578 = vmatpush1.bf16.msra.mxu1 %v4254_v44 }
 0x1c8   :  { %1579 = vmatprep.subr.bf16.mxu1 %v4259_v45 }
 0x1cb   :  { %1580 = vmatpush1.bf16.msra.mxu1 %v4257_v46 }
 0x1cc   :  { %1581 = vmatprep.subr.bf16.mxu1 %v4262_v48 }
 0x1cf   :  { %1582 = vmatpush1.bf16.msra.mxu1 %v4260_v50 }
 0x1d0   :  { %1583 = vmatprep.subr.bf16.mxu1 %v4265_v51 }
 0x1d3   :  { %1584 = vmatpush1.bf16.msra.mxu1 %v4263_v54 }
 0x1d4   :  { %1585 = vmatprep.subr.bf16.mxu1 %v4268_v56 }
 0x1d7   :  { %1586 = vmatpush2.bf16.msra.mxu1 %v4266_v57 }
 0x1d8   :  { %1587 = vmatprep.subr.bf16.mxu1 %v4271_v58 }
 0x1db   :  { %1588 = vmatpush2.bf16.msra.mxu1 %v4269_v60 }
 0x1dc   :  { %1589 = vmatprep.subr.bf16.mxu1 %v4274_v61 }
 0x1df   :  { %1590 = vmatpush2.bf16.msra.mxu1 %v4272_v62 }
 0x1e0   :  { %1591 = vmatprep.subr.bf16.mxu1 %v4277_v63 }
 0x1e3   :  { %1592 = vmatpush2.bf16.msra.mxu1 %v4275_v59 }
 0x26e   :  { %v969_v4 = vpop.f32.mrf.mxu1 }
 0x26f   :  { %v970_v6 = vadd.f32 %v969_v4, %v5063_v3 }
 0x270   :  { %v971_v2 = vpop.f32.mrf.mxu1 }
 0x271   :  { %v972_v5 = vadd.f32 %v971_v2, %v5060_v1  ;;  %v1008_v13 = vmul.f32 0.1, %v970_v6 }
 0x272   :  { %v973_v7 = vpop.f32.mrf.mxu1 }
 0x273   :  { %v974_v8 = vadd.f32 %v973_v7, %v5063_v3  ;;  %v1009_v10 = vmul.f32 0.1, %v972_v5  ;;  %v1024_v21 = vmax.f32 %v970_v6, %v1008_v13 }
 0x274   :  { %v975_v9 = vpop.f32.mrf.mxu1 }
 0x275   :  { %v1010_v11 = vmul.f32 0.1, %v974_v8  ;;  %v976_v12 = vadd.f32 %v975_v9, %v5060_v1  ;;  %v1025_v18 = vmax.f32 %v972_v5, %v1009_v10 }
 0x276   :  { %v979_v15 = vpop.f32.mrf.mxu1 }
 0x277   :  { %v1011_v14 = vmul.f32 0.1, %v976_v12  ;;  %v1026_v16 = vmax.f32 %v974_v8, %v1010_v11  ;;  %v980_v17 = vadd.f32 %v979_v15, %v5063_v3 }
 0x278   :  { %v981_v20 = vpop.f32.mrf.mxu1 }
 0x279   :  { %v1027_v19 = vmax.f32 %v976_v12, %v1011_v14  ;;  %v982_v22 = vadd.f32 %v981_v20, %v5060_v1  ;;  %v1012_v23 = vmul.f32 0.1, %v980_v17  ;;  %v1040_v26 = vpack.c.bf16 %v1026_v16, %v1024_v21  ;;  %v4280_v16 = vld [vmem:[#allocation12 + $0xb4] ss:$8 sps:$4 sm:$0xff]   ;;  %v4289_v20 = vld [vmem:[#allocation12 + $0x84] ss:$8 sps:$4 sm:$0xff]  }
 0x27a   :  { %v983_v24 = vpop.f32.mrf.mxu1  ;;  %1593 = vmatprep.subr.bf16.mxu1 %v4280_v16  ;;  %v4287_v21 = vld [vmem:[#allocation12 + $0x80] ss:$8 sps:$4 sm:$0xff]  }
 0x27b   :  { %v1041_v25 = vpack.c.bf16 %v1027_v19, %v1025_v18  ;;  %v1013_v53 = vmul.f32 0.1, %v982_v22  ;;  %v984_v27 = vadd.f32 %v983_v24, %v5063_v3  ;;  %v1028_v30 = vmax.f32 %v980_v17, %v1012_v23  ;;  %v4278_v17 = vld [vmem:[#allocation12 + $0xb0] ss:$8 sps:$4 sm:$0xff]   ;;  %v4281_v18 = vld [vmem:[#allocation12 + $0xa0] ss:$8 sps:$4 sm:$0xff]  }
 0x27c   :  { %v985_v28 = vpop.f32.mrf.mxu1  ;;  %1594 = vmatpush2.bf16.msra.mxu1 %v4278_v17  ;;  %v4284_v19 = vld [vmem:[#allocation12 + $0x90] ss:$8 sps:$4 sm:$0xff]   ;;  %v4292_v23 = vld [vmem:[#allocation13 + $0xe4] ss:$16 sps:$4 sm:$0xff]   ;;  %v4295_v24 = vld [vmem:[#allocation13 + $0xec] ss:$16 sps:$4 sm:$0xff]  }
 0x27d   :  { %1284 = vmatprep.mubr.bf16.mxu0 %v1041_v25  ;;  %v1014_v29 = vmul.f32 0.1, %v984_v27  ;;  %v986_v55 = vadd.f32 %v985_v28, %v5060_v1  ;;  %v1029_v32 = vmax.f32 %v982_v22, %v1013_v53  ;;  %v4290_v22 = vld [vmem:[#allocation13 + $0xe0] ss:$16 sps:$4 sm:$0xff]   ;;  %v4298_v25 = vld [vmem:[#allocation13 + $0xc4] ss:$16 sps:$4 sm:$0xff]   ;;  %2088 = vmatprep.subr.bf16.mxu0 %v4292_v23 }
 0x27e   :  { %1285 = vmatmul.mubr.bf16.vlgmr.msra.gmra.mxu0 %v1040_v26  ;;  %v989_v31 = vpop.f32.mrf.mxu1  ;;  %v4296_v26 = vld [vmem:[#allocation13 + $0xc0] ss:$16 sps:$4 sm:$0xff]   ;;  %v4304_v53 = vld [vmem:[#allocation13 + $0xa4] ss:$16 sps:$4 sm:$0xff]  }
 0x27f   :  { %v1030_v33 = vmax.f32 %v984_v27, %v1014_v29  ;;  %v1015_v34 = vmul.f32 0.1, %v986_v55  ;;  %v990_v35 = vadd.f32 %v989_v31, %v5063_v3  ;;  %2089 = vmatpush1.bf16.msra.mxu0 %v4290_v22  ;;  %v4302_v27 = vld [vmem:[#allocation13 + $0xa0] ss:$16 sps:$4 sm:$0xff]   ;;  %v4310_v28 = vld [vmem:[#allocation13 + $0x84] ss:$16 sps:$4 sm:$0xff]  }
 0x280   :  { %v991_v36 = vpop.f32.mrf.mxu1  ;;  %2090 = vmatprep.subr.bf16.mxu0 %v4298_v25  ;;  %v4308_v29 = vld [vmem:[#allocation13 + $0x80] ss:$16 sps:$4 sm:$0xff]   ;;  %v4322_v31 = vld [vmem:[#allocation13 + $0x44] ss:$16 sps:$4 sm:$0xff]   ;;  %v4299_v22 = vld [vmem:[#allocation13 + $0xc8] ss:$16 sps:$4 sm:$0xff]  }
 0x281   :  { %v1031_v37 = vmax.f32 %v986_v55, %v1015_v34  ;;  %v992_v38 = vadd.f32 %v991_v36, %v5060_v1  ;;  %v1016_v39 = vmul.f32 0.1, %v990_v35  ;;  %v1042_v41 = vpack.c.bf16 %v1030_v33, %v1028_v30  ;;  %v4316_v55 = vld [vmem:[#allocation13 + $0x64] ss:$16 sps:$4 sm:$0xff]   ;;  %v4314_v30 = vld [vmem:[#allocation13 + $0x60] ss:$16 sps:$4 sm:$0xff]  }
 0x282   :  { %v993_v40 = vpop.f32.mrf.mxu1  ;;  %v4328_v33 = vld [vmem:[#allocation13 + $0x24] ss:$16 sps:$4 sm:$0xff]   ;;  %v4326_v34 = vld [vmem:[#allocation13 + $0x20] ss:$16 sps:$4 sm:$0xff]  }
 0x283   :  { %v1017_v42 = vmul.f32 0.1, %v992_v38  ;;  %v994_v43 = vadd.f32 %v993_v40, %v5063_v3  ;;  %v1043_v44 = vpack.c.bf16 %v1031_v37, %v1029_v32  ;;  %v1032_v50 = vmax.f32 %v990_v35, %v1016_v39  ;;  %2091 = vmatpush1.bf16.msra.mxu0 %v4296_v26  ;;  %v4320_v32 = vld [vmem:[#allocation13 + $0x40] ss:$16 sps:$4 sm:$0xff]   ;;  %v4334_v35 = vld [vmem:[#allocation13 + $0x4] ss:$16 sps:$4 sm:$0xff]  }
 0x284   :  { %v995_v45 = vpop.f32.mrf.mxu1  ;;  %2092 = vmatprep.subr.bf16.mxu0 %v4304_v53  ;;  %v4332_v36 = vld [vmem:[#allocation13] ss:$16 sps:$4 sm:$0xff]   ;;  %v4340_v37 = vld [vmem:[#allocation13 + $0x1e4] ss:$16 sps:$4 sm:$0xff]   ;;  %v4307_v53 = vld [vmem:[#allocation13 + $0xac] ss:$16 sps:$4 sm:$0xff]  }
 0x285   :  { %v1018_v46 = vmul.f32 0.1, %v994_v43  ;;  %v996_v48 = vadd.f32 %v995_v45, %v5060_v1  ;;  %1294 = vmatprep.mubr.bf16.mxu0 %v1043_v44  ;;  %v1033_v54 = vmax.f32 %v992_v38, %v1017_v42  ;;  %v4338_v38 = vld [vmem:[#allocation13 + $0x1e0] ss:$16 sps:$4 sm:$0xff]   ;;  %v4346_v39 = vld [vmem:[#allocation13 + $0x1c4] ss:$16 sps:$4 sm:$0xff]  }
 0x286   :  { %v999_v51 = vpop.f32.mrf.mxu1  ;;  %1295 = vmatmul.mubr.bf16.gmra.mxu0 %v1042_v41  ;;  %v4344_v40 = vld [vmem:[#allocation13 + $0x1c0] ss:$16 sps:$4 sm:$0xff]   ;;  %v4352_v41 = vld [vmem:[#allocation13 + $0x1a4] ss:$16 sps:$4 sm:$0xff]   ;;  %v1080_v45 = vld [vmem:[%s5395_s6] sm:$0x3] }
 0x287   :  { %v1034_v56 = vmax.f32 %v994_v43, %v1018_v46  ;;  %v1019_v57 = vmul.f32 0.1, %v996_v48  ;;  %v1000_v58 = vadd.f32 %v999_v51, %v5063_v3  ;;  %2093 = vmatpush1.bf16.msra.mxu0 %v4302_v27  ;;  %v4350_v42 = vld [vmem:[#allocation13 + $0x1a0] ss:$16 sps:$4 sm:$0xff]   ;;  %v4358_v43 = vld [vmem:[#allocation13 + $0x184] ss:$16 sps:$4 sm:$0xff]   ;;  %v5085_v46 = vrot.slane %v1080_v45, %v5035_v52 }
 0x288   :  { %v1001_v60 = vpop.f32.mrf.mxu1  ;;  %2094 = vmatprep.subr.bf16.mxu0 %v4310_v28  ;;  %v4356_v44 = vld [vmem:[#allocation13 + $0x180] ss:$16 sps:$4 sm:$0xff]  }
 0x289   :  { %v1035_v61 = vmax.f32 %v996_v48, %v1019_v57  ;;  %v1002_v62 = vadd.f32 %v1001_v60, %v5060_v1  ;;  %v1020_v63 = vmul.f32 0.1, %v1000_v58  ;;  %v1044_v0 = vpack.c.bf16 %v1034_v56, %v1032_v50 }
 0x28a   :  { %v1003_v59 = vpop.f32.mrf.mxu1  ;;  %v5088_v48 = vrot.slane %v1080_v45, %v5032_v49 }
 0x28b   :  { %v1021_v4 = vmul.f32 0.1, %v1002_v62  ;;  %v1004_v2 = vadd.f32 %v1003_v59, %v5063_v3  ;;  %v1045_v5 = vpack.c.bf16 %v1035_v61, %v1033_v54  ;;  %v1036_v9 = vmax.f32 %v1000_v58, %v1020_v63  ;;  %v4283_v3 = vld [vmem:[#allocation12 + $0xa4] ss:$8 sps:$4 sm:$0xff]   ;;  %2095 = vmatpush1.bf16.msra.mxu0 %v4308_v29 }
 0x28c   :  { %v1005_v6 = vpop.f32.mrf.mxu1  ;;  %1595 = vmatprep.subr.bf16.mxu1 %v4283_v3  ;;  %2096 = vmatprep.subr.bf16.mxu0 %v4316_v55  ;;  %v4301_v3 = vld [vmem:[#allocation13 + $0xcc] ss:$16 sps:$4 sm:$0xff]  }
 0x28d   :  { %v1022_v7 = vmul.f32 0.1, %v1004_v2  ;;  %v1006_v8 = vadd.f32 %v1005_v6, %v5060_v1  ;;  %1304 = vmatprep.mubr.bf16.mxu0 %v1045_v5  ;;  %v1037_v10 = vmax.f32 %v1002_v62, %v1021_v4  ;;  %1596 = vmatpush2.bf16.msra.mxu1 %v4281_v18  ;;  %v4286_v1 = vld [vmem:[#allocation12 + $0x94] ss:$8 sps:$4 sm:$0xff]  }
 0x28e   :  { %1305 = vmatmul.mubr.bf16.gmra.mxu0 %v1044_v0  ;;  %1597 = vmatprep.subr.bf16.mxu1 %v4286_v1 }
 0x28f   :  { %v1038_v11 = vmax.f32 %v1004_v2, %v1022_v7  ;;  %v1023_v12 = vmul.f32 0.1, %v1006_v8  ;;  %2097 = vmatpush1.bf16.msra.mxu0 %v4314_v30 }
 0x290   :  { %2098 = vmatprep.subr.bf16.mxu0 %v4322_v31 }
 0x291   :  { %v1039_v13 = vmax.f32 %v1006_v8, %v1023_v12  ;;  %v1046_v14 = vpack.c.bf16 %v1038_v11, %v1036_v9  ;;  %1598 = vmatpush2.bf16.msra.mxu1 %v4284_v19 }
 0x292   :  { %1599 = vmatprep.subr.bf16.mxu1 %v4289_v20 }
 0x293   :  { %v1047_v15 = vpack.c.bf16 %v1039_v13, %v1037_v10  ;;  %2099 = vmatpush1.bf16.msra.mxu0 %v4320_v32 }
 0x294   :  { %2100 = vmatprep.subr.bf16.mxu0 %v4328_v33 }
 0x295   :  { %1314 = vmatprep.mubr.bf16.mxu0 %v1047_v15  ;;  %1600 = vmatpush2.bf16.msra.mxu1 %v4287_v21 }
 0x296   :  { %1315 = vmatmul.mubr.bf16.gmra.mxu0 %v1046_v14  ;;  %2161 = vmatprep.subr.bf16.mxu1 %v4295_v24  ;;  %v4293_v14 = vld [vmem:[#allocation13 + $0xe8] ss:$16 sps:$4 sm:$0xff]  }
 0x297   :  { %2101 = vmatpush1.bf16.msra.mxu0 %v4326_v34 }
 0x298   :  { %2102 = vmatprep.subr.bf16.mxu0 %v4334_v35  ;;  %v4305_v35 = vld [vmem:[#allocation13 + $0xa8] ss:$16 sps:$4 sm:$0xff]  }
 0x29b   :  { %2103 = vmatpush1.bf16.msra.mxu0 %v4332_v36 }
 0x29c   :  { %2104 = vmatprep.subr.bf16.mxu0 %v4340_v37  ;;  %v4313_v37 = vld [vmem:[#allocation13 + $0x8c] ss:$16 sps:$4 sm:$0xff]  }
 0x29f   :  { %2105 = vmatpush2.bf16.msra.mxu0 %v4338_v38 }
 0x2a0   :  { %2106 = vmatprep.subr.bf16.mxu0 %v4346_v39 }
 0x2a3   :  { %2107 = vmatpush2.bf16.msra.mxu0 %v4344_v40 }
 0x2a4   :  { %2108 = vmatprep.subr.bf16.mxu0 %v4352_v41 }
 0x2a7   :  { %2109 = vmatpush2.bf16.msra.mxu0 %v4350_v42 }
 0x2a8   :  { %2110 = vmatprep.subr.bf16.mxu0 %v4358_v43 }
 0x2ab   :  { %2111 = vmatpush2.bf16.msra.mxu0 %v4356_v44 }
 0x33e   :  { %v1286_v50 = vpop.f32.mrf.mxu0 }
 0x33f   :  { %v1287_v56 = vadd.f32 %v1286_v50, %v5088_v48  ;;  %v4311_v50 = vld [vmem:[#allocation13 + $0x88] ss:$16 sps:$4 sm:$0xff]  }
 0x340   :  { %v1288_v51 = vpop.f32.mrf.mxu0 }
 0x341   :  { %v1289_v54 = vadd.f32 %v1288_v51, %v5085_v46  ;;  %v1325_v59 = vmul.f32 0.1, %v1287_v56 }
 0x342   :  { %v1290_v57 = vpop.f32.mrf.mxu0 }
 0x343   :  { %v1291_v58 = vadd.f32 %v1290_v57, %v5088_v48  ;;  %v1326_v61 = vmul.f32 0.1, %v1289_v54  ;;  %v1341_v9 = vmax.f32 %v1287_v56, %v1325_v59 }
 0x344   :  { %v1292_v60 = vpop.f32.mrf.mxu0 }
 0x345   :  { %v1327_v62 = vmul.f32 0.1, %v1291_v58  ;;  %v1293_v63 = vadd.f32 %v1292_v60, %v5085_v46  ;;  %v1342_v6 = vmax.f32 %v1289_v54, %v1326_v61  ;;  %v4319_v54 = vld [vmem:[#allocation13 + $0x6c] ss:$16 sps:$4 sm:$0xff]  }
 0x346   :  { %v1296_v4 = vpop.f32.mrf.mxu0 }
 0x347   :  { %v1328_v0 = vmul.f32 0.1, %v1293_v63  ;;  %v1343_v2 = vmax.f32 %v1291_v58, %v1327_v62  ;;  %v1297_v5 = vadd.f32 %v1296_v4, %v5088_v48 }
 0x348   :  { %v1298_v8 = vpop.f32.mrf.mxu0 }
 0x349   :  { %v1344_v7 = vmax.f32 %v1293_v63, %v1328_v0  ;;  %v1299_v10 = vadd.f32 %v1298_v8, %v5085_v46  ;;  %v1329_v11 = vmul.f32 0.1, %v1297_v5  ;;  %v1357_v15 = vpack.c.bf16 %v1343_v2, %v1341_v9  ;;  %v4317_v0 = vld [vmem:[#allocation13 + $0x68] ss:$16 sps:$4 sm:$0xff]   ;;  %v4325_v2 = vld [vmem:[#allocation13 + $0x4c] ss:$16 sps:$4 sm:$0xff]  }
 0x34a   :  { %v1300_v12 = vpop.f32.mrf.mxu0 }
 0x34b   :  { %v1358_v13 = vpack.c.bf16 %v1344_v7, %v1342_v6  ;;  %v1330_v16 = vmul.f32 0.1, %v1299_v10  ;;  %v1301_v17 = vadd.f32 %v1300_v12, %v5088_v48  ;;  %v1345_v20 = vmax.f32 %v1297_v5, %v1329_v11  ;;  %v4323_v11 = vld [vmem:[#allocation13 + $0x48] ss:$16 sps:$4 sm:$0xff]   ;;  %v4331_v12 = vld [vmem:[#allocation13 + $0x2c] ss:$16 sps:$4 sm:$0xff]  }
 0x34c   :  { %v1302_v18 = vpop.f32.mrf.mxu0 }
 0x34d   :  { %1601 = vmatprep.mubr.bf16.mxu1 %v1358_v13  ;;  %v1331_v1 = vmul.f32 0.1, %v1301_v17  ;;  %v1303_v19 = vadd.f32 %v1302_v18, %v5085_v46  ;;  %v1346_v23 = vmax.f32 %v1299_v10, %v1330_v16  ;;  %v4337_v16 = vld [vmem:[#allocation13 + $0xc] ss:$16 sps:$4 sm:$0xff]  }
 0x34e   :  { %1602 = vmatmul.mubr.bf16.vlgmr.msra.gmra.mxu1 %v1357_v15  ;;  %v1306_v21 = vpop.f32.mrf.mxu0  ;;  %v4329_v15 = vld [vmem:[#allocation13 + $0x28] ss:$16 sps:$4 sm:$0xff]   ;;  %v4349_v18 = vld [vmem:[#allocation13 + $0x1cc] ss:$16 sps:$4 sm:$0xff]  }
 0x34f   :  { %2162 = vmatpush1.bf16.msra.mxu1 %v4293_v14  ;;  %v1347_v24 = vmax.f32 %v1301_v17, %v1331_v1  ;;  %v1332_v25 = vmul.f32 0.1, %v1303_v19  ;;  %v1307_v26 = vadd.f32 %v1306_v21, %v5088_v48  ;;  %v4343_v17 = vld [vmem:[#allocation13 + $0x1ec] ss:$16 sps:$4 sm:$0xff]   ;;  %v4347_v1 = vld [vmem:[#allocation13 + $0x1c8] ss:$16 sps:$4 sm:$0xff]  }
 0x350   :  { %2163 = vmatprep.subr.bf16.mxu1 %v4301_v3  ;;  %v1308_v27 = vpop.f32.mrf.mxu0  ;;  %v4341_v3 = vld [vmem:[#allocation13 + $0x1e8] ss:$16 sps:$4 sm:$0xff]   ;;  %v4361_v21 = vld [vmem:[#allocation13 + $0x18c] ss:$16 sps:$4 sm:$0xff]  }
 0x351   :  { %v1348_v28 = vmax.f32 %v1303_v19, %v1332_v25  ;;  %v1309_v29 = vadd.f32 %v1308_v27, %v5085_v46  ;;  %v1333_v55 = vmul.f32 0.1, %v1307_v26  ;;  %v1359_v31 = vpack.c.bf16 %v1347_v24, %v1345_v20  ;;  %v4355_v19 = vld [vmem:[#allocation13 + $0x1ac] ss:$16 sps:$4 sm:$0xff]   ;;  %v4353_v20 = vld [vmem:[#allocation13 + $0x1a8] ss:$16 sps:$4 sm:$0xff]  }
 0x352   :  { %v1310_v30 = vpop.f32.mrf.mxu0  ;;  %v4367_v24 = vld [vmem:[#allocation13 + $0x16c] ss:$16 sps:$4 sm:$0xff]   ;;  %v4362_v25 = vld [vmem:[#allocation13 + $0x160] ss:$16 sps:$4 sm:$0xff]  }
 0x353   :  { %2164 = vmatpush1.bf16.msra.mxu1 %v4299_v22  ;;  %v1334_v32 = vmul.f32 0.1, %v1309_v29  ;;  %v1311_v33 = vadd.f32 %v1310_v30, %v5088_v48  ;;  %v1360_v34 = vpack.c.bf16 %v1348_v28, %v1346_v23  ;;  %v1349_v40 = vmax.f32 %v1307_v26, %v1333_v55  ;;  %v4359_v22 = vld [vmem:[#allocation13 + $0x188] ss:$16 sps:$4 sm:$0xff]   ;;  %v4364_v23 = vld [vmem:[#allocation13 + $0x164] ss:$16 sps:$4 sm:$0xff]  }
 0x354   :  { %2165 = vmatprep.subr.bf16.mxu1 %v4307_v53  ;;  %v1312_v36 = vpop.f32.mrf.mxu0  ;;  %v4365_v26 = vld [vmem:[#allocation13 + $0x168] ss:$16 sps:$4 sm:$0xff]   ;;  %2112 = vmatprep.subr.bf16.mxu0 %v4364_v23  ;;  %v4370_v53 = vld [vmem:[#allocation13 + $0x144] ss:$16 sps:$4 sm:$0xff]   ;;  %v4373_v27 = vld [vmem:[#allocation13 + $0x14c] ss:$16 sps:$4 sm:$0xff]  }
 0x355   :  { %v1335_v38 = vmul.f32 0.1, %v1311_v33  ;;  %v1313_v39 = vadd.f32 %v1312_v36, %v5085_v46  ;;  %1611 = vmatprep.mubr.bf16.mxu1 %v1360_v34  ;;  %v1350_v42 = vmax.f32 %v1309_v29, %v1334_v32  ;;  %2113 = vmatpush2.bf16.msra.mxu0 %v4362_v25  ;;  %v4368_v28 = vld [vmem:[#allocation13 + $0x140] ss:$16 sps:$4 sm:$0xff]   ;;  %v4371_v29 = vld [vmem:[#allocation13 + $0x148] ss:$16 sps:$4 sm:$0xff]  }
 0x356   :  { %v1316_v41 = vpop.f32.mrf.mxu0  ;;  %1612 = vmatmul.mubr.bf16.gmra.mxu1 %v1359_v31  ;;  %2114 = vmatprep.subr.bf16.mxu0 %v4370_v53  ;;  %v4376_v55 = vld [vmem:[#allocation13 + $0x124] ss:$16 sps:$4 sm:$0xff]   ;;  %v4379_v30 = vld [vmem:[#allocation13 + $0x12c] ss:$16 sps:$4 sm:$0xff]   ;;  %v4374_v31 = vld [vmem:[#allocation13 + $0x120] ss:$16 sps:$4 sm:$0xff]  }
 0x357   :  { %v1351_v43 = vmax.f32 %v1311_v33, %v1335_v38  ;;  %v1336_v44 = vmul.f32 0.1, %v1313_v39  ;;  %v1317_v45 = vadd.f32 %v1316_v41, %v5088_v48  ;;  %2166 = vmatpush1.bf16.msra.mxu1 %v4305_v35  ;;  %v4377_v32 = vld [vmem:[#allocation13 + $0x128] ss:$16 sps:$4 sm:$0xff]   ;;  %v4382_v33 = vld [vmem:[#allocation13 + $0x104] ss:$16 sps:$4 sm:$0xff]  }
 0x358   :  { %v1318_v51 = vpop.f32.mrf.mxu0  ;;  %2167 = vmatprep.subr.bf16.mxu1 %v4313_v37  ;;  %v4385_v34 = vld [vmem:[#allocation13 + $0x10c] ss:$16 sps:$4 sm:$0xff]   ;;  %v4380_v35 = vld [vmem:[#allocation13 + $0x100] ss:$16 sps:$4 sm:$0xff]   ;;  %v4383_v36 = vld [vmem:[#allocation13 + $0x108] ss:$16 sps:$4 sm:$0xff]  }
 0x359   :  { %v1352_v56 = vmax.f32 %v1313_v39, %v1336_v44  ;;  %v1319_v57 = vadd.f32 %v1318_v51, %v5085_v46  ;;  %v1337_v58 = vmul.f32 0.1, %v1317_v45  ;;  %v1361_v61 = vpack.c.bf16 %v1351_v43, %v1349_v40  ;;  %2115 = vmatpush2.bf16.msra.mxu0 %v4368_v28  ;;  %v4388_v37 = vld [vmem:[#allocation15 + $0x74] ss:$8 sps:$4 sm:$0xff]   ;;  %v4392_v53 = vld [vmem:[#allocation15 + $0x50] ss:$8 sps:$4 sm:$0xff]  }
 0x35a   :  { %v1320_v60 = vpop.f32.mrf.mxu0  ;;  %2116 = vmatprep.subr.bf16.mxu0 %v4376_v55  ;;  %v1397_v38 = vld [vmem:[%s5397_s8] sm:$0x3] }
 0x35b   :  { %v1338_v62 = vmul.f32 0.1, %v1319_v57  ;;  %v1321_v63 = vadd.f32 %v1320_v60, %v5088_v48  ;;  %v1362_v59 = vpack.c.bf16 %v1352_v56, %v1350_v42  ;;  %2168 = vmatpush1.bf16.msra.mxu1 %v4311_v50  ;;  %v1353_v7 = vmax.f32 %v1317_v45, %v1337_v58 }
 0x35c   :  { %v1322_v4 = vpop.f32.mrf.mxu0  ;;  %2169 = vmatprep.subr.bf16.mxu1 %v4319_v54  ;;  %v5110_v39 = vrot.slane %v1397_v38, %v5035_v52  ;;  %v5113_v40 = vrot.slane %v1397_v38, %v5032_v49  ;;  %v4400_v38 = vld [vmem:[#allocation15 + $0x34] ss:$8 sps:$4 sm:$0xff]  }
 0x35d   :  { %v1339_v5 = vmul.f32 0.1, %v1321_v63  ;;  %v1323_v6 = vadd.f32 %v1322_v4, %v5085_v46  ;;  %1621 = vmatprep.mubr.bf16.mxu1 %v1362_v59  ;;  %v1354_v8 = vmax.f32 %v1319_v57, %v1338_v62  ;;  %v4335_v46 = vld [vmem:[#allocation13 + $0x8] ss:$16 sps:$4 sm:$0xff]   ;;  %2117 = vmatpush2.bf16.msra.mxu0 %v4374_v31 }
 0x35e   :  { %1622 = vmatmul.mubr.bf16.gmra.mxu1 %v1361_v61  ;;  %2118 = vmatprep.subr.bf16.mxu0 %v4382_v33 }
 0x35f   :  { %v1355_v9 = vmax.f32 %v1321_v63, %v1339_v5  ;;  %v1340_v10 = vmul.f32 0.1, %v1323_v6  ;;  %2170 = vmatpush1.bf16.msra.mxu1 %v4317_v0 }
 0x360   :  { %2171 = vmatprep.subr.bf16.mxu1 %v4325_v2 }
 0x361   :  { %v1356_v48 = vmax.f32 %v1323_v6, %v1340_v10  ;;  %v1363_v13 = vpack.c.bf16 %v1355_v9, %v1353_v7  ;;  %2119 = vmatpush2.bf16.msra.mxu0 %v4380_v35  ;;  %v4395_v35 = vld [vmem:[#allocation15 + $0x40] ss:$8 sps:$4 sm:$0xff]  }
 0x362   :  { %2510 = vmatprep.subr.bf16.mxu0 %v4388_v37 }
 0x363   :  { %v1364_v14 = vpack.c.bf16 %v1356_v48, %v1354_v8  ;;  %2172 = vmatpush1.bf16.msra.mxu1 %v4323_v11  ;;  %v4386_v8 = vld [vmem:[#allocation15 + $0x70] ss:$8 sps:$4 sm:$0xff]   ;;  %v4391_v11 = vld [vmem:[#allocation15 + $0x64] ss:$8 sps:$4 sm:$0xff]  }
 0x364   :  { %2173 = vmatprep.subr.bf16.mxu1 %v4331_v12 }
 0x365   :  { %1631 = vmatprep.mubr.bf16.mxu1 %v1364_v14 }
 0x366   :  { %1632 = vmatmul.mubr.bf16.gmra.mxu1 %v1363_v13 }
 0x367   :  { %2174 = vmatpush1.bf16.msra.mxu1 %v4329_v15 }
 0x368   :  { %2175 = vmatprep.subr.bf16.mxu1 %v4337_v16 }
 0x36b   :  { %2176 = vmatpush1.bf16.msra.mxu1 %v4335_v46  ;;  %v4389_v46 = vld [vmem:[#allocation15 + $0x60] ss:$8 sps:$4 sm:$0xff]  }
 0x36c   :  { %2177 = vmatprep.subr.bf16.mxu1 %v4343_v17 }
 0x36f   :  { %2178 = vmatpush2.bf16.msra.mxu1 %v4341_v3  ;;  %v4394_v3 = vld [vmem:[#allocation15 + $0x54] ss:$8 sps:$4 sm:$0xff]  }
 0x370   :  { %2179 = vmatprep.subr.bf16.mxu1 %v4349_v18 }
 0x373   :  { %2180 = vmatpush2.bf16.msra.mxu1 %v4347_v1 }
 0x374   :  { %2181 = vmatprep.subr.bf16.mxu1 %v4355_v19 }
 0x377   :  { %2182 = vmatpush2.bf16.msra.mxu1 %v4353_v20 }
 0x378   :  { %2183 = vmatprep.subr.bf16.mxu1 %v4361_v21 }
 0x37b   :  { %2184 = vmatpush2.bf16.msra.mxu1 %v4359_v22 }
 0x37c   :  { %2185 = vmatprep.subr.bf16.mxu1 %v4367_v24 }
 0x37f   :  { %2186 = vmatpush2.bf16.msra.mxu1 %v4365_v26 }
 0x380   :  { %2187 = vmatprep.subr.bf16.mxu1 %v4373_v27 }
 0x383   :  { %2188 = vmatpush2.bf16.msra.mxu1 %v4371_v29  ;;  %v4397_v29 = vld [vmem:[#allocation15 + $0x44] ss:$8 sps:$4 sm:$0xff]  }
 0x384   :  { %2189 = vmatprep.subr.bf16.mxu1 %v4379_v30 }
 0x387   :  { %2190 = vmatpush2.bf16.msra.mxu1 %v4377_v32 }
 0x388   :  { %2191 = vmatprep.subr.bf16.mxu1 %v4385_v34 }
 0x38b   :  { %2192 = vmatpush2.bf16.msra.mxu1 %v4383_v36 }
 0x40e   :  { %v1603_v41 = vpop.f32.mrf.mxu1 }
 0x40f   :  { %v1604_v44 = vadd.f32 %v1603_v41, %v5113_v40 }
 0x410   :  { %v1605_v42 = vpop.f32.mrf.mxu1 }
 0x411   :  { %v1606_v43 = vadd.f32 %v1605_v42, %v5110_v39  ;;  %v1642_v58 = vmul.f32 0.1, %v1604_v44 }
 0x412   :  { %v1607_v45 = vpop.f32.mrf.mxu1 }
 0x413   :  { %v1608_v50 = vadd.f32 %v1607_v45, %v5113_v40  ;;  %v1643_v54 = vmul.f32 0.1, %v1606_v43  ;;  %v1658_v4 = vmax.f32 %v1604_v44, %v1642_v58 }
 0x414   :  { %v1609_v51 = vpop.f32.mrf.mxu1 }
 0x415   :  { %v1644_v56 = vmul.f32 0.1, %v1608_v50  ;;  %v1610_v57 = vadd.f32 %v1609_v51, %v5110_v39  ;;  %v1659_v63 = vmax.f32 %v1606_v43, %v1643_v54 }
 0x416   :  { %v1613_v61 = vpop.f32.mrf.mxu1 }
 0x417   :  { %v1645_v60 = vmul.f32 0.1, %v1610_v57  ;;  %v1660_v62 = vmax.f32 %v1608_v50, %v1644_v56  ;;  %v1614_v5 = vadd.f32 %v1613_v61, %v5113_v40  ;;  %v4398_v56 = vld [vmem:[#allocation15 + $0x30] ss:$8 sps:$4 sm:$0xff]  }
 0x418   :  { %v1615_v0 = vpop.f32.mrf.mxu1 }
 0x419   :  { %v1661_v59 = vmax.f32 %v1610_v57, %v1645_v60  ;;  %v1616_v2 = vadd.f32 %v1615_v0, %v5110_v39  ;;  %v1674_v9 = vpack.c.bf16 %v1660_v62, %v1658_v4  ;;  %v1646_v15 = vmul.f32 0.1, %v1614_v5  ;;  %v4403_v60 = vld [vmem:[#allocation15 + $0x24] ss:$8 sps:$4 sm:$0xff]   ;;  %v4401_v4 = vld [vmem:[#allocation15 + $0x20] ss:$8 sps:$4 sm:$0xff]  }
 0x41a   :  { %v1617_v6 = vpop.f32.mrf.mxu1 }
 0x41b   :  { %v1675_v7 = vpack.c.bf16 %v1661_v59, %v1659_v63  ;;  %v1618_v10 = vadd.f32 %v1617_v6, %v5113_v40  ;;  %v1647_v48 = vmul.f32 0.1, %v1616_v2  ;;  %v1662_v22 = vmax.f32 %v1614_v5, %v1646_v15  ;;  %v4418_v15 = vld [vmem:[#allocation15 + $0xd4] ss:$8 sps:$4 sm:$0xff]  }
 0x41c   :  { %v1619_v12 = vpop.f32.mrf.mxu1 }
 0x41d   :  { %2120 = vmatprep.mubr.bf16.mxu0 %v1675_v7  ;;  %2193 = vmatprep.mubr.bf16.mxu1 %v1675_v7  ;;  %v1648_v13 = vmul.f32 0.1, %v1618_v10  ;;  %v1620_v14 = vadd.f32 %v1619_v12, %v5110_v39  ;;  %v1663_v19 = vmax.f32 %v1616_v2, %v1647_v48  ;;  %v4406_v2 = vld [vmem:[#allocation15 + $0x14] ss:$8 sps:$4 sm:$0xff]   ;;  %v4410_v48 = vld [vmem:[#allocation15 + $0xf0] ss:$8 sps:$4 sm:$0xff]  }
 0x41e   :  { %2121 = vmatmul.mubr.bf16.vlgmr.msra.gmra.mxu0 %v1674_v9  ;;  %2194 = vmatmul.mubr.bf16.vlgmr.msra.gmra.mxu1 %v1674_v9  ;;  %v1623_v16 = vpop.f32.mrf.mxu1  ;;  %v4404_v9 = vld [vmem:[#allocation15 + $0x10] ss:$8 sps:$4 sm:$0xff]   ;;  %v4412_v12 = vld [vmem:[#allocation15 + $0xf4] ss:$8 sps:$4 sm:$0xff]  }
 0x41f   :  { %2511 = vmatpush1.bf16.msra.mxu0 %v4386_v8  ;;  %v1649_v17 = vmul.f32 0.1, %v1620_v14  ;;  %v1664_v18 = vmax.f32 %v1618_v10, %v1648_v13  ;;  %v1624_v23 = vadd.f32 %v1623_v16, %v5113_v40  ;;  %v4415_v13 = vld [vmem:[#allocation15 + $0xe4] ss:$8 sps:$4 sm:$0xff]   ;;  %v4416_v16 = vld [vmem:[#allocation15 + $0xd0] ss:$8 sps:$4 sm:$0xff]  }
 0x420   :  { %2512 = vmatprep.subr.bf16.mxu0 %v4391_v11  ;;  %v1625_v1 = vpop.f32.mrf.mxu1  ;;  %v4407_v11 = vld [vmem:[#allocation15] ss:$8 sps:$4 sm:$0xff]  }
 0x421   :  { %v1665_v20 = vmax.f32 %v1620_v14, %v1649_v17  ;;  %v1626_v21 = vadd.f32 %v1625_v1, %v5110_v39  ;;  %v1676_v28 = vpack.c.bf16 %v1664_v18, %v1662_v22  ;;  %v1650_v32 = vmul.f32 0.1, %v1624_v23  ;;  %v4413_v14 = vld [vmem:[#allocation15 + $0xe0] ss:$8 sps:$4 sm:$0xff]   ;;  %v4422_v18 = vld [vmem:[#allocation15 + $0xb0] ss:$8 sps:$4 sm:$0xff]  }
 0x422   :  { %v1627_v24 = vpop.f32.mrf.mxu1  ;;  %v4419_v17 = vld [vmem:[#allocation15 + $0xc0] ss:$8 sps:$4 sm:$0xff]   ;;  %v4427_v1 = vld [vmem:[#allocation15 + $0xa4] ss:$8 sps:$4 sm:$0xff]  }
 0x423   :  { %2513 = vmatpush1.bf16.msra.mxu0 %v4389_v46  ;;  %v1628_v25 = vadd.f32 %v1627_v24, %v5113_v40  ;;  %v1677_v26 = vpack.c.bf16 %v1665_v20, %v1663_v19  ;;  %v1651_v55 = vmul.f32 0.1, %v1626_v21  ;;  %v1666_v44 = vmax.f32 %v1624_v23, %v1650_v32  ;;  %v4421_v46 = vld [vmem:[#allocation15 + $0xc4] ss:$8 sps:$4 sm:$0xff]   ;;  %v4425_v19 = vld [vmem:[#allocation15 + $0xa0] ss:$8 sps:$4 sm:$0xff]  }
 0x424   :  { %2514 = vmatprep.subr.bf16.mxu0 %v4394_v3  ;;  %v1629_v27 = vpop.f32.mrf.mxu1  ;;  %v4424_v3 = vld [vmem:[#allocation15 + $0xb4] ss:$8 sps:$4 sm:$0xff]   ;;  %v4433_v22 = vld [vmem:[#allocation15 + $0x84] ss:$8 sps:$4 sm:$0xff]   ;;  %v4431_v23 = vld [vmem:[#allocation15 + $0x80] ss:$8 sps:$4 sm:$0xff]  }
 0x425   :  { %v1652_v30 = vmul.f32 0.1, %v1628_v25  ;;  %v1630_v31 = vadd.f32 %v1629_v27, %v5110_v39  ;;  %2130 = vmatprep.mubr.bf16.mxu0 %v1677_v26  ;;  %2203 = vmatprep.mubr.bf16.mxu1 %v1677_v26  ;;  %v1667_v41 = vmax.f32 %v1626_v21, %v1651_v55  ;;  %v4430_v20 = vld [vmem:[#allocation15 + $0x94] ss:$8 sps:$4 sm:$0xff]   ;;  %v4428_v21 = vld [vmem:[#allocation15 + $0x90] ss:$8 sps:$4 sm:$0xff]  }
 0x426   :  { %v1633_v33 = vpop.f32.mrf.mxu1  ;;  %2131 = vmatmul.mubr.bf16.gmra.mxu0 %v1676_v28  ;;  %2204 = vmatmul.mubr.bf16.gmra.mxu1 %v1676_v28  ;;  %v4436_v24 = vld [vmem:[#allocation18 + $0x74] ss:$8 sps:$4 sm:$0xff]   ;;  %v4485_v27 = vld [vmem:[#allocation16 + $0x60] ss:$8 sps:$4 sm:$0xff]   ;;  %v4493_v55 = vld [vmem:[#allocation16 + $0x44] ss:$8 sps:$4 sm:$0xff]  }
 0x427   :  { %v1653_v34 = vmul.f32 0.1, %v1630_v31  ;;  %2515 = vmatpush1.bf16.msra.mxu0 %v4392_v53  ;;  %v1668_v36 = vmax.f32 %v1628_v25, %v1652_v30  ;;  %v1634_v45 = vadd.f32 %v1633_v33, %v5113_v40  ;;  %v4482_v25 = vld [vmem:[#allocation16 + $0x70] ss:$8 sps:$4 sm:$0xff]   ;;  %v4484_v26 = vld [vmem:[#allocation16 + $0x74] ss:$8 sps:$4 sm:$0xff]  }
 0x428   :  { %v1635_v37 = vpop.f32.mrf.mxu1  ;;  %2516 = vmatprep.subr.bf16.mxu0 %v4397_v29  ;;  %v4487_v53 = vld [vmem:[#allocation16 + $0x64] ss:$8 sps:$4 sm:$0xff]   ;;  %2827 = vmatprep.subr.bf16.mxu1 %v4484_v26  ;;  %v4490_v28 = vld [vmem:[#allocation16 + $0x54] ss:$8 sps:$4 sm:$0xff]   ;;  %v4488_v29 = vld [vmem:[#allocation16 + $0x50] ss:$8 sps:$4 sm:$0xff]  }
 0x429   :  { %v1669_v42 = vmax.f32 %v1630_v31, %v1653_v34  ;;  %v1636_v43 = vadd.f32 %v1635_v37, %v5110_v39  ;;  %v1678_v58 = vpack.c.bf16 %v1668_v36, %v1666_v44  ;;  %v1654_v59 = vmul.f32 0.1, %v1634_v45  ;;  %2828 = vmatpush1.bf16.msra.mxu1 %v4482_v25  ;;  %v4491_v30 = vld [vmem:[#allocation16 + $0x40] ss:$8 sps:$4 sm:$0xff]   ;;  %v4496_v31 = vld [vmem:[#allocation16 + $0x34] ss:$8 sps:$4 sm:$0xff]  }
 0x42a   :  { %v1637_v50 = vpop.f32.mrf.mxu1  ;;  %2829 = vmatprep.subr.bf16.mxu1 %v4487_v53  ;;  %v4494_v32 = vld [vmem:[#allocation16 + $0x30] ss:$8 sps:$4 sm:$0xff]   ;;  %v4499_v33 = vld [vmem:[#allocation16 + $0x24] ss:$8 sps:$4 sm:$0xff]   ;;  %v4497_v34 = vld [vmem:[#allocation16 + $0x20] ss:$8 sps:$4 sm:$0xff]  }
 0x42b   :  { %v1638_v51 = vadd.f32 %v1637_v50, %v5113_v40  ;;  %v1679_v54 = vpack.c.bf16 %v1669_v42, %v1667_v41  ;;  %2517 = vmatpush1.bf16.msra.mxu0 %v4395_v35  ;;  %v1655_v61 = vmul.f32 0.1, %v1636_v43  ;;  %v1670_v7 = vmax.f32 %v1634_v45, %v1654_v59  ;;  %v4502_v35 = vld [vmem:[#allocation16 + $0x14] ss:$8 sps:$4 sm:$0xff]   ;;  %v4503_v50 = vld [vmem:[#allocation16] ss:$8 sps:$4 sm:$0xff]  }
 0x42c   :  { %v1639_v57 = vpop.f32.mrf.mxu1  ;;  %2518 = vmatprep.subr.bf16.mxu0 %v4400_v38  ;;  %v5134_v36 = vld [vmem:[%s5399_s10] sm:$0xf]  ;;  %v4500_v38 = vld [vmem:[#allocation16 + $0x10] ss:$8 sps:$4 sm:$0xff]  }
 0x42d   :  { %v1656_v62 = vmul.f32 0.1, %v1638_v51  ;;  %v1640_v63 = vadd.f32 %v1639_v57, %v5110_v39  ;;  %2140 = vmatprep.mubr.bf16.mxu0 %v1679_v54  ;;  %2213 = vmatprep.mubr.bf16.mxu1 %v1679_v54  ;;  %v1671_v5 = vmax.f32 %v1636_v43, %v1655_v61  ;;  %v4409_v39 = vld [vmem:[#allocation15 + $0x4] ss:$8 sps:$4 sm:$0xff]   ;;  %v5138_v37 = vrot.slane %v5134_v36, %v5035_v52  ;;  %v4442_v26 = vld [vmem:[#allocation18 + $0x54] ss:$8 sps:$4 sm:$0xff]  }
 0x42e   :  { %2141 = vmatmul.mubr.bf16.gmra.mxu0 %v1678_v58  ;;  %2214 = vmatmul.mubr.bf16.gmra.mxu1 %v1678_v58  ;;  %v5142_v41 = vrot.slane %v5134_v36, %v5032_v49  ;;  %v4505_v43 = vld [vmem:[#allocation16 + $0x4] ss:$8 sps:$4 sm:$0xff]  }
 0x42f   :  { %v1657_v0 = vmul.f32 0.1, %v1640_v63  ;;  %2519 = vmatpush1.bf16.msra.mxu0 %v4398_v56  ;;  %v1672_v40 = vmax.f32 %v1638_v51, %v1656_v62  ;;  %2830 = vmatpush1.bf16.msra.mxu1 %v4485_v27  ;;  %v4508_v56 = vld [vmem:[#allocation16 + $0xf4] ss:$8 sps:$4 sm:$0xff]   ;;  %v4506_v62 = vld [vmem:[#allocation16 + $0xf0] ss:$8 sps:$4 sm:$0xff]  }
 0x430   :  { %2520 = vmatprep.subr.bf16.mxu0 %v4403_v60  ;;  %2831 = vmatprep.subr.bf16.mxu1 %v4490_v28  ;;  %v4515_v27 = vld [vmem:[#allocation16 + $0xc0] ss:$8 sps:$4 sm:$0xff]  }
 0x431   :  { %v1673_v6 = vmax.f32 %v1640_v63, %v1657_v0  ;;  %v1680_v10 = vpack.c.bf16 %v1672_v40, %v1670_v7  ;;  %v4511_v0 = vld [vmem:[#allocation16 + $0xe4] ss:$8 sps:$4 sm:$0xff]  }
 0x433   :  { %v1681_v8 = vpack.c.bf16 %v1673_v6, %v1671_v5  ;;  %2521 = vmatpush1.bf16.msra.mxu0 %v4401_v4  ;;  %2832 = vmatpush1.bf16.msra.mxu1 %v4488_v29 }
 0x434   :  { %2522 = vmatprep.subr.bf16.mxu0 %v4406_v2  ;;  %2833 = vmatprep.subr.bf16.mxu1 %v4493_v55  ;;  %v4520_v55 = vld [vmem:[#allocation16 + $0xb4] ss:$8 sps:$4 sm:$0xff]  }
 0x435   :  { %2150 = vmatprep.mubr.bf16.mxu0 %v1681_v8  ;;  %2223 = vmatprep.mubr.bf16.mxu1 %v1681_v8  ;;  %v4509_v8 = vld [vmem:[#allocation16 + $0xe0] ss:$8 sps:$4 sm:$0xff]  }
 0x436   :  { %2151 = vmatmul.mubr.bf16.gmra.mxu0 %v1680_v10  ;;  %2224 = vmatmul.mubr.bf16.gmra.mxu1 %v1680_v10  ;;  %v4514_v10 = vld [vmem:[#allocation16 + $0xd4] ss:$8 sps:$4 sm:$0xff]  }
 0x437   :  { %2523 = vmatpush1.bf16.msra.mxu0 %v4404_v9  ;;  %2834 = vmatpush1.bf16.msra.mxu1 %v4491_v30 }
 0x438   :  { %2524 = vmatprep.subr.bf16.mxu0 %v4409_v39  ;;  %2835 = vmatprep.subr.bf16.mxu1 %v4496_v31 }
 0x43b   :  { %2525 = vmatpush1.bf16.msra.mxu0 %v4407_v11  ;;  %2836 = vmatpush1.bf16.msra.mxu1 %v4494_v32 }
 0x43c   :  { %2526 = vmatprep.subr.bf16.mxu0 %v4412_v12  ;;  %2837 = vmatprep.subr.bf16.mxu1 %v4499_v33  ;;  %v4440_v33 = vld [vmem:[#allocation18 + $0x50] ss:$8 sps:$4 sm:$0xff]  }
 0x43f   :  { %2527 = vmatpush2.bf16.msra.mxu0 %v4410_v48  ;;  %2838 = vmatpush1.bf16.msra.mxu1 %v4497_v34  ;;  %v4434_v48 = vld [vmem:[#allocation18 + $0x70] ss:$8 sps:$4 sm:$0xff]  }
 0x440   :  { %2528 = vmatprep.subr.bf16.mxu0 %v4415_v13  ;;  %2839 = vmatprep.subr.bf16.mxu1 %v4502_v35 }
 0x443   :  { %2529 = vmatpush2.bf16.msra.mxu0 %v4413_v14  ;;  %2840 = vmatpush1.bf16.msra.mxu1 %v4500_v38 }
 0x444   :  { %2530 = vmatprep.subr.bf16.mxu0 %v4418_v15  ;;  %2841 = vmatprep.subr.bf16.mxu1 %v4505_v43  ;;  %v1762_v43 = vsub.s32 3, %v5029_v47 }
 0x447   :  { %2531 = vmatpush2.bf16.msra.mxu0 %v4416_v16  ;;  %2842 = vmatpush1.bf16.msra.mxu1 %v4503_v50  ;;  %v4445_v50 = vld [vmem:[#allocation18 + $0x44] ss:$8 sps:$4 sm:$0xff]  }
 0x448   :  { %2532 = vmatprep.subr.bf16.mxu0 %v4421_v46  ;;  %2843 = vmatprep.subr.bf16.mxu1 %v4508_v56  ;;  %v4439_v46 = vld [vmem:[#allocation18 + $0x64] ss:$8 sps:$4 sm:$0xff]  }
 0x44b   :  { %2533 = vmatpush2.bf16.msra.mxu0 %v4419_v17  ;;  %2844 = vmatpush2.bf16.msra.mxu1 %v4506_v62 }
 0x44c   :  { %2534 = vmatprep.subr.bf16.mxu0 %v4424_v3  ;;  %2845 = vmatprep.subr.bf16.mxu1 %v4511_v0  ;;  %v4512_v3 = vld [vmem:[#allocation16 + $0xd0] ss:$8 sps:$4 sm:$0xff]   ;;  %v5162_v0 = vrot.slane %v5134_v36, %v1762_v43  ;;  %v4463_v43 = vld [vmem:[#allocation18 + $0xe4] ss:$8 sps:$4 sm:$0xff]  }
 0x44f   :  { %2535 = vmatpush2.bf16.msra.mxu0 %v4422_v18  ;;  %2846 = vmatpush2.bf16.msra.mxu1 %v4509_v8 }
 0x450   :  { %2536 = vmatprep.subr.bf16.mxu0 %v4427_v1  ;;  %2847 = vmatprep.subr.bf16.mxu1 %v4514_v10  ;;  %v4446_v10 = vld [vmem:[#allocation18 + $0x30] ss:$8 sps:$4 sm:$0xff]  }
 0x453   :  { %2537 = vmatpush2.bf16.msra.mxu0 %v4425_v19  ;;  %v4517_v19 = vld [vmem:[#allocation16 + $0xc4] ss:$8 sps:$4 sm:$0xff]   ;;  %2848 = vmatpush2.bf16.msra.mxu1 %v4512_v3 }
 0x454   :  { %2538 = vmatprep.subr.bf16.mxu0 %v4430_v20  ;;  %2849 = vmatprep.subr.bf16.mxu1 %v4517_v19  ;;  %v4449_v19 = vld [vmem:[#allocation18 + $0x20] ss:$8 sps:$4 sm:$0xff]  }
 0x457   :  { %2539 = vmatpush2.bf16.msra.mxu0 %v4428_v21  ;;  %2850 = vmatpush2.bf16.msra.mxu1 %v4515_v27 }
 0x458   :  { %2540 = vmatprep.subr.bf16.mxu0 %v4433_v22  ;;  %v4437_v22 = vld [vmem:[#allocation18 + $0x60] ss:$8 sps:$4 sm:$0xff]   ;;  %2851 = vmatprep.subr.bf16.mxu1 %v4520_v55 }
 0x45b   :  { %2541 = vmatpush2.bf16.msra.mxu0 %v4431_v23 }
 0x45c   :  { %3144 = vmatprep.subr.bf16.mxu0 %v4436_v24 }
 0x4de   :  { %v2122_v42 = vpop.f32.mrf.mxu0  ;;  %v5149_v13 = vpop.f32.mrf.mxu1 }
 0x4df   :  { %v2123_v51 = vadd.f32 %v2122_v42, %v5142_v41 }
 0x4e0   :  { %v2124_v44 = vpop.f32.mrf.mxu0  ;;  %v2197_v23 = vpop.f32.mrf.mxu1 }
 0x4e1   :  { %v2125_v45 = vadd.f32 %v2124_v44, %v5138_v37  ;;  %v2234_v63 = vmul.f32 0.1, %v2123_v51 }
 0x4e2   :  { %v2126_v54 = vpop.f32.mrf.mxu0  ;;  %v5155_v34 = vpop.f32.mrf.mxu1 }
 0x4e3   :  { %v2127_v57 = vadd.f32 %v2126_v54, %v5142_v41  ;;  %v2235_v60 = vmul.f32 0.1, %v2125_v45  ;;  %v2266_v9 = vmax.f32 %v2123_v51, %v2234_v63  ;;  %v4518_v51 = vld [vmem:[#allocation16 + $0xb0] ss:$8 sps:$4 sm:$0xff]  }
 0x4e4   :  { %v2128_v58 = vpop.f32.mrf.mxu0  ;;  %v2201_v62 = vpop.f32.mrf.mxu1  ;;  %2852 = vmatpush2.bf16.msra.mxu1 %v4518_v51 }
 0x4e5   :  { %v2129_v61 = vadd.f32 %v2128_v58, %v5138_v37  ;;  %v2238_v59 = vmul.f32 0.1, %v2127_v57  ;;  %v2267_v5 = vmax.f32 %v2125_v45, %v2235_v60 }
 0x4e6   :  { %v2132_v40 = vpop.f32.mrf.mxu0 }
 0x4e7   :  { %v2239_v4 = vmul.f32 0.1, %v2129_v61  ;;  %v2270_v2 = vmax.f32 %v2127_v57, %v2238_v59  ;;  %v2133_v15 = vadd.f32 %v2132_v40, %v5142_v41  ;;  %v4448_v59 = vld [vmem:[#allocation18 + $0x34] ss:$8 sps:$4 sm:$0xff]  }
 0x4e8   :  { %v2134_v7 = vpop.f32.mrf.mxu0 }
 0x4e9   :  { %v2271_v6 = vmax.f32 %v2129_v61, %v2239_v4  ;;  %v2135_v39 = vadd.f32 %v2134_v7, %v5138_v37  ;;  %v2298_v14 = vpack.c.bf16 %v2270_v2, %v2266_v9  ;;  %v2242_v24 = vmul.f32 0.1, %v2133_v15  ;;  %v4443_v61 = vld [vmem:[#allocation18 + $0x40] ss:$8 sps:$4 sm:$0xff]  }
 0x4ea   :  { %v2136_v11 = vpop.f32.mrf.mxu0 }
 0x4eb   :  { %v2299_v12 = vpack.c.bf16 %v2271_v6, %v2267_v5  ;;  %v2137_v16 = vadd.f32 %v2136_v11, %v5142_v41  ;;  %v2243_v20 = vmul.f32 0.1, %v2135_v39  ;;  %v2274_v35 = vmax.f32 %v2133_v15, %v2242_v24 }
 0x4ec   :  { %v2138_v17 = vpop.f32.mrf.mxu0  ;;  %v2202_v6 = vadd.f32 %v2201_v62, %v5162_v0 }
 0x4ed   :  { %2542 = vmatprep.mubr.bf16.mxu0 %v2299_v12  ;;  %v2246_v18 = vmul.f32 0.1, %v2137_v16  ;;  %v2139_v1 = vadd.f32 %v2138_v17, %v5138_v37  ;;  %v2275_v30 = vmax.f32 %v2135_v39, %v2243_v20  ;;  %v4451_v12 = vld [vmem:[#allocation18 + $0x24] ss:$8 sps:$4 sm:$0xff]  }
 0x4ee   :  { %2543 = vmatmul.mubr.bf16.vlgmr.msra.gmra.mxu0 %v2298_v14  ;;  %v2142_v21 = vpop.f32.mrf.mxu0 }
 0x4ef   :  { %3145 = vmatpush1.bf16.msra.mxu0 %v4434_v48  ;;  %v2247_v25 = vmul.f32 0.1, %v2139_v1  ;;  %v2278_v28 = vmax.f32 %v2137_v16, %v2246_v18  ;;  %v2143_v38 = vadd.f32 %v2142_v21, %v5142_v41  ;;  %v2198_v48 = vadd.f32 %v2197_v23, %v5162_v0  ;;  %v5170_v23 = vpop.f32.mrf.mxu1 }
 0x4f0   :  { %3146 = vmatprep.subr.bf16.mxu0 %v4439_v46  ;;  %v2144_v53 = vpop.f32.mrf.mxu0  ;;  %v2241_v18 = vmul.f32 0.1, %v2202_v6 }
 0x4f1   :  { %v2279_v29 = vmax.f32 %v2139_v1, %v2247_v25  ;;  %v2145_v31 = vadd.f32 %v2144_v53, %v5138_v37  ;;  %v2300_v56 = vpack.c.bf16 %v2278_v28, %v2274_v35  ;;  %v2250_v63 = vmul.f32 0.1, %v2143_v38  ;;  %v4460_v35 = vld [vmem:[#allocation18 + $0xf4] ss:$8 sps:$4 sm:$0xff]  }
 0x4f2   :  { %v2146_v32 = vpop.f32.mrf.mxu0  ;;  %v2237_v24 = vmul.f32 0.1, %v2198_v48  ;;  %v2273_v53 = vmax.f32 %v2202_v6, %v2241_v18  ;;  %v4478_v6 = vld [vmem:[#allocation18 + $0x94] ss:$8 sps:$4 sm:$0xff]  }
 0x4f3   :  { %3147 = vmatpush1.bf16.msra.mxu0 %v4437_v22  ;;  %v2147_v42 = vadd.f32 %v2146_v32, %v5142_v41  ;;  %v2301_v45 = vpack.c.bf16 %v2279_v29, %v2275_v30  ;;  %v2251_v57 = vmul.f32 0.1, %v2145_v31  ;;  %v2282_v39 = vmax.f32 %v2143_v38, %v2250_v63  ;;  %v4454_v22 = vld [vmem:[#allocation18 + $0x14] ss:$8 sps:$4 sm:$0xff]   ;;  %v4457_v29 = vld [vmem:[#allocation18 + $0x4] ss:$8 sps:$4 sm:$0xff]   ;;  %v2207_v30 = vpop.f32.mrf.mxu1 }
 0x4f4   :  { %3148 = vmatprep.subr.bf16.mxu0 %v4442_v26  ;;  %v2148_v44 = vpop.f32.mrf.mxu0  ;;  %v2269_v55 = vmax.f32 %v2198_v48, %v2237_v24  ;;  %v4470_v63 = vld [vmem:[#allocation18 + $0xb0] ss:$8 sps:$4 sm:$0xff]  }
 0x4f5   :  { %v2254_v54 = vmul.f32 0.1, %v2147_v42  ;;  %v2149_v58 = vadd.f32 %v2148_v44, %v5138_v37  ;;  %2552 = vmatprep.mubr.bf16.mxu0 %v2301_v45  ;;  %v2283_v7 = vmax.f32 %v2145_v31, %v2251_v57  ;;  %v2209_v38 = vpop.f32.mrf.mxu1  ;;  %v4461_v45 = vld [vmem:[#allocation18 + $0xe0] ss:$8 sps:$4 sm:$0xff]  }
 0x4f6   :  { %v2152_v60 = vpop.f32.mrf.mxu0  ;;  %2553 = vmatmul.mubr.bf16.gmra.mxu0 %v2300_v56  ;;  %v2933_v32 = vpack.c.bf16 %v2273_v53, %v2269_v55  ;;  %v4469_v56 = vld [vmem:[#allocation18 + $0xc4] ss:$8 sps:$4 sm:$0xff]  }
 0x4f7   :  { %3149 = vmatpush1.bf16.msra.mxu0 %v4440_v33  ;;  %v2255_v4 = vmul.f32 0.1, %v2149_v58  ;;  %v2286_v2 = vmax.f32 %v2147_v42, %v2254_v54  ;;  %v2153_v11 = vadd.f32 %v2152_v60, %v5142_v41  ;;  %v4455_v33 = vld [vmem:[#allocation18] ss:$8 sps:$4 sm:$0xff]   ;;  %v4458_v42 = vld [vmem:[#allocation18 + $0xf0] ss:$8 sps:$4 sm:$0xff]   ;;  %v2211_v44 = vpop.f32.mrf.mxu1 }
 0x4f8   :  { %v2154_v40 = vpop.f32.mrf.mxu0  ;;  %3150 = vmatprep.subr.bf16.mxu0 %v4445_v50  ;;  %v4466_v50 = vld [vmem:[#allocation18 + $0xd4] ss:$8 sps:$4 sm:$0xff]   ;;  %v4464_v54 = vld [vmem:[#allocation18 + $0xd0] ss:$8 sps:$4 sm:$0xff]  }
 0x4f9   :  { %v2155_v5 = vadd.f32 %v2154_v40, %v5138_v37  ;;  %v2287_v8 = vmax.f32 %v2149_v58, %v2255_v4  ;;  %v2302_v3 = vpack.c.bf16 %v2286_v2, %v2282_v39  ;;  %v2258_v20 = vmul.f32 0.1, %v2153_v11  ;;  %v5172_v51 = vpop.f32.mrf.mxu1  ;;  %v4467_v58 = vld [vmem:[#allocation18 + $0xc0] ss:$8 sps:$4 sm:$0xff]   ;;  %v4472_v60 = vld [vmem:[#allocation18 + $0xb4] ss:$8 sps:$4 sm:$0xff]  }
 0x4fa   :  { %v2156_v9 = vpop.f32.mrf.mxu0  ;;  %v4473_v2 = vld [vmem:[#allocation18 + $0xa0] ss:$8 sps:$4 sm:$0xff]   ;;  %v4481_v39 = vld [vmem:[#allocation18 + $0x84] ss:$8 sps:$4 sm:$0xff]  }
 0x4fb   :  { %3151 = vmatpush1.bf16.msra.mxu0 %v4443_v61  ;;  %v2157_v14 = vadd.f32 %v2156_v9, %v5142_v41  ;;  %v2303_v16 = vpack.c.bf16 %v2287_v8, %v2283_v7  ;;  %v2259_v46 = vmul.f32 0.1, %v2155_v5  ;;  %v2290_v27 = vmax.f32 %v2153_v11, %v2258_v20  ;;  %v2217_v57 = vpop.f32.mrf.mxu1 }
 0x4fc   :  { %3152 = vmatprep.subr.bf16.mxu0 %v4448_v59  ;;  %v2158_v15 = vpop.f32.mrf.mxu0  ;;  %v1758_v61 = vsub.s32 2, %v5029_v47  ;;  %v4475_v59 = vld [vmem:[#allocation18 + $0xa4] ss:$8 sps:$4 sm:$0xff]   ;;  %v2212_v7 = vadd.f32 %v2211_v44, %v5162_v0  ;;  %v2208_v9 = vadd.f32 %v2207_v30, %v5162_v0  ;;  %v4521_v30 = vld [vmem:[#allocation16 + $0xa0] ss:$8 sps:$4 sm:$0xff]  }
 0x4fd   :  { %v2159_v17 = vadd.f32 %v2158_v15, %v5138_v37  ;;  %v2262_v1 = vmul.f32 0.1, %v2157_v14  ;;  %2562 = vmatprep.mubr.bf16.mxu0 %v2303_v16  ;;  %v2291_v41 = vmax.f32 %v2155_v5, %v2259_v46  ;;  %v4452_v37 = vld [vmem:[#allocation18 + $0x10] ss:$8 sps:$4 sm:$0xff]   ;;  %v2219_v62 = vpop.f32.mrf.mxu1 }
 0x4fe   :  { %2563 = vmatmul.mubr.bf16.gmra.mxu0 %v2302_v3  ;;  %v5176_v4 = vrot.slane %v5134_v36, %v1758_v61  ;;  %v2249_v11 = vmul.f32 0.1, %v2212_v7 }
 0x4ff   :  { %3153 = vmatpush1.bf16.msra.mxu0 %v4446_v10  ;;  %v2263_v21 = vmul.f32 0.1, %v2159_v17  ;;  %v2294_v25 = vmax.f32 %v2157_v14, %v2262_v1  ;;  %v2221_v40 = vpop.f32.mrf.mxu1  ;;  %v4476_v10 = vld [vmem:[#allocation18 + $0x90] ss:$8 sps:$4 sm:$0xff]   ;;  %v2245_v14 = vmul.f32 0.1, %v2208_v9 }
 0x500   :  { %3154 = vmatprep.subr.bf16.mxu0 %v4451_v12  ;;  %v2200_v5 = vadd.f32 %v5155_v34, %v5176_v4  ;;  %v2196_v47 = vadd.f32 %v5149_v13, %v5176_v4  ;;  %v4479_v34 = vld [vmem:[#allocation18 + $0x80] ss:$8 sps:$4 sm:$0xff]   ;;  %v2210_v16 = vadd.f32 %v2209_v38, %v5176_v4  ;;  %v2281_v46 = vmax.f32 %v2212_v7, %v2249_v11 }
 0x501   :  { %v2295_v26 = vmax.f32 %v2159_v17, %v2263_v21  ;;  %v2304_v31 = vpack.c.bf16 %v2294_v25, %v2290_v27  ;;  %v2225_v8 = vpop.f32.mrf.mxu1  ;;  %v2222_v13 = vadd.f32 %v2221_v40, %v5162_v0  ;;  %v2206_v3 = vadd.f32 %v5170_v23, %v5176_v4  ;;  %v4532_v40 = vld [vmem:[#allocation19 + $0x74] ss:$8 sps:$4 sm:$0xff]  }
 0x502   :  { %v2240_v36 = vmul.f32 0.1, %v2200_v5  ;;  %v2236_v12 = vmul.f32 0.1, %v2196_v47  ;;  %v2277_v1 = vmax.f32 %v2208_v9, %v2245_v14  ;;  %v2248_v21 = vmul.f32 0.1, %v2210_v16 }
 0x503   :  { %3155 = vmatpush1.bf16.msra.mxu0 %v4449_v19  ;;  %v2305_v28 = vpack.c.bf16 %v2295_v26, %v2291_v41  ;;  %v2227_v48 = vpop.f32.mrf.mxu1  ;;  %v2218_v19 = vadd.f32 %v2217_v57, %v5162_v0  ;;  %v2244_v41 = vmul.f32 0.1, %v2206_v3  ;;  %v2216_v55 = vadd.f32 %v5172_v51, %v5176_v4  ;;  %v4529_v57 = vld [vmem:[#allocation16 + $0x84] ss:$8 sps:$4 sm:$0xff]  }
 0x504   :  { %3156 = vmatprep.subr.bf16.mxu0 %v4454_v22  ;;  %v2272_v15 = vmax.f32 %v2200_v5, %v2240_v36  ;;  %v2268_v17 = vmax.f32 %v2196_v47, %v2236_v12  ;;  %v2257_v22 = vmul.f32 0.1, %v2222_v13  ;;  %v2935_v24 = vpack.c.bf16 %v2281_v46, %v2277_v1 }
 0x505   :  { %2572 = vmatprep.mubr.bf16.mxu0 %v2305_v28  ;;  %v2229_v18 = vpop.f32.mrf.mxu1  ;;  %v2253_v26 = vmul.f32 0.1, %v2218_v19  ;;  %v2280_v53 = vmax.f32 %v2210_v16, %v2248_v21  ;;  %v4523_v28 = vld [vmem:[#allocation16 + $0xa4] ss:$8 sps:$4 sm:$0xff]   ;;  %v2252_v44 = vmul.f32 0.1, %v2216_v55 }
 0x506   :  { %2573 = vmatmul.mubr.bf16.gmra.mxu0 %v2304_v31  ;;  %v2932_v20 = vpack.c.bf16 %v2272_v15, %v2268_v17  ;;  %v2289_v27 = vmax.f32 %v2222_v13, %v2257_v22  ;;  %2853 = vmatprep.subr.bf16.mxu1 %v4523_v28  ;;  %v2230_v51 = vadd.f32 %v2229_v18, %v5176_v4  ;;  %v4530_v22 = vld [vmem:[#allocation19 + $0x70] ss:$8 sps:$4 sm:$0xff]  }
 0x507   :  { %3157 = vmatpush1.bf16.msra.mxu0 %v4452_v37  ;;  %3176 = vmatprep.mubr.bf16.mxu0 %v2933_v32  ;;  %v2231_v25 = vpop.f32.mrf.mxu1  ;;  %v2220_v37 = vadd.f32 %v2219_v62, %v5176_v4  ;;  %v2285_v31 = vmax.f32 %v2218_v19, %v2253_v26  ;;  %v2228_v32 = vadd.f32 %v2227_v48, %v5162_v0  ;;  %v4535_v26 = vld [vmem:[#allocation19 + $0x64] ss:$8 sps:$4 sm:$0xff]  }
 0x508   :  { %3158 = vmatprep.subr.bf16.mxu0 %v4457_v29  ;;  %v2232_v23 = vadd.f32 %v2231_v25, %v5162_v0  ;;  %v2276_v29 = vmax.f32 %v2206_v3, %v2244_v41  ;;  %2854 = vmatpush2.bf16.msra.mxu1 %v4521_v30  ;;  %v2284_v0 = vmax.f32 %v2216_v55, %v2252_v44  ;;  %v2264_v62 = vmul.f32 0.1, %v2230_v51  ;;  %v4536_v44 = vld [vmem:[#allocation19 + $0x50] ss:$8 sps:$4 sm:$0xff]  }
 0x50a   :  { %v2265_v38 = vmul.f32 0.1, %v2232_v23  ;;  %v2296_v5 = vmax.f32 %v2230_v51, %v2264_v62  ;;  %v4541_v51 = vld [vmem:[#allocation19 + $0x44] ss:$8 sps:$4 sm:$0xff]  }
 0x50b   :  { %3159 = vmatpush1.bf16.msra.mxu0 %v4455_v33  ;;  %v2256_v33 = vmul.f32 0.1, %v2220_v37 }
 0x50c   :  { %3160 = vmatprep.subr.bf16.mxu0 %v4460_v35  ;;  %v2934_v35 = vpack.c.bf16 %v2280_v53, %v2276_v29  ;;  %v4533_v29 = vld [vmem:[#allocation19 + $0x60] ss:$8 sps:$4 sm:$0xff]  }
 0x50f   :  { %3161 = vmatpush2.bf16.msra.mxu0 %v4458_v42  ;;  %v2937_v42 = vpack.c.bf16 %v2289_v27, %v2285_v31  ;;  %v4538_v31 = vld [vmem:[#allocation19 + $0x54] ss:$8 sps:$4 sm:$0xff]  }
 0x510   :  { %3162 = vmatprep.subr.bf16.mxu0 %v4463_v43  ;;  %v4526_v43 = vld [vmem:[#allocation16 + $0x94] ss:$8 sps:$4 sm:$0xff]  }
 0x511   :  { %2855 = vmatprep.subr.bf16.mxu1 %v4526_v43 }
 0x513   :  { %3163 = vmatpush2.bf16.msra.mxu0 %v4461_v45  ;;  %v4524_v45 = vld [vmem:[#allocation16 + $0x90] ss:$8 sps:$4 sm:$0xff]  }
 0x514   :  { %3164 = vmatprep.subr.bf16.mxu0 %v4466_v50  ;;  %v2261_v50 = vmul.f32 0.1, %v2228_v32  ;;  %2856 = vmatpush2.bf16.msra.mxu1 %v4524_v45 }
 0x515   :  { %2857 = vmatprep.subr.bf16.mxu1 %v4529_v57 }
 0x516   :  { %v2293_v61 = vmax.f32 %v2228_v32, %v2261_v50 }
 0x517   :  { %3165 = vmatpush2.bf16.msra.mxu0 %v4464_v54  ;;  %v2288_v54 = vmax.f32 %v2220_v37, %v2256_v33 }
 0x518   :  { %3166 = vmatprep.subr.bf16.mxu0 %v4469_v56  ;;  %v2297_v56 = vmax.f32 %v2232_v23, %v2265_v38 }
 0x51b   :  { %3167 = vmatpush2.bf16.msra.mxu0 %v4467_v58  ;;  %v2226_v58 = vadd.f32 %v2225_v8, %v5176_v4  ;;  %v2338_v4 = vld [vmem:[%s5401_s12] sm:$0x3] }
 0x51c   :  { %3168 = vmatprep.subr.bf16.mxu0 %v4472_v60  ;;  %v4527_v60 = vld [vmem:[#allocation16 + $0x80] ss:$8 sps:$4 sm:$0xff]   ;;  %v5200_v47 = vrot.slane %v2338_v4, %v5035_v52  ;;  %v5203_v8 = vrot.slane %v2338_v4, %v5032_v49 }
 0x51d   :  { %2858 = vmatpush2.bf16.msra.mxu1 %v4527_v60 }
 0x51e   :  { %3461 = vmatprep.subr.bf16.mxu1 %v4532_v40 }
 0x51f   :  { %3169 = vmatpush2.bf16.msra.mxu0 %v4470_v63  ;;  %v2936_v63 = vpack.c.bf16 %v2288_v54, %v2284_v0 }
 0x520   :  { %3170 = vmatprep.subr.bf16.mxu0 %v4475_v59  ;;  %v2939_v59 = vpack.c.bf16 %v2297_v56, %v2293_v61 }
 0x523   :  { %3171 = vmatpush2.bf16.msra.mxu0 %v4473_v2  ;;  %v2260_v2 = vmul.f32 0.1, %v2226_v58 }
 0x524   :  { %3172 = vmatprep.subr.bf16.mxu0 %v4478_v6 }
 0x525   :  { %v2292_v6 = vmax.f32 %v2226_v58, %v2260_v2  ;;  %v4544_v2 = vld [vmem:[#allocation19 + $0x34] ss:$8 sps:$4 sm:$0xff]  }
 0x527   :  { %3173 = vmatpush2.bf16.msra.mxu0 %v4476_v10  ;;  %v2938_v7 = vpack.c.bf16 %v2296_v5, %v2292_v6 }
 0x528   :  { %3174 = vmatprep.subr.bf16.mxu0 %v4481_v39 }
 0x52b   :  { %3175 = vmatpush2.bf16.msra.mxu0 %v4479_v34 }
 0x52e   :  { %3177 = vmatmul.mubr.bf16.vlgmr.msra.gmra.mxu0 %v2932_v20 }
 0x52f   :  { %3186 = vmatprep.mubr.bf16.mxu0 %v2935_v24 }
 0x536   :  { %3187 = vmatmul.mubr.bf16.gmra.mxu0 %v2934_v35 }
 0x537   :  { %3196 = vmatprep.mubr.bf16.mxu0 %v2937_v42 }
 0x53e   :  { %3197 = vmatmul.mubr.bf16.gmra.mxu0 %v2936_v63  ;;  %v4539_v63 = vld [vmem:[#allocation19 + $0x40] ss:$8 sps:$4 sm:$0xff]  }
 0x53f   :  { %3206 = vmatprep.mubr.bf16.mxu0 %v2939_v59 }
 0x546   :  { %3207 = vmatmul.mubr.bf16.gmra.mxu0 %v2938_v7 }
 0x5ae   :  { %v2544_v9 = vpop.f32.mrf.mxu0 }
 0x5af   :  { %v2545_v39 = vadd.f32 %v2544_v9, %v5203_v8 }
 0x5b0   :  { %v2546_v10 = vpop.f32.mrf.mxu0 }
 0x5b1   :  { %v2547_v36 = vadd.f32 %v2546_v10, %v5200_v47  ;;  %v2583_v16 = vmul.f32 0.1, %v2545_v39 }
 0x5b2   :  { %v2548_v11 = vpop.f32.mrf.mxu0 }
 0x5b3   :  { %v2549_v12 = vadd.f32 %v2548_v11, %v5203_v8  ;;  %v2584_v14 = vmul.f32 0.1, %v2547_v36  ;;  %v2599_v1 = vmax.f32 %v2545_v39, %v2583_v16 }
 0x5b4   :  { %v2550_v48 = vpop.f32.mrf.mxu0 }
 0x5b5   :  { %v2585_v34 = vmul.f32 0.1, %v2549_v12  ;;  %v2551_v15 = vadd.f32 %v2550_v48, %v5200_v47  ;;  %v2600_v3 = vmax.f32 %v2547_v36, %v2584_v14  ;;  %v4542_v36 = vld [vmem:[#allocation19 + $0x30] ss:$8 sps:$4 sm:$0xff]   ;;  %v4547_v48 = vld [vmem:[#allocation19 + $0x24] ss:$8 sps:$4 sm:$0xff]  }
 0x5b6   :  { %v2554_v17 = vpop.f32.mrf.mxu0 }
 0x5b7   :  { %v2586_v46 = vmul.f32 0.1, %v2551_v15  ;;  %v2601_v13 = vmax.f32 %v2549_v12, %v2585_v34  ;;  %v2555_v41 = vadd.f32 %v2554_v17, %v5203_v8 }
 0x5b8   :  { %v2556_v19 = vpop.f32.mrf.mxu0 }
 0x5b9   :  { %v2602_v18 = vmax.f32 %v2551_v15, %v2586_v46  ;;  %v2557_v20 = vadd.f32 %v2556_v19, %v5200_v47  ;;  %v2615_v24 = vpack.c.bf16 %v2601_v13, %v2599_v1  ;;  %v2587_v55 = vmul.f32 0.1, %v2555_v41  ;;  %v4550_v1 = vld [vmem:[#allocation19 + $0x14] ss:$8 sps:$4 sm:$0xff]  }
 0x5ba   :  { %v2558_v25 = vpop.f32.mrf.mxu0 }
 0x5bb   :  { %v2616_v21 = vpack.c.bf16 %v2602_v18, %v2600_v3  ;;  %v2559_v53 = vadd.f32 %v2558_v25, %v5203_v8  ;;  %v2588_v27 = vmul.f32 0.1, %v2557_v20  ;;  %v2603_v45 = vmax.f32 %v2555_v41, %v2587_v55  ;;  %v4545_v3 = vld [vmem:[#allocation19 + $0x20] ss:$8 sps:$4 sm:$0xff]   ;;  %v4553_v41 = vld [vmem:[#allocation19 + $0x4] ss:$8 sps:$4 sm:$0xff]  }
 0x5bc   :  { %v2560_v37 = vpop.f32.mrf.mxu0  ;;  %v4565_v55 = vld [vmem:[#allocation19 + $0xc4] ss:$8 sps:$4 sm:$0xff]  }
 0x5bd   :  { %2859 = vmatprep.mubr.bf16.mxu1 %v2616_v21  ;;  %v2589_v23 = vmul.f32 0.1, %v2559_v53  ;;  %v2561_v28 = vadd.f32 %v2560_v37, %v5200_v47  ;;  %v2604_v38 = vmax.f32 %v2557_v20, %v2588_v27  ;;  %v4554_v37 = vld [vmem:[#allocation19 + $0xf0] ss:$8 sps:$4 sm:$0xff]   ;;  %v4559_v27 = vld [vmem:[#allocation19 + $0xe4] ss:$8 sps:$4 sm:$0xff]  }
 0x5be   :  { %2860 = vmatmul.mubr.bf16.vlgmr.msra.gmra.mxu1 %v2615_v24  ;;  %v2564_v30 = vpop.f32.mrf.mxu0 }
 0x5bf   :  { %3462 = vmatpush1.bf16.msra.mxu1 %v4530_v22  ;;  %v2590_v32 = vmul.f32 0.1, %v2561_v28  ;;  %v2605_v33 = vmax.f32 %v2559_v53, %v2589_v23  ;;  %v2565_v50 = vadd.f32 %v2564_v30, %v5203_v8  ;;  %v4556_v53 = vld [vmem:[#allocation19 + $0xf4] ss:$8 sps:$4 sm:$0xff]   ;;  %v4557_v23 = vld [vmem:[#allocation19 + $0xe0] ss:$8 sps:$4 sm:$0xff]  }
 0x5c0   :  { %3463 = vmatprep.subr.bf16.mxu1 %v4535_v26  ;;  %v2566_v35 = vpop.f32.mrf.mxu0  ;;  %v4563_v30 = vld [vmem:[#allocation19 + $0xc0] ss:$8 sps:$4 sm:$0xff]  }
 0x5c1   :  { %v2606_v42 = vmax.f32 %v2561_v28, %v2590_v32  ;;  %v2567_v43 = vadd.f32 %v2566_v35, %v5200_v47  ;;  %v2617_v58 = vpack.c.bf16 %v2605_v33, %v2603_v45  ;;  %v2591_v59 = vmul.f32 0.1, %v2565_v50  ;;  %v4562_v28 = vld [vmem:[#allocation19 + $0xd4] ss:$8 sps:$4 sm:$0xff]   ;;  %v4566_v33 = vld [vmem:[#allocation19 + $0xb0] ss:$8 sps:$4 sm:$0xff]  }
 0x5c2   :  { %v2568_v54 = vpop.f32.mrf.mxu0  ;;  %v2972_v32 = vld [vmem:[%s5405_s16] sm:$0x3]  ;;  %v4571_v35 = vld [vmem:[#allocation19 + $0xa4] ss:$8 sps:$4 sm:$0xff]  }
 0x5c3   :  { %3464 = vmatpush1.bf16.msra.mxu1 %v4533_v29  ;;  %v2569_v56 = vadd.f32 %v2568_v54, %v5203_v8  ;;  %v2618_v57 = vpack.c.bf16 %v2606_v42, %v2604_v38  ;;  %v2592_v60 = vmul.f32 0.1, %v2567_v43  ;;  %v2607_v39 = vmax.f32 %v2565_v50, %v2591_v59  ;;  %v4560_v29 = vld [vmem:[#allocation19 + $0xd0] ss:$8 sps:$4 sm:$0xff]   ;;  %v4574_v50 = vld [vmem:[#allocation19 + $0x94] ss:$8 sps:$4 sm:$0xff]  }
 0x5c4   :  { %3465 = vmatprep.subr.bf16.mxu1 %v4538_v31  ;;  %v2570_v0 = vpop.f32.mrf.mxu0  ;;  %v4568_v31 = vld [vmem:[#allocation19 + $0xb4] ss:$8 sps:$4 sm:$0xff]   ;;  %v5225_v38 = vrot.slane %v2972_v32, %v5035_v52  ;;  %v5228_v42 = vrot.slane %v2972_v32, %v5032_v49 }
 0x5c5   :  { %v2593_v61 = vmul.f32 0.1, %v2569_v56  ;;  %v2571_v62 = vadd.f32 %v2570_v0, %v5200_v47  ;;  %2869 = vmatprep.mubr.bf16.mxu1 %v2618_v57  ;;  %v2608_v4 = vmax.f32 %v2567_v43, %v2592_v60  ;;  %v4572_v0 = vld [vmem:[#allocation19 + $0x90] ss:$8 sps:$4 sm:$0xff]   ;;  %v4577_v60 = vld [vmem:[#allocation19 + $0x84] ss:$8 sps:$4 sm:$0xff]  }
 0x5c6   :  { %v2574_v40 = vpop.f32.mrf.mxu0  ;;  %2870 = vmatmul.mubr.bf16.gmra.mxu1 %v2617_v58 }
 0x5c7   :  { %3466 = vmatpush1.bf16.msra.mxu1 %v4536_v44  ;;  %v2594_v5 = vmul.f32 0.1, %v2571_v62  ;;  %v2609_v6 = vmax.f32 %v2569_v56, %v2593_v61  ;;  %v2575_v11 = vadd.f32 %v2574_v40, %v5203_v8  ;;  %v4569_v44 = vld [vmem:[#allocation19 + $0xa0] ss:$8 sps:$4 sm:$0xff]  }
 0x5c8   :  { %3467 = vmatprep.subr.bf16.mxu1 %v4541_v51  ;;  %v2576_v7 = vpop.f32.mrf.mxu0 }
 0x5c9   :  { %v2610_v9 = vmax.f32 %v2571_v62, %v2594_v5  ;;  %v2577_v10 = vadd.f32 %v2576_v7, %v5200_v47  ;;  %v2619_v16 = vpack.c.bf16 %v2609_v6, %v2607_v39  ;;  %v2595_v18 = vmul.f32 0.1, %v2575_v11  ;;  %v4575_v5 = vld [vmem:[#allocation19 + $0x80] ss:$8 sps:$4 sm:$0xff]  }
 0x5ca   :  { %v2578_v12 = vpop.f32.mrf.mxu0 }
 0x5cb   :  { %3468 = vmatpush1.bf16.msra.mxu1 %v4539_v63  ;;  %v2579_v14 = vadd.f32 %v2578_v12, %v5203_v8  ;;  %v2620_v34 = vpack.c.bf16 %v2610_v9, %v2608_v4  ;;  %v2596_v46 = vmul.f32 0.1, %v2577_v10  ;;  %v4548_v8 = vld [vmem:[#allocation19 + $0x10] ss:$8 sps:$4 sm:$0xff]   ;;  %v2611_v24 = vmax.f32 %v2575_v11, %v2595_v18 }
 0x5cc   :  { %3469 = vmatprep.subr.bf16.mxu1 %v4544_v2  ;;  %v2580_v15 = vpop.f32.mrf.mxu0 }
 0x5cd   :  { %v2597_v13 = vmul.f32 0.1, %v2579_v14  ;;  %v2581_v17 = vadd.f32 %v2580_v15, %v5200_v47  ;;  %2879 = vmatprep.mubr.bf16.mxu1 %v2620_v34  ;;  %v2612_v21 = vmax.f32 %v2577_v10, %v2596_v46  ;;  %v4551_v47 = vld [vmem:[#allocation19] ss:$8 sps:$4 sm:$0xff]  }
 0x5ce   :  { %2880 = vmatmul.mubr.bf16.gmra.mxu1 %v2619_v16 }
 0x5cf   :  { %3470 = vmatpush1.bf16.msra.mxu1 %v4542_v36  ;;  %v2598_v19 = vmul.f32 0.1, %v2581_v17  ;;  %v2613_v20 = vmax.f32 %v2579_v14, %v2597_v13 }
 0x5d0   :  { %3471 = vmatprep.subr.bf16.mxu1 %v4547_v48 }
 0x5d1   :  { %v2614_v22 = vmax.f32 %v2581_v17, %v2598_v19  ;;  %v2621_v26 = vpack.c.bf16 %v2613_v20, %v2611_v24 }
 0x5d3   :  { %3472 = vmatpush1.bf16.msra.mxu1 %v4545_v3  ;;  %v2622_v25 = vpack.c.bf16 %v2614_v22, %v2612_v21 }
 0x5d4   :  { %3473 = vmatprep.subr.bf16.mxu1 %v4550_v1 }
 0x5d5   :  { %2889 = vmatprep.mubr.bf16.mxu1 %v2622_v25 }
 0x5d6   :  { %2890 = vmatmul.mubr.bf16.gmra.mxu1 %v2621_v26 }
 0x5d7   :  { %3474 = vmatpush1.bf16.msra.mxu1 %v4548_v8 }
 0x5d8   :  { %3475 = vmatprep.subr.bf16.mxu1 %v4553_v41 }
 0x5db   :  { %3476 = vmatpush1.bf16.msra.mxu1 %v4551_v47 }
 0x5dc   :  { %3477 = vmatprep.subr.bf16.mxu1 %v4556_v53 }
 0x5df   :  { %3478 = vmatpush2.bf16.msra.mxu1 %v4554_v37 }
 0x5e0   :  { %3479 = vmatprep.subr.bf16.mxu1 %v4559_v27 }
 0x5e3   :  { %3480 = vmatpush2.bf16.msra.mxu1 %v4557_v23 }
 0x5e4   :  { %3481 = vmatprep.subr.bf16.mxu1 %v4562_v28 }
 0x5e7   :  { %3482 = vmatpush2.bf16.msra.mxu1 %v4560_v29 }
 0x5e8   :  { %3483 = vmatprep.subr.bf16.mxu1 %v4565_v55 }
 0x5eb   :  { %3484 = vmatpush2.bf16.msra.mxu1 %v4563_v30 }
 0x5ec   :  { %3485 = vmatprep.subr.bf16.mxu1 %v4568_v31 }
 0x5ee   :  { %v3178_v43 = vpop.f32.mrf.mxu0 }
 0x5ef   :  { %3486 = vmatpush2.bf16.msra.mxu1 %v4566_v33  ;;  %v3179_v51 = vadd.f32 %v3178_v43, %v5228_v42 }
 0x5f0   :  { %v3180_v45 = vpop.f32.mrf.mxu0  ;;  %3487 = vmatprep.subr.bf16.mxu1 %v4571_v35 }
 0x5f1   :  { %v3181_v54 = vadd.f32 %v3180_v45, %v5225_v38  ;;  %v3217_v59 = vmul.f32 0.1, %v3179_v51 }
 0x5f2   :  { %v3182_v56 = vpop.f32.mrf.mxu0 }
 0x5f3   :  { %v3183_v57 = vadd.f32 %v3182_v56, %v5228_v42  ;;  %3488 = vmatpush2.bf16.msra.mxu1 %v4569_v44  ;;  %v3218_v61 = vmul.f32 0.1, %v3181_v54  ;;  %v3233_v36 = vmax.f32 %v3179_v51, %v3217_v59 }
 0x5f4   :  { %v3184_v58 = vpop.f32.mrf.mxu0  ;;  %3489 = vmatprep.subr.bf16.mxu1 %v4574_v50 }
 0x5f5   :  { %v3219_v62 = vmul.f32 0.1, %v3183_v57  ;;  %v3185_v63 = vadd.f32 %v3184_v58, %v5225_v38  ;;  %v3234_v4 = vmax.f32 %v3181_v54, %v3218_v61 }
 0x5f6   :  { %v3188_v40 = vpop.f32.mrf.mxu0 }
 0x5f7   :  { %v3220_v2 = vmul.f32 0.1, %v3185_v63  ;;  %3490 = vmatpush2.bf16.msra.mxu1 %v4572_v0  ;;  %v3235_v6 = vmax.f32 %v3183_v57, %v3219_v62  ;;  %v3189_v39 = vadd.f32 %v3188_v40, %v5228_v42 }
 0x5f8   :  { %v3190_v7 = vpop.f32.mrf.mxu0  ;;  %3491 = vmatprep.subr.bf16.mxu1 %v4577_v60 }
 0x5f9   :  { %v3236_v9 = vmax.f32 %v3185_v63, %v3220_v2  ;;  %v3191_v10 = vadd.f32 %v3190_v7, %v5225_v38  ;;  %v3249_v14 = vpack.c.bf16 %v3235_v6, %v3233_v36  ;;  %v3221_v13 = vmul.f32 0.1, %v3189_v39 }
 0x5fa   :  { %v3192_v11 = vpop.f32.mrf.mxu0 }
 0x5fb   :  { %v3193_v12 = vadd.f32 %v3192_v11, %v5228_v42  ;;  %3492 = vmatpush2.bf16.msra.mxu1 %v4575_v5  ;;  %v3250_v48 = vpack.c.bf16 %v3236_v9, %v3234_v4  ;;  %v3222_v15 = vmul.f32 0.1, %v3191_v10  ;;  %v3237_v22 = vmax.f32 %v3189_v39, %v3221_v13  ;;  %v3566_v4 = vld [vmem:[%s5408_s19] ss:$2 sm:$0x3] }
 0x5fc   :  { %v3194_v34 = vpop.f32.mrf.mxu0  ;;  %v5261_v11 = vrot.slane %v3566_v4, %v5032_v49 }
 0x5fd   :  { %v3223_v16 = vmul.f32 0.1, %v3193_v12  ;;  %v3195_v46 = vadd.f32 %v3194_v34, %v5225_v38  ;;  %3493 = vmatprep.mubr.bf16.mxu1 %v3250_v48  ;;  %v3238_v19 = vmax.f32 %v3191_v10, %v3222_v15  ;;  %v5265_v34 = vrot.slane %v3566_v4, %v5035_v52 }
 0x5fe   :  { %v3198_v17 = vpop.f32.mrf.mxu0  ;;  %3494 = vmatmul.mubr.bf16.vlgmr.msra.gmra.mxu1 %v3249_v14 }
 0x5ff   :  { %v3224_v3 = vmul.f32 0.1, %v3195_v46  ;;  %v3239_v18 = vmax.f32 %v3193_v12, %v3223_v16  ;;  %v3199_v8 = vadd.f32 %v3198_v17, %v5228_v42 }
 0x600   :  { %v3200_v1 = vpop.f32.mrf.mxu0 }
 0x601   :  { %v3240_v20 = vmax.f32 %v3195_v46, %v3224_v3  ;;  %v3201_v21 = vadd.f32 %v3200_v1, %v5225_v38  ;;  %v3251_v47 = vpack.c.bf16 %v3239_v18, %v3237_v22  ;;  %v3225_v23 = vmul.f32 0.1, %v3199_v8 }
 0x602   :  { %v3202_v24 = vpop.f32.mrf.mxu0 }
 0x603   :  { %v3203_v41 = vadd.f32 %v3202_v24, %v5228_v42  ;;  %v3252_v25 = vpack.c.bf16 %v3240_v20, %v3238_v19  ;;  %v3226_v53 = vmul.f32 0.1, %v3201_v21  ;;  %v3241_v35 = vmax.f32 %v3199_v8, %v3225_v23 }
 0x604   :  { %v3204_v26 = vpop.f32.mrf.mxu0 }
 0x605   :  { %v3227_v37 = vmul.f32 0.1, %v3203_v41  ;;  %v3205_v27 = vadd.f32 %v3204_v26, %v5225_v38  ;;  %3503 = vmatprep.mubr.bf16.mxu1 %v3252_v25  ;;  %v3242_v31 = vmax.f32 %v3201_v21, %v3226_v53 }
 0x606   :  { %v3208_v28 = vpop.f32.mrf.mxu0  ;;  %3504 = vmatmul.mubr.bf16.gmra.mxu1 %v3251_v47 }
 0x607   :  { %v3228_v29 = vmul.f32 0.1, %v3205_v27  ;;  %v3243_v55 = vmax.f32 %v3203_v41, %v3227_v37  ;;  %v3209_v43 = vadd.f32 %v3208_v28, %v5228_v42 }
 0x608   :  { %v3210_v30 = vpop.f32.mrf.mxu0 }
 0x609   :  { %v3244_v32 = vmax.f32 %v3205_v27, %v3228_v29  ;;  %v3211_v33 = vadd.f32 %v3210_v30, %v5225_v38  ;;  %v3253_v51 = vpack.c.bf16 %v3243_v55, %v3241_v35  ;;  %v3229_v58 = vmul.f32 0.1, %v3209_v43 }
 0x60a   :  { %v3212_v44 = vpop.f32.mrf.mxu0 }
 0x60b   :  { %v3213_v45 = vadd.f32 %v3212_v44, %v5228_v42  ;;  %v3254_v50 = vpack.c.bf16 %v3244_v32, %v3242_v31  ;;  %v3230_v56 = vmul.f32 0.1, %v3211_v33  ;;  %v3245_v59 = vmax.f32 %v3209_v43, %v3229_v58  ;;  %v2655_v42 = vld [vmem:[%s5403_s14] sm:$0x3] }
 0x60c   :  { %v3214_v54 = vpop.f32.mrf.mxu0  ;;  %v5250_v5 = vrot.slane %v2655_v42, %v5032_v49 }
 0x60d   :  { %v3231_v57 = vmul.f32 0.1, %v3213_v45  ;;  %v3215_v0 = vadd.f32 %v3214_v54, %v5225_v38  ;;  %3513 = vmatprep.mubr.bf16.mxu1 %v3254_v50  ;;  %v3246_v62 = vmax.f32 %v3211_v33, %v3230_v56  ;;  %v5253_v38 = vrot.slane %v2655_v42, %v5035_v52 }
 0x60e   :  { %3514 = vmatmul.mubr.bf16.gmra.mxu1 %v3253_v51 }
 0x60f   :  { %v3232_v60 = vmul.f32 0.1, %v3215_v0  ;;  %v3247_v61 = vmax.f32 %v3213_v45, %v3231_v57 }
 0x611   :  { %v3248_v63 = vmax.f32 %v3215_v0, %v3232_v60  ;;  %v3255_v2 = vpack.c.bf16 %v3247_v61, %v3245_v59 }
 0x613   :  { %v3256_v40 = vpack.c.bf16 %v3248_v63, %v3246_v62 }
 0x615   :  { %3523 = vmatprep.mubr.bf16.mxu1 %v3256_v40 }
 0x616   :  { %3524 = vmatmul.mubr.bf16.gmra.mxu1 %v3255_v2 }
 0x67e   :  { %v2861_v6 = vpop.f32.mrf.mxu1 }
 0x67f   :  { %v2862_v7 = vadd.f32 %v2861_v6, %v5250_v5 }
 0x680   :  { %v2863_v9 = vpop.f32.mrf.mxu1 }
 0x681   :  { %v2900_v10 = vmul.f32 0.1, %v2862_v7  ;;  %v2864_v36 = vadd.f32 %v2863_v9, %v5253_v38 }
 0x682   :  { %v2865_v39 = vpop.f32.mrf.mxu1 }
 0x683   :  { %v2916_v12 = vmax.f32 %v2862_v7, %v2900_v10  ;;  %v2901_v48 = vmul.f32 0.1, %v2864_v36  ;;  %v2866_v14 = vadd.f32 %v2865_v39, %v5250_v5 }
 0x684   :  { %v2867_v15 = vpop.f32.mrf.mxu1 }
 0x685   :  { %v2917_v16 = vmax.f32 %v2864_v36, %v2901_v48  ;;  %v2902_v46 = vmul.f32 0.1, %v2866_v14  ;;  %v2868_v13 = vadd.f32 %v2867_v15, %v5253_v38  ;;  %v3578_v18 = vmul.f32 %v5261_v11, %v2916_v12 }
 0x686   :  { %v2871_v19 = vpop.f32.mrf.mxu1 }
 0x687   :  { %v2918_v17 = vmax.f32 %v2866_v14, %v2902_v46  ;;  %v2903_v3 = vmul.f32 0.1, %v2868_v13  ;;  %v3579_v1 = vmul.f32 %v5265_v34, %v2917_v16  ;;  %v2872_v21 = vadd.f32 %v2871_v19, %v5250_v5 }
 0x688   :  { %v2873_v8 = vpop.f32.mrf.mxu1 }
 0x689   :  { %v2919_v20 = vmax.f32 %v2868_v13, %v2903_v3  ;;  %v3594_v22 = vadd.f32 %v3579_v1, %v3578_v18  ;;  %v2904_v24 = vmul.f32 0.1, %v2872_v21  ;;  %v2874_v41 = vadd.f32 %v2873_v8, %v5253_v38 }
 0x68a   :  { %v3580_v25 = vmul.f32 %v5261_v11, %v2918_v17  ;;  %v2875_v47 = vpop.f32.mrf.mxu1 }
 0x68b   :  { %3595 = vadd.xlane.f32.xlu0 %v3594_v22  ;;  %v3581_v26 = vmul.f32 %v5265_v34, %v2919_v20  ;;  %v2920_v53 = vmax.f32 %v2872_v21, %v2904_v24  ;;  %v2905_v37 = vmul.f32 0.1, %v2874_v41  ;;  %v2876_v27 = vadd.f32 %v2875_v47, %v5250_v5 }
 0x68c   :  { %v2877_v28 = vpop.f32.mrf.mxu1 }
 0x68d   :  { %v3597_v23 = vadd.f32 %v3581_v26, %v3580_v25  ;;  %v2921_v29 = vmax.f32 %v2874_v41, %v2905_v37  ;;  %v2906_v55 = vmul.f32 0.1, %v2876_v27  ;;  %v2878_v30 = vadd.f32 %v2877_v28, %v5253_v38 }
 0x68e   :  { %v2881_v31 = vpop.f32.mrf.mxu1  ;;  %v3582_v32 = vmul.f32 %v5261_v11, %v2920_v53 }
 0x68f   :  { %3598 = vadd.xlane.f32.xlu0 %v3597_v23  ;;  %v2922_v33 = vmax.f32 %v2876_v27, %v2906_v55  ;;  %v2907_v35 = vmul.f32 0.1, %v2878_v30  ;;  %v2882_v43 = vadd.f32 %v2881_v31, %v5250_v5  ;;  %v3583_v44 = vmul.f32 %v5265_v34, %v2921_v29 }
 0x690   :  { %v2883_v45 = vpop.f32.mrf.mxu1 }
 0x691   :  { %v2923_v50 = vmax.f32 %v2878_v30, %v2907_v35  ;;  %v2908_v54 = vmul.f32 0.1, %v2882_v43  ;;  %v2884_v51 = vadd.f32 %v2883_v45, %v5253_v38  ;;  %v3600_v56 = vadd.f32 %v3583_v44, %v3582_v32 }
 0x692   :  { %v2885_v57 = vpop.f32.mrf.mxu1  ;;  %v3584_v0 = vmul.f32 %v5261_v11, %v2922_v33 }
 0x693   :  { %v2924_v58 = vmax.f32 %v2882_v43, %v2908_v54  ;;  %v2909_v60 = vmul.f32 0.1, %v2884_v51  ;;  %v2886_v61 = vadd.f32 %v2885_v57, %v5250_v5  ;;  %3601 = vadd.xlane.f32.xlu1 %v3600_v56  ;;  %v3585_v62 = vmul.f32 %v5265_v34, %v2923_v50 }
 0x694   :  { %v2887_v63 = vpop.f32.mrf.mxu1 }
 0x695   :  { %v2925_v59 = vmax.f32 %v2884_v51, %v2909_v60  ;;  %v2910_v40 = vmul.f32 0.1, %v2886_v61  ;;  %v2888_v2 = vadd.f32 %v2887_v63, %v5253_v38  ;;  %v3603_v42 = vadd.f32 %v3585_v62, %v3584_v0 }
 0x696   :  { %v2891_v6 = vpop.f32.mrf.mxu1  ;;  %v3586_v7 = vmul.f32 %v5261_v11, %v2924_v58 }
 0x697   :  { %v2926_v4 = vmax.f32 %v2886_v61, %v2910_v40  ;;  %v2911_v9 = vmul.f32 0.1, %v2888_v2  ;;  %v2892_v10 = vadd.f32 %v2891_v6, %v5250_v5  ;;  %3604 = vadd.xlane.f32.xlu1 %v3603_v42  ;;  %v3587_v36 = vmul.f32 %v5265_v34, %v2925_v59 }
 0x698   :  { %v2893_v39 = vpop.f32.mrf.mxu1 }
 0x699   :  { %v2927_v12 = vmax.f32 %v2888_v2, %v2911_v9  ;;  %v2912_v48 = vmul.f32 0.1, %v2892_v10  ;;  %v2894_v14 = vadd.f32 %v2893_v39, %v5253_v38  ;;  %v3606_v15 = vadd.f32 %v3587_v36, %v3586_v7 }
 0x69a   :  { %v2895_v16 = vpop.f32.mrf.mxu1  ;;  %v3588_v46 = vmul.f32 %v5261_v11, %v2926_v4 }
 0x69b   :  { %v2928_v13 = vmax.f32 %v2892_v10, %v2912_v48  ;;  %v2913_v17 = vmul.f32 0.1, %v2894_v14  ;;  %v2896_v3 = vadd.f32 %v2895_v16, %v5250_v5  ;;  %3607 = vadd.xlane.f32.xlu0 %v3606_v15  ;;  %v3589_v18 = vmul.f32 %v5265_v34, %v2927_v12 }
 0x69c   :  { %v2897_v1 = vpop.f32.mrf.mxu1 }
 0x69d   :  { %v2929_v19 = vmax.f32 %v2894_v14, %v2913_v17  ;;  %v2914_v20 = vmul.f32 0.1, %v2896_v3  ;;  %v2898_v21 = vadd.f32 %v2897_v1, %v5253_v38  ;;  %v3609_v22 = vadd.f32 %v3589_v18, %v3588_v46  ;;  %v3289_v38 = vld [vmem:[%s5407_s18] sm:$0x3] }
 0x69e   :  { %v3590_v41 = vmul.f32 %v5261_v11, %v2928_v13  ;;  %v5300_v27 = vrot.slane %v3289_v38, %v5032_v49  ;;  %v5303_v23 = vrot.slane %v3289_v38, %v5035_v52 }
 0x69f   :  { %v2930_v8 = vmax.f32 %v2896_v3, %v2914_v20  ;;  %v2915_v24 = vmul.f32 0.1, %v2898_v21  ;;  %3610 = vadd.xlane.f32.xlu1 %v3609_v22  ;;  %v3591_v25 = vmul.f32 %v5265_v34, %v2929_v19 }
 0x6a1   :  { %v2931_v26 = vmax.f32 %v2898_v21, %v2915_v24  ;;  %v3612_v47 = vadd.f32 %v3591_v25, %v3590_v41  ;;  %v3592_v5 = vmul.f32 %v5261_v11, %v2930_v8  ;;  %v4055_v11 = vld [vmem:[%s5408_s19 + $0x1] ss:$2 sm:$0x3] }
 0x6a2   :  { %v5311_v32 = vrot.slane %v4055_v11, %v5032_v49  ;;  %v5315_v44 = vrot.slane %v4055_v11, %v5035_v52 }
 0x6a3   :  { %3613 = vadd.xlane.f32.xlu0 %v3612_v47  ;;  %v3593_v53 = vmul.f32 %v5265_v34, %v2931_v26 }
 0x6a5   :  { %v3615_v37 = vadd.f32 %v3593_v53, %v3592_v5 }
 0x6a7   :  { %3616 = vadd.xlane.f32.xlu1 %v3615_v37 }
 0x6be   :  { %v3495_v28 = vpop.f32.mrf.mxu1 }
 0x6bf   :  { %v3496_v29 = vadd.f32 %v3495_v28, %v5300_v27 }
 0x6c0   :  { %v3497_v34 = vpop.f32.mrf.mxu1 }
 0x6c1   :  { %v3534_v55 = vmul.f32 0.1, %v3496_v29  ;;  %v3498_v30 = vadd.f32 %v3497_v34, %v5303_v23 }
 0x6c2   :  { %v3499_v31 = vpop.f32.mrf.mxu1 }
 0x6c3   :  { %v3550_v33 = vmax.f32 %v3496_v29, %v3534_v55  ;;  %v3535_v35 = vmul.f32 0.1, %v3498_v30  ;;  %v3500_v43 = vadd.f32 %v3499_v31, %v5300_v27 }
 0x6c4   :  { %v3501_v45 = vpop.f32.mrf.mxu1 }
 0x6c5   :  { %v3551_v50 = vmax.f32 %v3498_v30, %v3535_v35  ;;  %v3536_v54 = vmul.f32 0.1, %v3500_v43  ;;  %v3502_v51 = vadd.f32 %v3501_v45, %v5303_v23  ;;  %v3631_v57 = vmul.f32 %v5311_v32, %v3550_v33 }
 0x6c6   :  { %v3505_v56 = vpop.f32.mrf.mxu1 }
 0x6c7   :  { %v3552_v0 = vmax.f32 %v3500_v43, %v3536_v54  ;;  %v3537_v58 = vmul.f32 0.1, %v3502_v51  ;;  %v3506_v49 = vadd.f32 %v3505_v56, %v5300_v27  ;;  %v3632_v60 = vmul.f32 %v5315_v44, %v3551_v50 }
 0x6c8   :  { %v3507_v61 = vpop.f32.mrf.mxu1 }
 0x6c9   :  { %v3553_v62 = vmax.f32 %v3502_v51, %v3537_v58  ;;  %v3538_v63 = vmul.f32 0.1, %v3506_v49  ;;  %v3508_v52 = vadd.f32 %v3507_v61, %v5303_v23  ;;  %v3647_v59 = vadd.f32 %v3632_v60, %v3631_v57 }
 0x6ca   :  { %v3509_v40 = vpop.f32.mrf.mxu1  ;;  %v3633_v2 = vmul.f32 %v5311_v32, %v3552_v0 }
 0x6cb   :  { %v3554_v42 = vmax.f32 %v3506_v49, %v3538_v63  ;;  %v3539_v6 = vmul.f32 0.1, %v3508_v52  ;;  %v3510_v7 = vadd.f32 %v3509_v40, %v5300_v27  ;;  %3648 = vadd.xlane.f32.xlu0 %v3647_v59  ;;  %v3634_v4 = vmul.f32 %v5315_v44, %v3553_v62 }
 0x6cc   :  { %v3511_v9 = vpop.f32.mrf.mxu1 }
 0x6cd   :  { %v3555_v10 = vmax.f32 %v3508_v52, %v3539_v6  ;;  %v3540_v36 = vmul.f32 0.1, %v3510_v7  ;;  %v3512_v39 = vadd.f32 %v3511_v9, %v5303_v23  ;;  %v3650_v12 = vadd.f32 %v3634_v4, %v3633_v2 }
 0x6ce   :  { %v3515_v48 = vpop.f32.mrf.mxu1  ;;  %v3635_v14 = vmul.f32 %v5311_v32, %v3554_v42 }
 0x6cf   :  { %v3556_v15 = vmax.f32 %v3510_v7, %v3540_v36  ;;  %v3541_v16 = vmul.f32 0.1, %v3512_v39  ;;  %v3516_v46 = vadd.f32 %v3515_v48, %v5300_v27  ;;  %3651 = vadd.xlane.f32.xlu1 %v3650_v12  ;;  %v3636_v13 = vmul.f32 %v5315_v44, %v3555_v10 }
 0x6d0   :  { %v3517_v17 = vpop.f32.mrf.mxu1 }
 0x6d1   :  { %v3557_v3 = vmax.f32 %v3512_v39, %v3541_v16  ;;  %v3542_v18 = vmul.f32 0.1, %v3516_v46  ;;  %v3518_v1 = vadd.f32 %v3517_v17, %v5303_v23  ;;  %v3653_v19 = vadd.f32 %v3636_v13, %v3635_v14  ;;  %v4056_v39 = vld [vmem:[%s5409_s20] ss:$0 sm:$0xff] }
 0x6d2   :  { %v3519_v20 = vpop.f32.mrf.mxu1  ;;  %v3637_v21 = vmul.f32 %v5311_v32, %v3556_v15 }
 0x6d3   :  { %v3558_v22 = vmax.f32 %v3516_v46, %v3542_v18  ;;  %v3543_v8 = vmul.f32 0.1, %v3518_v1  ;;  %v3520_v24 = vadd.f32 %v3519_v20, %v5300_v27  ;;  %3654 = vadd.xlane.f32.xlu0 %v3653_v19  ;;  %v3638_v41 = vmul.f32 %v5315_v44, %v3557_v3 }
 0x6d4   :  { %v3521_v25 = vpop.f32.mrf.mxu1 }
 0x6d5   :  { %v3559_v26 = vmax.f32 %v3518_v1, %v3543_v8  ;;  %v3544_v47 = vmul.f32 0.1, %v3520_v24  ;;  %v3522_v5 = vadd.f32 %v3521_v25, %v5303_v23  ;;  %v3656_v53 = vadd.f32 %v3638_v41, %v3637_v21 }
 0x6d6   :  { %v3525_v37 = vpop.f32.mrf.mxu1  ;;  %v3639_v38 = vmul.f32 %v5311_v32, %v3558_v22 }
 0x6d7   :  { %v3560_v28 = vmax.f32 %v3520_v24, %v3544_v47  ;;  %v3545_v29 = vmul.f32 0.1, %v3522_v5  ;;  %v3526_v11 = vadd.f32 %v3525_v37, %v5300_v27  ;;  %3657 = vadd.xlane.f32.xlu1 %v3656_v53  ;;  %v3640_v34 = vmul.f32 %v5315_v44, %v3559_v26 }
 0x6d8   :  { %v3527_v55 = vpop.f32.mrf.mxu1 }
 0x6d9   :  { %v3561_v30 = vmax.f32 %v3522_v5, %v3545_v29  ;;  %v3546_v31 = vmul.f32 0.1, %v3526_v11  ;;  %v3528_v33 = vadd.f32 %v3527_v55, %v5303_v23  ;;  %v3659_v35 = vadd.f32 %v3640_v34, %v3639_v38 }
 0x6da   :  { %v3529_v43 = vpop.f32.mrf.mxu1  ;;  %v3641_v45 = vmul.f32 %v5311_v32, %v3560_v28 }
 0x6db   :  { %v3562_v50 = vmax.f32 %v3526_v11, %v3546_v31  ;;  %v3547_v54 = vmul.f32 0.1, %v3528_v33  ;;  %v3530_v51 = vadd.f32 %v3529_v43, %v5300_v27  ;;  %3660 = vadd.xlane.f32.xlu0 %v3659_v35  ;;  %v3642_v56 = vmul.f32 %v5315_v44, %v3561_v30 }
 0x6dc   :  { %v3531_v57 = vpop.f32.mrf.mxu1 }
 0x6dd   :  { %v3563_v0 = vmax.f32 %v3528_v33, %v3547_v54  ;;  %v3548_v58 = vmul.f32 0.1, %v3530_v51  ;;  %v3532_v49 = vadd.f32 %v3531_v57, %v5303_v23  ;;  %v3662_v60 = vadd.f32 %v3642_v56, %v3641_v45 }
 0x6de   :  { %v3643_v63 = vmul.f32 %v5311_v32, %v3562_v50 }
 0x6df   :  { %v3564_v61 = vmax.f32 %v3530_v51, %v3548_v58  ;;  %v3549_v62 = vmul.f32 0.1, %v3532_v49  ;;  %3663 = vadd.xlane.f32.xlu1 %v3662_v60  ;;  %v3644_v52 = vmul.f32 %v5315_v44, %v3563_v0 }
 0x6e1   :  { %v3565_v59 = vmax.f32 %v3532_v49, %v3549_v62  ;;  %v3665_v40 = vadd.f32 %v3644_v52, %v3643_v63  ;;  %v3645_v27 = vmul.f32 %v5311_v32, %v3564_v61 }
 0x6e3   :  { %3666 = vadd.xlane.f32.xlu0 %v3665_v40  ;;  %v3646_v2 = vmul.f32 %v5315_v44, %v3565_v59 }
 0x6e5   :  { %v3668_v42 = vadd.f32 %v3646_v2, %v3645_v27 }
 0x6e7   :  { %3669 = vadd.xlane.f32.xlu1 %v3668_v42 }
 0x714   :  { %v3596_v6 = vpop.xlane.xlu0 %3595 }
 0x718   :  { %v3599_v23 = vpop.xlane.xlu0 %3598 }
 0x71c   :  { %v3602_v7 = vpop.xlane.xlu1 %3601 }
 0x720   :  { %v3605_v4 = vpop.xlane.xlu1 %3604 }
 0x724   :  { %v3608_v9 = vpop.xlane.xlu0 %3607 }
 0x728   :  { %v3611_v10 = vpop.xlane.xlu1 %3610 }
 0x72c   :  { %v3614_v36 = vpop.xlane.xlu0 %3613 }
 0x730   :  { %v3617_v12 = vpop.xlane.xlu1 %3616 }
 0x754   :  { %v3649_v48 = vpop.xlane.xlu0 %3648 }
 0x755   :  { %v3672_v32 = vsel %vm3671_vm1, %v3596_v6, %v3649_v48 }
 0x756   :  { %v3687_v44 = vadd.f32 %v4056_v39, %v3672_v32 }
 0x758   :  { %3696 = vst.msk [vmem:[%s5410_s21] sm:$0xff] %vm3695_vm2, %v3687_v44  ;;  %v3652_v14 = vpop.xlane.xlu1 %3651 }
 0x759   :  { %v3673_v15 = vsel %vm3671_vm1, %v3599_v23, %v3652_v14 }
 0x75a   :  { %v3688_v16 = vadd.f32 %v4056_v39, %v3673_v15 }
 0x75c   :  { %3697 = vst.msk [vmem:[%s5410_s21 + $0x8] sm:$0xff] %vm3695_vm2, %v3688_v16  ;;  %v3655_v46 = vpop.xlane.xlu0 %3654 }
 0x75d   :  { %v3674_v13 = vsel %vm3671_vm1, %v3602_v7, %v3655_v46 }
 0x75e   :  { %v3689_v17 = vadd.f32 %v4056_v39, %v3674_v13 }
 0x760   :  { %3698 = vst.msk [vmem:[%s5410_s21 + $0x10] sm:$0xff] %vm3695_vm2, %v3689_v17  ;;  %v3658_v3 = vpop.xlane.xlu1 %3657 }
 0x761   :  { %v3675_v18 = vsel %vm3671_vm1, %v3605_v4, %v3658_v3 }
 0x762   :  { %v3690_v1 = vadd.f32 %v4056_v39, %v3675_v18 }
 0x764   :  { %3699 = vst.msk [vmem:[%s5410_s21 + $0x18] sm:$0xff] %vm3695_vm2, %v3690_v1  ;;  %v3661_v19 = vpop.xlane.xlu0 %3660 }
 0x765   :  { %v3676_v20 = vsel %vm3671_vm1, %v3608_v9, %v3661_v19 }
 0x766   :  { %v3691_v21 = vadd.f32 %v4056_v39, %v3676_v20 }
 0x768   :  { %3700 = vst.msk [vmem:[%s5410_s21 + $0x20] sm:$0xff] %vm3695_vm2, %v3691_v21  ;;  %v3664_v22 = vpop.xlane.xlu1 %3663 }
 0x769   :  { %v3677_v8 = vsel %vm3671_vm1, %v3611_v10, %v3664_v22 }
 0x76a   :  { %v3692_v24 = vadd.f32 %v4056_v39, %v3677_v8 }
 0x76c   :  { %3701 = vst.msk [vmem:[%s5410_s21 + $0x28] sm:$0xff] %vm3695_vm2, %v3692_v24  ;;  %v3667_v41 = vpop.xlane.xlu0 %3666 }
 0x76d   :  { %v3678_v25 = vsel %vm3671_vm1, %v3614_v36, %v3667_v41 }
 0x76e   :  { %v3693_v26 = vadd.f32 %v4056_v39, %v3678_v25 }
 0x770   :  { %3702 = vst.msk [vmem:[%s5410_s21 + $0x30] sm:$0xff] %vm3695_vm2, %v3693_v26  ;;  %v3670_v47 = vpop.xlane.xlu1 %3669 }
 0x771   :  { %v3679_v5 = vsel %vm3671_vm1, %v3617_v12, %v3670_v47 }
 0x772   :  { %v3694_v53 = vadd.f32 %v4056_v39, %v3679_v5 }
 0x774   :  { %3703 = vst.msk [vmem:[%s5410_s21 + $0x38] sm:$0xff] %vm3695_vm2, %v3694_v53 }
 0x775   :  { %3708 = vsyncpa [#allocation3], 1 }
 0x776   :  { %3709 = vsyncpa [#allocation5], 1 }
 0x777   :  { %3710 = vsyncpa [#allocation8], 1 }
 0x778   :  { %3711 = vsyncpa [#allocation11], 1 }
 0x779   :  { %3712 = vsyncpa [#allocation14], 1 }
 0x77a   :  { %3713 = vsyncpa [#allocation17], 1 }
 0x77b   :  { %3714 = vsyncpa [#allocation20], 1 }

</bundles_post_ra>
